<compile_context>
chip_gen: v5e
topology: v5e:2x2
jax: 0.10.0
libtpu: 0.0.40
codegen_flags: <defaults>
</compile_context>

<pallas_src>
import jax
import jax.numpy as jnp
from jax import lax
from jax.experimental import pallas as pl
from jax.experimental.pallas import tpu as pltpu

# ---------------------------------------------------------------------------
# Fixed network geometry (CIFAR-10 LeNet):
# 32x32x3 -> conv5(6) -> pool2 -> conv5(16) -> pool2 -> fc 400->120->84->classes
# ---------------------------------------------------------------------------
H0, W0, C0 = 32, 32, 3
KSZ = 5
C1 = 6
H1, W1 = H0 - KSZ + 1, W0 - KSZ + 1        # 28, 28
P1H, P1W = H1 // 2, W1 // 2                # 14, 14
C2 = 16
H2, W2 = P1H - KSZ + 1, P1W - KSZ + 1      # 10, 10
P2H, P2W = H2 // 2, W2 // 2                # 5, 5
F1, F2 = 120, 84
PAD_N = 128                                # lane-dense padded logits width
B_TILE = 64                                # images per grid step (sublane batch)

# Pooled activations keep their full lane width (no lane compaction): the width
# slot index runs over 2*P-1 positions, only even slots hold valid pooled values,
# and the consumer weights (band2 / fc1) have zero rows for the odd slots.
P1_POS = 2 * P1W - 1                       # 27
P1_LANES = P1_POS * C1                     # 162
P2_POS = 2 * P2W - 1                       # 9
P2_LANES = P2_POS * C2                     # 144


# ---------------------------------------------------------------------------
# Fused kernel: one batch-tile (B_TILE images) per grid step; all weights and
# inter-layer activations stay in VMEM.
# ---------------------------------------------------------------------------
def _netcifar10_kernel(x_ref, band1_ref, b1_ref, band2_ref, b2_ref,
                       fc1w_ref, fc1b_ref, fc2w_ref, fc2b_ref,
                       fc3w_ref, fc3b_ref, out_ref,
                       p1_buf, p2_buf):
    f32 = jnp.float32
    bf16 = jnp.bfloat16
    bt = x_ref.shape[1]                    # B_TILE

    # ---- conv1 + ReLU + 2x2 maxpool, fused per pooled output row ----
    def conv1_row(pr, carry):
        r0 = pr * 2
        acc0 = jnp.zeros((bt, W1 * C1), f32)
        acc1 = jnp.zeros((bt, W1 * C1), f32)
        for ki in range(KSZ):              # banded conv: 5 accumulated MXU matmuls/row
            acc0 += jnp.dot(x_ref[r0 + ki], band1_ref[ki], preferred_element_type=f32)
            acc1 += jnp.dot(x_ref[r0 + 1 + ki], band1_ref[ki], preferred_element_type=f32)
        # row pool + bias + ReLU (ReLU/max commute, bias added once)
        y = jnp.maximum(jnp.maximum(acc0, acc1) + b1_ref[...], 0.0)
        # column pool: max with a lane-shifted view; odd width slots stay (and are
        # zeroed out by band2's zero rows), so no narrow compaction stores.
        yc = jnp.maximum(y[:, :P1_LANES], y[:, C1:C1 + P1_LANES])
        p1_buf[pr] = yc.astype(bf16)
        return carry

    lax.fori_loop(0, P1H, conv1_row, None)

    # ---- conv2 + ReLU + 2x2 maxpool, same structure ----
    def conv2_row(pr, carry):
        r0 = pr * 2
        acc0 = jnp.zeros((bt, W2 * C2), f32)
        acc1 = jnp.zeros((bt, W2 * C2), f32)
        for ki in range(KSZ):
            acc0 += jnp.dot(p1_buf[r0 + ki], band2_ref[ki], preferred_element_type=f32)
            acc1 += jnp.dot(p1_buf[r0 + 1 + ki], band2_ref[ki], preferred_element_type=f32)
        y = jnp.maximum(jnp.maximum(acc0, acc1) + b2_ref[...], 0.0)
        yc = jnp.maximum(y[:, :P2_LANES], y[:, C2:C2 + P2_LANES])
        p2_buf[pr] = yc.astype(bf16)
        return carry

    lax.fori_loop(0, P2H, conv2_row, None)

    # ---- fc1 + ReLU: torch CHW flatten folded into permuted, zero-padded
    #      per-row weight slabs -> 5 matmuls of (B_TILE,144)@(144,120) ----
    acc = jnp.zeros((bt, F1), f32)
    for h in range(P2H):
        acc += jnp.dot(p2_buf[h], fc1w_ref[h], preferred_element_type=f32)
    f = jnp.maximum(acc + fc1b_ref[...], 0.0)

    # ---- fc2 + ReLU, fc3 (zero-padded to a lane-dense 128-wide output) ----
    f = jnp.maximum(jnp.dot(f.astype(bf16), fc2w_ref[...],
                            preferred_element_type=f32) + fc2b_ref[...], 0.0)
    out_ref[...] = (jnp.dot(f.astype(bf16), fc3w_ref[...],
                            preferred_element_type=f32) + fc3b_ref[...])


# ---------------------------------------------------------------------------
# Trace-time weight preparation
# ---------------------------------------------------------------------------
def _conv_band_weights(w_oihw, pos_of_w, n_pos, w_out):
    """band[ki][pos*I + i, w*O + o] = sum_kj [pos == pos_of_w[w+kj]] * w[o, i, ki, kj].

    `pos_of_w[w]` maps a conv-input width index to its lane position in the
    (uncompacted) input activation; odd/unused positions get all-zero rows.
    """
    O, I, KH, KW = w_oihw.shape
    w_t = jnp.transpose(w_oihw, (2, 3, 1, 0)).astype(jnp.float32)   # (KH, KW, I, O)
    pos_of_w = jnp.asarray(pos_of_w, jnp.int32)
    bands = []
    for ki in range(KH):
        m = jnp.zeros((n_pos * I, w_out * O), jnp.float32)
        for kj in range(KW):
            sel = (jnp.arange(n_pos)[:, None]
                   == pos_of_w[None, kj:kj + w_out]).astype(jnp.float32)
            m = m + jnp.einsum("pw,io->piwo", sel, w_t[ki, kj]).reshape(n_pos * I,
                                                                        w_out * O)
        bands.append(m)
    return jnp.stack(bands)                                          # (KH, n_pos*I, w_out*O)


# ---------------------------------------------------------------------------
# Forward pass (mirrors NetCifar10.forward)
# ---------------------------------------------------------------------------
def net_cifar10_forward(params, x_nchw):
    B = x_nchw.shape[0]
    nc = params["fc3_w"].shape[1]
    assert nc <= PAD_N
    bf16 = jnp.bfloat16

    # Pad batch to a multiple of B_TILE; relayout NCHW -> (H, B, W*C) with channel
    # fastest in the lanes; cast to bf16 (matmul LHS, f32 accumulation in-kernel).
    bp = ((B + B_TILE - 1) // B_TILE) * B_TILE
    x = jnp.pad(x_nchw.astype(jnp.float32), ((0, bp - B), (0, 0), (0, 0), (0, 0)))
    x = jnp.transpose(x, (2, 0, 3, 1)).reshape(H0, bp, W0 * C0).astype(bf16)

    # Banded conv weights (tiny trace-time prep).
    band1 = _conv_band_weights(params["conv1_w"], jnp.arange(W0), W0, W1).astype(bf16)
    bias1 = jnp.tile(params["conv1_b"].astype(jnp.float32), W1).reshape(1, W1 * C1)
    band2 = _conv_band_weights(params["conv2_w"], 2 * jnp.arange(P1W),
                               P1_POS, W2).astype(bf16)
    bias2 = jnp.tile(params["conv2_b"].astype(jnp.float32), W2).reshape(1, W2 * C2)

    # fc1: rows reordered from torch's (C,H,W) flatten order into per-row (h) slabs
    # indexed by the uncompacted pooled lane layout (only even width slots populated).
    hh, wp, cc = jnp.meshgrid(jnp.arange(P2H), jnp.arange(P2W), jnp.arange(C2),
                              indexing="ij")
    torch_row = cc * (P2H * P2W) + hh * P2W + wp
    lane = (2 * wp) * C2 + cc
    fc1w = jnp.zeros((P2H, P2_LANES, F1), jnp.float32).at[hh, lane].set(
        params["fc1_w"].astype(jnp.float32)[torch_row]).astype(bf16)
    fc1b = params["fc1_b"].astype(jnp.float32).reshape(1, F1)
    fc2w = params["fc2_w"].astype(bf16)
    fc2b = params["fc2_b"].astype(jnp.float32).reshape(1, F2)
    fc3w = jnp.zeros((F2, PAD_N), jnp.float32).at[:, :nc].set(
        params["fc3_w"].astype(jnp.float32)).astype(bf16)
    fc3b = jnp.zeros((1, PAD_N), jnp.float32).at[0, :nc].set(
        params["fc3_b"].astype(jnp.float32))

    out = pl.pallas_call(
        _netcifar10_kernel,
        out_shape=jax.ShapeDtypeStruct((bp, PAD_N), jnp.float32),
        grid=(bp // B_TILE,),
        in_specs=[
            pl.BlockSpec((H0, B_TILE, W0 * C0), lambda i: (0, i, 0)),     # batch tile
            pl.BlockSpec((KSZ, W0 * C0, W1 * C1), lambda i: (0, 0, 0)),   # band1 (resident)
            pl.BlockSpec((1, W1 * C1), lambda i: (0, 0)),                 # conv1 bias row
            pl.BlockSpec((KSZ, P1_LANES, W2 * C2), lambda i: (0, 0, 0)),  # band2 (resident)
            pl.BlockSpec((1, W2 * C2), lambda i: (0, 0)),                 # conv2 bias row
            pl.BlockSpec((P2H, P2_LANES, F1), lambda i: (0, 0, 0)),       # fc1 weight slabs
            pl.BlockSpec((1, F1), lambda i: (0, 0)),                      # fc1 bias
            pl.BlockSpec((F1, F2), lambda i: (0, 0)),                     # fc2 weight
            pl.BlockSpec((1, F2), lambda i: (0, 0)),                      # fc2 bias
            pl.BlockSpec((F2, PAD_N), lambda i: (0, 0)),                  # fc3 weight (padded)
            pl.BlockSpec((1, PAD_N), lambda i: (0, 0)),                   # fc3 bias (padded)
        ],
        out_specs=pl.BlockSpec((B_TILE, PAD_N), lambda i: (i, 0)),        # lane-dense logits
        scratch_shapes=[
            pltpu.VMEM((P1H, B_TILE, P1_LANES), jnp.bfloat16),   # pooled conv1 (conv2 LHS)
            pltpu.VMEM((P2H, B_TILE, P2_LANES), jnp.bfloat16),   # pooled conv2 (fc1 LHS)
        ],
        compiler_params=pltpu.CompilerParams(
            dimension_semantics=("parallel",)),   # v7x: two TCs split the batch tiles
    )(x, band1, bias1, band2, bias2, fc1w, fc1b, fc2w, fc2b, fc3w, fc3b)

    return out[:B, :nc]


# ---------------------------------------------------------------------------
# Pure-JAX reference (for a correctness check) and synthetic params
# ---------------------------------------------------------------------------
def _reference_forward(params, x_nchw):
    hi = jax.lax.Precision.HIGHEST
    x = jnp.transpose(x_nchw, (0, 2, 3, 1)).astype(jnp.float32)

    def conv(h, w, b):
        dn = jax.lax.conv_dimension_numbers(h.shape, w.shape, ("NHWC", "OIHW", "NHWC"))
        y = jax.lax.conv_general_dilated(h, w, (1, 1), "VALID",
                                         dimension_numbers=dn, precision=hi)
        return jax.nn.relu(y + b)

    def pool(h):
        return jax.lax.reduce_window(h, -jnp.inf, jax.lax.max,
                                     (1, 2, 2, 1), (1, 2, 2, 1), "VALID")

    x = pool(conv(x, params["conv1_w"], params["conv1_b"]))
    x = pool(conv(x, params["conv2_w"], params["conv2_b"]))
    B = x.shape[0]
    x = jnp.transpose(x, (0, 3, 1, 2)).reshape(B, C2 * P2H * P2W)
    x = jax.nn.relu(jnp.dot(x, params["fc1_w"], precision=hi) + params["fc1_b"])
    x = jax.nn.relu(jnp.dot(x, params["fc2_w"], precision=hi) + params["fc2_b"])
    return jnp.dot(x, params["fc3_w"], precision=hi) + params["fc3_b"]


def init_params(key, num_classes):
    def u(k, shape, fan_in):
        bound = 1.0 / jnp.sqrt(jnp.float32(fan_in))
        return jax.random.uniform(k, shape, jnp.float32, -bound, bound)

    keys = jax.random.split(key, 10)
    return {
        # conv weights in PyTorch (out_ch, in_ch, kh, kw) layout
        "conv1_w": u(keys[0], (6, 3, 5, 5), 3 * 5 * 5),
        "conv1_b": u(keys[1], (6,), 3 * 5 * 5),
        "conv2_w": u(keys[2], (16, 6, 5, 5), 6 * 5 * 5),
        "conv2_b": u(keys[3], (16,), 6 * 5 * 5),
        # linear weights stored transposed: (in, out); fc1 rows in torch CHW order
        "fc1_w": u(keys[4], (16 * 5 * 5, 120), 16 * 5 * 5),
        "fc1_b": u(keys[5], (120,), 16 * 5 * 5),
        "fc2_w": u(keys[6], (120, 84), 120),
        "fc2_b": u(keys[7], (84,), 120),
        "fc3_w": u(keys[8], (84, num_classes), 84),
        "fc3_b": u(keys[9], (num_classes,), 84),
    }


if __name__ == "__main__":
    num_classes = 10
    key = jax.random.PRNGKey(0)
    k_params, k_x = jax.random.split(key)

    params = init_params(k_params, num_classes)
    # Spatial size must be 32x32 so the 16*5*5 flatten matches fc1 (as in the module).
    x = jax.random.normal(k_x, (2, 3, 32, 32), jnp.float32)

    out = jax.jit(net_cifar10_forward)(params, x)
    out = jax.block_until_ready(out)
    assert out.shape == (2, num_classes), out.shape
    assert bool(jnp.all(jnp.isfinite(out)))

    ref = jax.block_until_ready(jax.jit(_reference_forward)(params, x))
    max_err = float(jnp.max(jnp.abs(out - ref)))
    # bf16 matmul operands (f32 accumulation) vs. the f32 HIGHEST-precision reference.
    assert max_err < 2e-2, f"mismatch vs reference: {max_err}"

    print("KERNEL_OK")
</pallas_src>

<mosaic_0001>
module attributes {stable_mosaic.version = 11 : i64} {
  func.func @_netcifar10_kernel(%arg0: i32, %arg1: memref<32x64x96xbf16, #tpu.memory_space<vmem>>, %arg2: memref<5x96x168xbf16, #tpu.memory_space<vmem>>, %arg3: memref<1x168xf32, #tpu.memory_space<vmem>>, %arg4: memref<5x162x160xbf16, #tpu.memory_space<vmem>>, %arg5: memref<1x160xf32, #tpu.memory_space<vmem>>, %arg6: memref<5x144x120xbf16, #tpu.memory_space<vmem>>, %arg7: memref<1x120xf32, #tpu.memory_space<vmem>>, %arg8: memref<120x84xbf16, #tpu.memory_space<vmem>>, %arg9: memref<1x84xf32, #tpu.memory_space<vmem>>, %arg10: memref<84x128xbf16, #tpu.memory_space<vmem>>, %arg11: memref<1x128xf32, #tpu.memory_space<vmem>>, %arg12: memref<64x128xf32, #tpu.memory_space<vmem>>, %arg13: memref<14x64x162xbf16, #tpu.memory_space<vmem>>, %arg14: memref<5x64x144xbf16, #tpu.memory_space<vmem>>) attributes {dimension_semantics = [#tpu.dimension_semantics<parallel>], iteration_bounds = array<i64: 1>, scalar_prefetch = 0 : i64, scratch_operands = 2 : i64, tpu.core_type = #tpu.core_type<tc>, window_params = [{transform_indices = @transform_0, window_bounds = array<i64: 32, 64, 96>}, {pipeline_mode = #tpu.pipeline_mode<synchronous>, transform_indices = @transform_1, window_bounds = array<i64: 5, 96, 168>}, {pipeline_mode = #tpu.pipeline_mode<synchronous>, transform_indices = @transform_2, window_bounds = array<i64: 1, 168>}, {pipeline_mode = #tpu.pipeline_mode<synchronous>, transform_indices = @transform_3, window_bounds = array<i64: 5, 162, 160>}, {pipeline_mode = #tpu.pipeline_mode<synchronous>, transform_indices = @transform_4, window_bounds = array<i64: 1, 160>}, {pipeline_mode = #tpu.pipeline_mode<synchronous>, transform_indices = @transform_5, window_bounds = array<i64: 5, 144, 120>}, {pipeline_mode = #tpu.pipeline_mode<synchronous>, transform_indices = @transform_6, window_bounds = array<i64: 1, 120>}, {pipeline_mode = #tpu.pipeline_mode<synchronous>, transform_indices = @transform_7, window_bounds = array<i64: 120, 84>}, {pipeline_mode = #tpu.pipeline_mode<synchronous>, transform_indices = @transform_8, window_bounds = array<i64: 1, 84>}, {pipeline_mode = #tpu.pipeline_mode<synchronous>, transform_indices = @transform_9, window_bounds = array<i64: 84, 128>}, {pipeline_mode = #tpu.pipeline_mode<synchronous>, transform_indices = @transform_10, window_bounds = array<i64: 1, 128>}, {transform_indices = @transform_11, window_bounds = array<i64: 64, 128>}]} {
    %c0_i32 = arith.constant 0 : i32
    %c14_i32 = arith.constant 14 : i32
    %0 = arith.addi %c0_i32, %c14_i32 : i32
    %c1_i32 = arith.constant 1 : i32
    scf.for %arg15 = %c0_i32 to %0 step %c1_i32  : i32 {
      %c2_i32 = arith.constant 2 : i32
      %53 = arith.muli %arg15, %c2_i32 : i32
      %cst_50 = arith.constant 0.000000e+00 : f32
      %54 = vector.broadcast %cst_50 : f32 to vector<64x168xf32>
      %cst_51 = arith.constant 0.000000e+00 : f32
      %55 = vector.broadcast %cst_51 : f32 to vector<64x168xf32>
      %c0_i32_52 = arith.constant 0 : i32
      %56 = arith.addi %53, %c0_i32_52 : i32
      %57 = arith.index_cast %56 : i32 to index
      %c0_53 = arith.constant 0 : index
      %c0_54 = arith.constant 0 : index
      %58 = vector.load %arg1[%57, %c0_53, %c0_54] : memref<32x64x96xbf16, #tpu.memory_space<vmem>>, vector<1x64x96xbf16>
      %59 = vector.shape_cast %58 : vector<1x64x96xbf16> to vector<64x96xbf16>
      %c0_55 = arith.constant 0 : index
      %c0_56 = arith.constant 0 : index
      %c0_57 = arith.constant 0 : index
      %60 = vector.load %arg2[%c0_55, %c0_56, %c0_57] : memref<5x96x168xbf16, #tpu.memory_space<vmem>>, vector<1x96x168xbf16>
      %61 = vector.shape_cast %60 : vector<1x96x168xbf16> to vector<96x168xbf16>
      %cst_58 = arith.constant dense<0.000000e+00> : vector<64x168xf32>
      %62 = tpu.matmul %59, %61, %cst_58 {dimension_numbers = #tpu.dot_dimension_numbers<[1], [0], [0], [1], [0, 0, 1, 1], [], []>} : vector<64x96xbf16>, vector<96x168xbf16>, vector<64x168xf32> -> vector<64x168xf32>
      %63 = arith.addf %54, %62 : vector<64x168xf32>
      %c1_i32_59 = arith.constant 1 : i32
      %64 = arith.addi %53, %c1_i32_59 : i32
      %c0_i32_60 = arith.constant 0 : i32
      %65 = arith.addi %64, %c0_i32_60 : i32
      %66 = arith.index_cast %65 : i32 to index
      %c0_61 = arith.constant 0 : index
      %c0_62 = arith.constant 0 : index
      %67 = vector.load %arg1[%66, %c0_61, %c0_62] : memref<32x64x96xbf16, #tpu.memory_space<vmem>>, vector<1x64x96xbf16>
      %68 = vector.shape_cast %67 : vector<1x64x96xbf16> to vector<64x96xbf16>
      %c0_63 = arith.constant 0 : index
      %c0_64 = arith.constant 0 : index
      %c0_65 = arith.constant 0 : index
      %69 = vector.load %arg2[%c0_63, %c0_64, %c0_65] : memref<5x96x168xbf16, #tpu.memory_space<vmem>>, vector<1x96x168xbf16>
      %70 = vector.shape_cast %69 : vector<1x96x168xbf16> to vector<96x168xbf16>
      %cst_66 = arith.constant dense<0.000000e+00> : vector<64x168xf32>
      %71 = tpu.matmul %68, %70, %cst_66 {dimension_numbers = #tpu.dot_dimension_numbers<[1], [0], [0], [1], [0, 0, 1, 1], [], []>} : vector<64x96xbf16>, vector<96x168xbf16>, vector<64x168xf32> -> vector<64x168xf32>
      %72 = arith.addf %55, %71 : vector<64x168xf32>
      %c1_i32_67 = arith.constant 1 : i32
      %73 = arith.addi %53, %c1_i32_67 : i32
      %74 = arith.index_cast %73 : i32 to index
      %c0_68 = arith.constant 0 : index
      %c0_69 = arith.constant 0 : index
      %75 = vector.load %arg1[%74, %c0_68, %c0_69] : memref<32x64x96xbf16, #tpu.memory_space<vmem>>, vector<1x64x96xbf16>
      %76 = vector.shape_cast %75 : vector<1x64x96xbf16> to vector<64x96xbf16>
      %c1_70 = arith.constant 1 : index
      %c0_71 = arith.constant 0 : index
      %c0_72 = arith.constant 0 : index
      %77 = vector.load %arg2[%c1_70, %c0_71, %c0_72] : memref<5x96x168xbf16, #tpu.memory_space<vmem>>, vector<1x96x168xbf16>
      %78 = vector.shape_cast %77 : vector<1x96x168xbf16> to vector<96x168xbf16>
      %cst_73 = arith.constant dense<0.000000e+00> : vector<64x168xf32>
      %79 = tpu.matmul %76, %78, %cst_73 {dimension_numbers = #tpu.dot_dimension_numbers<[1], [0], [0], [1], [0, 0, 1, 1], [], []>} : vector<64x96xbf16>, vector<96x168xbf16>, vector<64x168xf32> -> vector<64x168xf32>
      %80 = arith.addf %63, %79 : vector<64x168xf32>
      %c1_i32_74 = arith.constant 1 : i32
      %81 = arith.addi %53, %c1_i32_74 : i32
      %c1_i32_75 = arith.constant 1 : i32
      %82 = arith.addi %81, %c1_i32_75 : i32
      %83 = arith.index_cast %82 : i32 to index
      %c0_76 = arith.constant 0 : index
      %c0_77 = arith.constant 0 : index
      %84 = vector.load %arg1[%83, %c0_76, %c0_77] : memref<32x64x96xbf16, #tpu.memory_space<vmem>>, vector<1x64x96xbf16>
      %85 = vector.shape_cast %84 : vector<1x64x96xbf16> to vector<64x96xbf16>
      %c1_78 = arith.constant 1 : index
      %c0_79 = arith.constant 0 : index
      %c0_80 = arith.constant 0 : index
      %86 = vector.load %arg2[%c1_78, %c0_79, %c0_80] : memref<5x96x168xbf16, #tpu.memory_space<vmem>>, vector<1x96x168xbf16>
      %87 = vector.shape_cast %86 : vector<1x96x168xbf16> to vector<96x168xbf16>
      %cst_81 = arith.constant dense<0.000000e+00> : vector<64x168xf32>
      %88 = tpu.matmul %85, %87, %cst_81 {dimension_numbers = #tpu.dot_dimension_numbers<[1], [0], [0], [1], [0, 0, 1, 1], [], []>} : vector<64x96xbf16>, vector<96x168xbf16>, vector<64x168xf32> -> vector<64x168xf32>
      %89 = arith.addf %72, %88 : vector<64x168xf32>
      %c2_i32_82 = arith.constant 2 : i32
      %90 = arith.addi %53, %c2_i32_82 : i32
      %91 = arith.index_cast %90 : i32 to index
      %c0_83 = arith.constant 0 : index
      %c0_84 = arith.constant 0 : index
      %92 = vector.load %arg1[%91, %c0_83, %c0_84] : memref<32x64x96xbf16, #tpu.memory_space<vmem>>, vector<1x64x96xbf16>
      %93 = vector.shape_cast %92 : vector<1x64x96xbf16> to vector<64x96xbf16>
      %c2_85 = arith.constant 2 : index
      %c0_86 = arith.constant 0 : index
      %c0_87 = arith.constant 0 : index
      %94 = vector.load %arg2[%c2_85, %c0_86, %c0_87] : memref<5x96x168xbf16, #tpu.memory_space<vmem>>, vector<1x96x168xbf16>
      %95 = vector.shape_cast %94 : vector<1x96x168xbf16> to vector<96x168xbf16>
      %cst_88 = arith.constant dense<0.000000e+00> : vector<64x168xf32>
      %96 = tpu.matmul %93, %95, %cst_88 {dimension_numbers = #tpu.dot_dimension_numbers<[1], [0], [0], [1], [0, 0, 1, 1], [], []>} : vector<64x96xbf16>, vector<96x168xbf16>, vector<64x168xf32> -> vector<64x168xf32>
      %97 = arith.addf %80, %96 : vector<64x168xf32>
      %c1_i32_89 = arith.constant 1 : i32
      %98 = arith.addi %53, %c1_i32_89 : i32
      %c2_i32_90 = arith.constant 2 : i32
      %99 = arith.addi %98, %c2_i32_90 : i32
      %100 = arith.index_cast %99 : i32 to index
      %c0_91 = arith.constant 0 : index
      %c0_92 = arith.constant 0 : index
      %101 = vector.load %arg1[%100, %c0_91, %c0_92] : memref<32x64x96xbf16, #tpu.memory_space<vmem>>, vector<1x64x96xbf16>
      %102 = vector.shape_cast %101 : vector<1x64x96xbf16> to vector<64x96xbf16>
      %c2_93 = arith.constant 2 : index
      %c0_94 = arith.constant 0 : index
      %c0_95 = arith.constant 0 : index
      %103 = vector.load %arg2[%c2_93, %c0_94, %c0_95] : memref<5x96x168xbf16, #tpu.memory_space<vmem>>, vector<1x96x168xbf16>
      %104 = vector.shape_cast %103 : vector<1x96x168xbf16> to vector<96x168xbf16>
      %cst_96 = arith.constant dense<0.000000e+00> : vector<64x168xf32>
      %105 = tpu.matmul %102, %104, %cst_96 {dimension_numbers = #tpu.dot_dimension_numbers<[1], [0], [0], [1], [0, 0, 1, 1], [], []>} : vector<64x96xbf16>, vector<96x168xbf16>, vector<64x168xf32> -> vector<64x168xf32>
      %106 = arith.addf %89, %105 : vector<64x168xf32>
      %c3_i32 = arith.constant 3 : i32
      %107 = arith.addi %53, %c3_i32 : i32
      %108 = arith.index_cast %107 : i32 to index
      %c0_97 = arith.constant 0 : index
      %c0_98 = arith.constant 0 : index
      %109 = vector.load %arg1[%108, %c0_97, %c0_98] : memref<32x64x96xbf16, #tpu.memory_space<vmem>>, vector<1x64x96xbf16>
      %110 = vector.shape_cast %109 : vector<1x64x96xbf16> to vector<64x96xbf16>
      %c3_99 = arith.constant 3 : index
      %c0_100 = arith.constant 0 : index
      %c0_101 = arith.constant 0 : index
      %111 = vector.load %arg2[%c3_99, %c0_100, %c0_101] : memref<5x96x168xbf16, #tpu.memory_space<vmem>>, vector<1x96x168xbf16>
      %112 = vector.shape_cast %111 : vector<1x96x168xbf16> to vector<96x168xbf16>
      %cst_102 = arith.constant dense<0.000000e+00> : vector<64x168xf32>
      %113 = tpu.matmul %110, %112, %cst_102 {dimension_numbers = #tpu.dot_dimension_numbers<[1], [0], [0], [1], [0, 0, 1, 1], [], []>} : vector<64x96xbf16>, vector<96x168xbf16>, vector<64x168xf32> -> vector<64x168xf32>
      %114 = arith.addf %97, %113 : vector<64x168xf32>
      %c1_i32_103 = arith.constant 1 : i32
      %115 = arith.addi %53, %c1_i32_103 : i32
      %c3_i32_104 = arith.constant 3 : i32
      %116 = arith.addi %115, %c3_i32_104 : i32
      %117 = arith.index_cast %116 : i32 to index
      %c0_105 = arith.constant 0 : index
      %c0_106 = arith.constant 0 : index
      %118 = vector.load %arg1[%117, %c0_105, %c0_106] : memref<32x64x96xbf16, #tpu.memory_space<vmem>>, vector<1x64x96xbf16>
      %119 = vector.shape_cast %118 : vector<1x64x96xbf16> to vector<64x96xbf16>
      %c3_107 = arith.constant 3 : index
      %c0_108 = arith.constant 0 : index
      %c0_109 = arith.constant 0 : index
      %120 = vector.load %arg2[%c3_107, %c0_108, %c0_109] : memref<5x96x168xbf16, #tpu.memory_space<vmem>>, vector<1x96x168xbf16>
      %121 = vector.shape_cast %120 : vector<1x96x168xbf16> to vector<96x168xbf16>
      %cst_110 = arith.constant dense<0.000000e+00> : vector<64x168xf32>
      %122 = tpu.matmul %119, %121, %cst_110 {dimension_numbers = #tpu.dot_dimension_numbers<[1], [0], [0], [1], [0, 0, 1, 1], [], []>} : vector<64x96xbf16>, vector<96x168xbf16>, vector<64x168xf32> -> vector<64x168xf32>
      %123 = arith.addf %106, %122 : vector<64x168xf32>
      %c4_i32 = arith.constant 4 : i32
      %124 = arith.addi %53, %c4_i32 : i32
      %125 = arith.index_cast %124 : i32 to index
      %c0_111 = arith.constant 0 : index
      %c0_112 = arith.constant 0 : index
      %126 = vector.load %arg1[%125, %c0_111, %c0_112] : memref<32x64x96xbf16, #tpu.memory_space<vmem>>, vector<1x64x96xbf16>
      %127 = vector.shape_cast %126 : vector<1x64x96xbf16> to vector<64x96xbf16>
      %c4_113 = arith.constant 4 : index
      %c0_114 = arith.constant 0 : index
      %c0_115 = arith.constant 0 : index
      %128 = vector.load %arg2[%c4_113, %c0_114, %c0_115] : memref<5x96x168xbf16, #tpu.memory_space<vmem>>, vector<1x96x168xbf16>
      %129 = vector.shape_cast %128 : vector<1x96x168xbf16> to vector<96x168xbf16>
      %cst_116 = arith.constant dense<0.000000e+00> : vector<64x168xf32>
      %130 = tpu.matmul %127, %129, %cst_116 {dimension_numbers = #tpu.dot_dimension_numbers<[1], [0], [0], [1], [0, 0, 1, 1], [], []>} : vector<64x96xbf16>, vector<96x168xbf16>, vector<64x168xf32> -> vector<64x168xf32>
      %131 = arith.addf %114, %130 : vector<64x168xf32>
      %c1_i32_117 = arith.constant 1 : i32
      %132 = arith.addi %53, %c1_i32_117 : i32
      %c4_i32_118 = arith.constant 4 : i32
      %133 = arith.addi %132, %c4_i32_118 : i32
      %134 = arith.index_cast %133 : i32 to index
      %c0_119 = arith.constant 0 : index
      %c0_120 = arith.constant 0 : index
      %135 = vector.load %arg1[%134, %c0_119, %c0_120] : memref<32x64x96xbf16, #tpu.memory_space<vmem>>, vector<1x64x96xbf16>
      %136 = vector.shape_cast %135 : vector<1x64x96xbf16> to vector<64x96xbf16>
      %c4_121 = arith.constant 4 : index
      %c0_122 = arith.constant 0 : index
      %c0_123 = arith.constant 0 : index
      %137 = vector.load %arg2[%c4_121, %c0_122, %c0_123] : memref<5x96x168xbf16, #tpu.memory_space<vmem>>, vector<1x96x168xbf16>
      %138 = vector.shape_cast %137 : vector<1x96x168xbf16> to vector<96x168xbf16>
      %cst_124 = arith.constant dense<0.000000e+00> : vector<64x168xf32>
      %139 = tpu.matmul %136, %138, %cst_124 {dimension_numbers = #tpu.dot_dimension_numbers<[1], [0], [0], [1], [0, 0, 1, 1], [], []>} : vector<64x96xbf16>, vector<96x168xbf16>, vector<64x168xf32> -> vector<64x168xf32>
      %140 = arith.addf %123, %139 : vector<64x168xf32>
      %141 = arith.maximumf %131, %140 : vector<64x168xf32>
      %c0_125 = arith.constant 0 : index
      %c0_126 = arith.constant 0 : index
      %142 = vector.load %arg3[%c0_125, %c0_126] : memref<1x168xf32, #tpu.memory_space<vmem>>, vector<1x168xf32>
      %143 = vector.broadcast %142 : vector<1x168xf32> to vector<64x168xf32>
      %144 = arith.addf %141, %143 : vector<64x168xf32>
      %cst_127 = arith.constant 0.000000e+00 : f32
      %145 = vector.broadcast %cst_127 : f32 to vector<64x168xf32>
      %146 = arith.maximumf %144, %145 : vector<64x168xf32>
      %147 = vector.extract_strided_slice %146 {offsets = [0, 0], sizes = [64, 162], strides = [1, 1]} : vector<64x168xf32> to vector<64x162xf32>
      %148 = vector.extract_strided_slice %146 {offsets = [0, 6], sizes = [64, 162], strides = [1, 1]} : vector<64x168xf32> to vector<64x162xf32>
      %149 = arith.maximumf %147, %148 : vector<64x162xf32>
      %150 = arith.truncf %149 : vector<64x162xf32> to vector<64x162xbf16>
      %151 = arith.index_cast %arg15 : i32 to index
      %c0_128 = arith.constant 0 : index
      %c0_129 = arith.constant 0 : index
      %152 = vector.load %arg13[%151, %c0_128, %c0_129] : memref<14x64x162xbf16, #tpu.memory_space<vmem>>, vector<1x64x162xbf16>
      %153 = vector.shape_cast %152 : vector<1x64x162xbf16> to vector<64x162xbf16>
      %154 = vector.shape_cast %150 : vector<64x162xbf16> to vector<1x64x162xbf16>
      tpu.vector_store %arg13[%151, %c0_128, %c0_129], %154 {strides = array<i32>} : memref<14x64x162xbf16, #tpu.memory_space<vmem>>, vector<1x64x162xbf16>,
    }
    %c14_i32_0 = arith.constant 14 : i32
    %c0_i32_1 = arith.constant 0 : i32
    %c5_i32 = arith.constant 5 : i32
    %1 = arith.addi %c0_i32_1, %c5_i32 : i32
    %c1_i32_2 = arith.constant 1 : i32
    scf.for %arg15 = %c0_i32_1 to %1 step %c1_i32_2  : i32 {
      %c2_i32 = arith.constant 2 : i32
      %53 = arith.muli %arg15, %c2_i32 : i32
      %cst_50 = arith.constant 0.000000e+00 : f32
      %54 = vector.broadcast %cst_50 : f32 to vector<64x160xf32>
      %cst_51 = arith.constant 0.000000e+00 : f32
      %55 = vector.broadcast %cst_51 : f32 to vector<64x160xf32>
      %c0_i32_52 = arith.constant 0 : i32
      %56 = arith.addi %53, %c0_i32_52 : i32
      %57 = arith.index_cast %56 : i32 to index
      %c0_53 = arith.constant 0 : index
      %c0_54 = arith.constant 0 : index
      %58 = vector.load %arg13[%57, %c0_53, %c0_54] : memref<14x64x162xbf16, #tpu.memory_space<vmem>>, vector<1x64x162xbf16>
      %59 = vector.shape_cast %58 : vector<1x64x162xbf16> to vector<64x162xbf16>
      %c0_55 = arith.constant 0 : index
      %c0_56 = arith.constant 0 : index
      %c0_57 = arith.constant 0 : index
      %60 = vector.load %arg4[%c0_55, %c0_56, %c0_57] : memref<5x162x160xbf16, #tpu.memory_space<vmem>>, vector<1x162x160xbf16>
      %61 = vector.shape_cast %60 : vector<1x162x160xbf16> to vector<162x160xbf16>
      %cst_58 = arith.constant dense<0.000000e+00> : vector<64x160xf32>
      %62 = tpu.matmul %59, %61, %cst_58 {dimension_numbers = #tpu.dot_dimension_numbers<[1], [0], [0], [1], [0, 0, 1, 1], [], []>} : vector<64x162xbf16>, vector<162x160xbf16>, vector<64x160xf32> -> vector<64x160xf32>
      %63 = arith.addf %54, %62 : vector<64x160xf32>
      %c1_i32_59 = arith.constant 1 : i32
      %64 = arith.addi %53, %c1_i32_59 : i32
      %c0_i32_60 = arith.constant 0 : i32
      %65 = arith.addi %64, %c0_i32_60 : i32
      %66 = arith.index_cast %65 : i32 to index
      %c0_61 = arith.constant 0 : index
      %c0_62 = arith.constant 0 : index
      %67 = vector.load %arg13[%66, %c0_61, %c0_62] : memref<14x64x162xbf16, #tpu.memory_space<vmem>>, vector<1x64x162xbf16>
      %68 = vector.shape_cast %67 : vector<1x64x162xbf16> to vector<64x162xbf16>
      %c0_63 = arith.constant 0 : index
      %c0_64 = arith.constant 0 : index
      %c0_65 = arith.constant 0 : index
      %69 = vector.load %arg4[%c0_63, %c0_64, %c0_65] : memref<5x162x160xbf16, #tpu.memory_space<vmem>>, vector<1x162x160xbf16>
      %70 = vector.shape_cast %69 : vector<1x162x160xbf16> to vector<162x160xbf16>
      %cst_66 = arith.constant dense<0.000000e+00> : vector<64x160xf32>
      %71 = tpu.matmul %68, %70, %cst_66 {dimension_numbers = #tpu.dot_dimension_numbers<[1], [0], [0], [1], [0, 0, 1, 1], [], []>} : vector<64x162xbf16>, vector<162x160xbf16>, vector<64x160xf32> -> vector<64x160xf32>
      %72 = arith.addf %55, %71 : vector<64x160xf32>
      %c1_i32_67 = arith.constant 1 : i32
      %73 = arith.addi %53, %c1_i32_67 : i32
      %74 = arith.index_cast %73 : i32 to index
      %c0_68 = arith.constant 0 : index
      %c0_69 = arith.constant 0 : index
      %75 = vector.load %arg13[%74, %c0_68, %c0_69] : memref<14x64x162xbf16, #tpu.memory_space<vmem>>, vector<1x64x162xbf16>
      %76 = vector.shape_cast %75 : vector<1x64x162xbf16> to vector<64x162xbf16>
      %c1_70 = arith.constant 1 : index
      %c0_71 = arith.constant 0 : index
      %c0_72 = arith.constant 0 : index
      %77 = vector.load %arg4[%c1_70, %c0_71, %c0_72] : memref<5x162x160xbf16, #tpu.memory_space<vmem>>, vector<1x162x160xbf16>
      %78 = vector.shape_cast %77 : vector<1x162x160xbf16> to vector<162x160xbf16>
      %cst_73 = arith.constant dense<0.000000e+00> : vector<64x160xf32>
      %79 = tpu.matmul %76, %78, %cst_73 {dimension_numbers = #tpu.dot_dimension_numbers<[1], [0], [0], [1], [0, 0, 1, 1], [], []>} : vector<64x162xbf16>, vector<162x160xbf16>, vector<64x160xf32> -> vector<64x160xf32>
      %80 = arith.addf %63, %79 : vector<64x160xf32>
      %c1_i32_74 = arith.constant 1 : i32
      %81 = arith.addi %53, %c1_i32_74 : i32
      %c1_i32_75 = arith.constant 1 : i32
      %82 = arith.addi %81, %c1_i32_75 : i32
      %83 = arith.index_cast %82 : i32 to index
      %c0_76 = arith.constant 0 : index
      %c0_77 = arith.constant 0 : index
      %84 = vector.load %arg13[%83, %c0_76, %c0_77] : memref<14x64x162xbf16, #tpu.memory_space<vmem>>, vector<1x64x162xbf16>
      %85 = vector.shape_cast %84 : vector<1x64x162xbf16> to vector<64x162xbf16>
      %c1_78 = arith.constant 1 : index
      %c0_79 = arith.constant 0 : index
      %c0_80 = arith.constant 0 : index
      %86 = vector.load %arg4[%c1_78, %c0_79, %c0_80] : memref<5x162x160xbf16, #tpu.memory_space<vmem>>, vector<1x162x160xbf16>
      %87 = vector.shape_cast %86 : vector<1x162x160xbf16> to vector<162x160xbf16>
      %cst_81 = arith.constant dense<0.000000e+00> : vector<64x160xf32>
      %88 = tpu.matmul %85, %87, %cst_81 {dimension_numbers = #tpu.dot_dimension_numbers<[1], [0], [0], [1], [0, 0, 1, 1], [], []>} : vector<64x162xbf16>, vector<162x160xbf16>, vector<64x160xf32> -> vector<64x160xf32>
      %89 = arith.addf %72, %88 : vector<64x160xf32>
      %c2_i32_82 = arith.constant 2 : i32
      %90 = arith.addi %53, %c2_i32_82 : i32
      %91 = arith.index_cast %90 : i32 to index
      %c0_83 = arith.constant 0 : index
      %c0_84 = arith.constant 0 : index
      %92 = vector.load %arg13[%91, %c0_83, %c0_84] : memref<14x64x162xbf16, #tpu.memory_space<vmem>>, vector<1x64x162xbf16>
      %93 = vector.shape_cast %92 : vector<1x64x162xbf16> to vector<64x162xbf16>
      %c2_85 = arith.constant 2 : index
      %c0_86 = arith.constant 0 : index
      %c0_87 = arith.constant 0 : index
      %94 = vector.load %arg4[%c2_85, %c0_86, %c0_87] : memref<5x162x160xbf16, #tpu.memory_space<vmem>>, vector<1x162x160xbf16>
      %95 = vector.shape_cast %94 : vector<1x162x160xbf16> to vector<162x160xbf16>
      %cst_88 = arith.constant dense<0.000000e+00> : vector<64x160xf32>
      %96 = tpu.matmul %93, %95, %cst_88 {dimension_numbers = #tpu.dot_dimension_numbers<[1], [0], [0], [1], [0, 0, 1, 1], [], []>} : vector<64x162xbf16>, vector<162x160xbf16>, vector<64x160xf32> -> vector<64x160xf32>
      %97 = arith.addf %80, %96 : vector<64x160xf32>
      %c1_i32_89 = arith.constant 1 : i32
      %98 = arith.addi %53, %c1_i32_89 : i32
      %c2_i32_90 = arith.constant 2 : i32
      %99 = arith.addi %98, %c2_i32_90 : i32
      %100 = arith.index_cast %99 : i32 to index
      %c0_91 = arith.constant 0 : index
      %c0_92 = arith.constant 0 : index
      %101 = vector.load %arg13[%100, %c0_91, %c0_92] : memref<14x64x162xbf16, #tpu.memory_space<vmem>>, vector<1x64x162xbf16>
      %102 = vector.shape_cast %101 : vector<1x64x162xbf16> to vector<64x162xbf16>
      %c2_93 = arith.constant 2 : index
      %c0_94 = arith.constant 0 : index
      %c0_95 = arith.constant 0 : index
      %103 = vector.load %arg4[%c2_93, %c0_94, %c0_95] : memref<5x162x160xbf16, #tpu.memory_space<vmem>>, vector<1x162x160xbf16>
      %104 = vector.shape_cast %103 : vector<1x162x160xbf16> to vector<162x160xbf16>
      %cst_96 = arith.constant dense<0.000000e+00> : vector<64x160xf32>
      %105 = tpu.matmul %102, %104, %cst_96 {dimension_numbers = #tpu.dot_dimension_numbers<[1], [0], [0], [1], [0, 0, 1, 1], [], []>} : vector<64x162xbf16>, vector<162x160xbf16>, vector<64x160xf32> -> vector<64x160xf32>
      %106 = arith.addf %89, %105 : vector<64x160xf32>
      %c3_i32 = arith.constant 3 : i32
      %107 = arith.addi %53, %c3_i32 : i32
      %108 = arith.index_cast %107 : i32 to index
      %c0_97 = arith.constant 0 : index
      %c0_98 = arith.constant 0 : index
      %109 = vector.load %arg13[%108, %c0_97, %c0_98] : memref<14x64x162xbf16, #tpu.memory_space<vmem>>, vector<1x64x162xbf16>
      %110 = vector.shape_cast %109 : vector<1x64x162xbf16> to vector<64x162xbf16>
      %c3_99 = arith.constant 3 : index
      %c0_100 = arith.constant 0 : index
      %c0_101 = arith.constant 0 : index
      %111 = vector.load %arg4[%c3_99, %c0_100, %c0_101] : memref<5x162x160xbf16, #tpu.memory_space<vmem>>, vector<1x162x160xbf16>
      %112 = vector.shape_cast %111 : vector<1x162x160xbf16> to vector<162x160xbf16>
      %cst_102 = arith.constant dense<0.000000e+00> : vector<64x160xf32>
      %113 = tpu.matmul %110, %112, %cst_102 {dimension_numbers = #tpu.dot_dimension_numbers<[1], [0], [0], [1], [0, 0, 1, 1], [], []>} : vector<64x162xbf16>, vector<162x160xbf16>, vector<64x160xf32> -> vector<64x160xf32>
      %114 = arith.addf %97, %113 : vector<64x160xf32>
      %c1_i32_103 = arith.constant 1 : i32
      %115 = arith.addi %53, %c1_i32_103 : i32
      %c3_i32_104 = arith.constant 3 : i32
      %116 = arith.addi %115, %c3_i32_104 : i32
      %117 = arith.index_cast %116 : i32 to index
      %c0_105 = arith.constant 0 : index
      %c0_106 = arith.constant 0 : index
      %118 = vector.load %arg13[%117, %c0_105, %c0_106] : memref<14x64x162xbf16, #tpu.memory_space<vmem>>, vector<1x64x162xbf16>
      %119 = vector.shape_cast %118 : vector<1x64x162xbf16> to vector<64x162xbf16>
      %c3_107 = arith.constant 3 : index
      %c0_108 = arith.constant 0 : index
      %c0_109 = arith.constant 0 : index
      %120 = vector.load %arg4[%c3_107, %c0_108, %c0_109] : memref<5x162x160xbf16, #tpu.memory_space<vmem>>, vector<1x162x160xbf16>
      %121 = vector.shape_cast %120 : vector<1x162x160xbf16> to vector<162x160xbf16>
      %cst_110 = arith.constant dense<0.000000e+00> : vector<64x160xf32>
      %122 = tpu.matmul %119, %121, %cst_110 {dimension_numbers = #tpu.dot_dimension_numbers<[1], [0], [0], [1], [0, 0, 1, 1], [], []>} : vector<64x162xbf16>, vector<162x160xbf16>, vector<64x160xf32> -> vector<64x160xf32>
      %123 = arith.addf %106, %122 : vector<64x160xf32>
      %c4_i32 = arith.constant 4 : i32
      %124 = arith.addi %53, %c4_i32 : i32
      %125 = arith.index_cast %124 : i32 to index
      %c0_111 = arith.constant 0 : index
      %c0_112 = arith.constant 0 : index
      %126 = vector.load %arg13[%125, %c0_111, %c0_112] : memref<14x64x162xbf16, #tpu.memory_space<vmem>>, vector<1x64x162xbf16>
      %127 = vector.shape_cast %126 : vector<1x64x162xbf16> to vector<64x162xbf16>
      %c4_113 = arith.constant 4 : index
      %c0_114 = arith.constant 0 : index
      %c0_115 = arith.constant 0 : index
      %128 = vector.load %arg4[%c4_113, %c0_114, %c0_115] : memref<5x162x160xbf16, #tpu.memory_space<vmem>>, vector<1x162x160xbf16>
      %129 = vector.shape_cast %128 : vector<1x162x160xbf16> to vector<162x160xbf16>
      %cst_116 = arith.constant dense<0.000000e+00> : vector<64x160xf32>
      %130 = tpu.matmul %127, %129, %cst_116 {dimension_numbers = #tpu.dot_dimension_numbers<[1], [0], [0], [1], [0, 0, 1, 1], [], []>} : vector<64x162xbf16>, vector<162x160xbf16>, vector<64x160xf32> -> vector<64x160xf32>
      %131 = arith.addf %114, %130 : vector<64x160xf32>
      %c1_i32_117 = arith.constant 1 : i32
      %132 = arith.addi %53, %c1_i32_117 : i32
      %c4_i32_118 = arith.constant 4 : i32
      %133 = arith.addi %132, %c4_i32_118 : i32
      %134 = arith.index_cast %133 : i32 to index
      %c0_119 = arith.constant 0 : index
      %c0_120 = arith.constant 0 : index
      %135 = vector.load %arg13[%134, %c0_119, %c0_120] : memref<14x64x162xbf16, #tpu.memory_space<vmem>>, vector<1x64x162xbf16>
      %136 = vector.shape_cast %135 : vector<1x64x162xbf16> to vector<64x162xbf16>
      %c4_121 = arith.constant 4 : index
      %c0_122 = arith.constant 0 : index
      %c0_123 = arith.constant 0 : index
      %137 = vector.load %arg4[%c4_121, %c0_122, %c0_123] : memref<5x162x160xbf16, #tpu.memory_space<vmem>>, vector<1x162x160xbf16>
      %138 = vector.shape_cast %137 : vector<1x162x160xbf16> to vector<162x160xbf16>
      %cst_124 = arith.constant dense<0.000000e+00> : vector<64x160xf32>
      %139 = tpu.matmul %136, %138, %cst_124 {dimension_numbers = #tpu.dot_dimension_numbers<[1], [0], [0], [1], [0, 0, 1, 1], [], []>} : vector<64x162xbf16>, vector<162x160xbf16>, vector<64x160xf32> -> vector<64x160xf32>
      %140 = arith.addf %123, %139 : vector<64x160xf32>
      %141 = arith.maximumf %131, %140 : vector<64x160xf32>
      %c0_125 = arith.constant 0 : index
      %c0_126 = arith.constant 0 : index
      %142 = vector.load %arg5[%c0_125, %c0_126] : memref<1x160xf32, #tpu.memory_space<vmem>>, vector<1x160xf32>
      %143 = vector.broadcast %142 : vector<1x160xf32> to vector<64x160xf32>
      %144 = arith.addf %141, %143 : vector<64x160xf32>
      %cst_127 = arith.constant 0.000000e+00 : f32
      %145 = vector.broadcast %cst_127 : f32 to vector<64x160xf32>
      %146 = arith.maximumf %144, %145 : vector<64x160xf32>
      %147 = vector.extract_strided_slice %146 {offsets = [0, 0], sizes = [64, 144], strides = [1, 1]} : vector<64x160xf32> to vector<64x144xf32>
      %148 = vector.extract_strided_slice %146 {offsets = [0, 16], sizes = [64, 144], strides = [1, 1]} : vector<64x160xf32> to vector<64x144xf32>
      %149 = arith.maximumf %147, %148 : vector<64x144xf32>
      %150 = arith.truncf %149 : vector<64x144xf32> to vector<64x144xbf16>
      %151 = arith.index_cast %arg15 : i32 to index
      %c0_128 = arith.constant 0 : index
      %c0_129 = arith.constant 0 : index
      %152 = vector.load %arg14[%151, %c0_128, %c0_129] : memref<5x64x144xbf16, #tpu.memory_space<vmem>>, vector<1x64x144xbf16>
      %153 = vector.shape_cast %152 : vector<1x64x144xbf16> to vector<64x144xbf16>
      %154 = vector.shape_cast %150 : vector<64x144xbf16> to vector<1x64x144xbf16>
      tpu.vector_store %arg14[%151, %c0_128, %c0_129], %154 {strides = array<i32>} : memref<5x64x144xbf16, #tpu.memory_space<vmem>>, vector<1x64x144xbf16>,
    }
    %c5_i32_3 = arith.constant 5 : i32
    %cst = arith.constant 0.000000e+00 : f32
    %2 = vector.broadcast %cst : f32 to vector<64x120xf32>
    %c0 = arith.constant 0 : index
    %c0_4 = arith.constant 0 : index
    %c0_5 = arith.constant 0 : index
    %3 = vector.load %arg14[%c0, %c0_4, %c0_5] : memref<5x64x144xbf16, #tpu.memory_space<vmem>>, vector<1x64x144xbf16>
    %4 = vector.shape_cast %3 : vector<1x64x144xbf16> to vector<64x144xbf16>
    %c0_6 = arith.constant 0 : index
    %c0_7 = arith.constant 0 : index
    %c0_8 = arith.constant 0 : index
    %5 = vector.load %arg6[%c0_6, %c0_7, %c0_8] : memref<5x144x120xbf16, #tpu.memory_space<vmem>>, vector<1x144x120xbf16>
    %6 = vector.shape_cast %5 : vector<1x144x120xbf16> to vector<144x120xbf16>
    %cst_9 = arith.constant dense<0.000000e+00> : vector<64x120xf32>
    %7 = tpu.matmul %4, %6, %cst_9 {dimension_numbers = #tpu.dot_dimension_numbers<[1], [0], [0], [1], [0, 0, 1, 1], [], []>} : vector<64x144xbf16>, vector<144x120xbf16>, vector<64x120xf32> -> vector<64x120xf32>
    %8 = arith.addf %2, %7 : vector<64x120xf32>
    %c1 = arith.constant 1 : index
    %c0_10 = arith.constant 0 : index
    %c0_11 = arith.constant 0 : index
    %9 = vector.load %arg14[%c1, %c0_10, %c0_11] : memref<5x64x144xbf16, #tpu.memory_space<vmem>>, vector<1x64x144xbf16>
    %10 = vector.shape_cast %9 : vector<1x64x144xbf16> to vector<64x144xbf16>
    %c1_12 = arith.constant 1 : index
    %c0_13 = arith.constant 0 : index
    %c0_14 = arith.constant 0 : index
    %11 = vector.load %arg6[%c1_12, %c0_13, %c0_14] : memref<5x144x120xbf16, #tpu.memory_space<vmem>>, vector<1x144x120xbf16>
    %12 = vector.shape_cast %11 : vector<1x144x120xbf16> to vector<144x120xbf16>
    %cst_15 = arith.constant dense<0.000000e+00> : vector<64x120xf32>
    %13 = tpu.matmul %10, %12, %cst_15 {dimension_numbers = #tpu.dot_dimension_numbers<[1], [0], [0], [1], [0, 0, 1, 1], [], []>} : vector<64x144xbf16>, vector<144x120xbf16>, vector<64x120xf32> -> vector<64x120xf32>
    %14 = arith.addf %8, %13 : vector<64x120xf32>
    %c2 = arith.constant 2 : index
    %c0_16 = arith.constant 0 : index
    %c0_17 = arith.constant 0 : index
    %15 = vector.load %arg14[%c2, %c0_16, %c0_17] : memref<5x64x144xbf16, #tpu.memory_space<vmem>>, vector<1x64x144xbf16>
    %16 = vector.shape_cast %15 : vector<1x64x144xbf16> to vector<64x144xbf16>
    %c2_18 = arith.constant 2 : index
    %c0_19 = arith.constant 0 : index
    %c0_20 = arith.constant 0 : index
    %17 = vector.load %arg6[%c2_18, %c0_19, %c0_20] : memref<5x144x120xbf16, #tpu.memory_space<vmem>>, vector<1x144x120xbf16>
    %18 = vector.shape_cast %17 : vector<1x144x120xbf16> to vector<144x120xbf16>
    %cst_21 = arith.constant dense<0.000000e+00> : vector<64x120xf32>
    %19 = tpu.matmul %16, %18, %cst_21 {dimension_numbers = #tpu.dot_dimension_numbers<[1], [0], [0], [1], [0, 0, 1, 1], [], []>} : vector<64x144xbf16>, vector<144x120xbf16>, vector<64x120xf32> -> vector<64x120xf32>
    %20 = arith.addf %14, %19 : vector<64x120xf32>
    %c3 = arith.constant 3 : index
    %c0_22 = arith.constant 0 : index
    %c0_23 = arith.constant 0 : index
    %21 = vector.load %arg14[%c3, %c0_22, %c0_23] : memref<5x64x144xbf16, #tpu.memory_space<vmem>>, vector<1x64x144xbf16>
    %22 = vector.shape_cast %21 : vector<1x64x144xbf16> to vector<64x144xbf16>
    %c3_24 = arith.constant 3 : index
    %c0_25 = arith.constant 0 : index
    %c0_26 = arith.constant 0 : index
    %23 = vector.load %arg6[%c3_24, %c0_25, %c0_26] : memref<5x144x120xbf16, #tpu.memory_space<vmem>>, vector<1x144x120xbf16>
    %24 = vector.shape_cast %23 : vector<1x144x120xbf16> to vector<144x120xbf16>
    %cst_27 = arith.constant dense<0.000000e+00> : vector<64x120xf32>
    %25 = tpu.matmul %22, %24, %cst_27 {dimension_numbers = #tpu.dot_dimension_numbers<[1], [0], [0], [1], [0, 0, 1, 1], [], []>} : vector<64x144xbf16>, vector<144x120xbf16>, vector<64x120xf32> -> vector<64x120xf32>
    %26 = arith.addf %20, %25 : vector<64x120xf32>
    %c4 = arith.constant 4 : index
    %c0_28 = arith.constant 0 : index
    %c0_29 = arith.constant 0 : index
    %27 = vector.load %arg14[%c4, %c0_28, %c0_29] : memref<5x64x144xbf16, #tpu.memory_space<vmem>>, vector<1x64x144xbf16>
    %28 = vector.shape_cast %27 : vector<1x64x144xbf16> to vector<64x144xbf16>
    %c4_30 = arith.constant 4 : index
    %c0_31 = arith.constant 0 : index
    %c0_32 = arith.constant 0 : index
    %29 = vector.load %arg6[%c4_30, %c0_31, %c0_32] : memref<5x144x120xbf16, #tpu.memory_space<vmem>>, vector<1x144x120xbf16>
    %30 = vector.shape_cast %29 : vector<1x144x120xbf16> to vector<144x120xbf16>
    %cst_33 = arith.constant dense<0.000000e+00> : vector<64x120xf32>
    %31 = tpu.matmul %28, %30, %cst_33 {dimension_numbers = #tpu.dot_dimension_numbers<[1], [0], [0], [1], [0, 0, 1, 1], [], []>} : vector<64x144xbf16>, vector<144x120xbf16>, vector<64x120xf32> -> vector<64x120xf32>
    %32 = arith.addf %26, %31 : vector<64x120xf32>
    %c0_34 = arith.constant 0 : index
    %c0_35 = arith.constant 0 : index
    %33 = vector.load %arg7[%c0_34, %c0_35] : memref<1x120xf32, #tpu.memory_space<vmem>>, vector<1x120xf32>
    %34 = vector.broadcast %33 : vector<1x120xf32> to vector<64x120xf32>
    %35 = arith.addf %32, %34 : vector<64x120xf32>
    %cst_36 = arith.constant 0.000000e+00 : f32
    %36 = vector.broadcast %cst_36 : f32 to vector<64x120xf32>
    %37 = arith.maximumf %35, %36 : vector<64x120xf32>
    %38 = arith.truncf %37 : vector<64x120xf32> to vector<64x120xbf16>
    %c0_37 = arith.constant 0 : index
    %c0_38 = arith.constant 0 : index
    %39 = vector.load %arg8[%c0_37, %c0_38] : memref<120x84xbf16, #tpu.memory_space<vmem>>, vector<120x84xbf16>
    %cst_39 = arith.constant dense<0.000000e+00> : vector<64x84xf32>
    %40 = tpu.matmul %38, %39, %cst_39 {dimension_numbers = #tpu.dot_dimension_numbers<[1], [0], [0], [1], [0, 0, 1, 1], [], []>} : vector<64x120xbf16>, vector<120x84xbf16>, vector<64x84xf32> -> vector<64x84xf32>
    %c0_40 = arith.constant 0 : index
    %c0_41 = arith.constant 0 : index
    %41 = vector.load %arg9[%c0_40, %c0_41] : memref<1x84xf32, #tpu.memory_space<vmem>>, vector<1x84xf32>
    %42 = vector.broadcast %41 : vector<1x84xf32> to vector<64x84xf32>
    %43 = arith.addf %40, %42 : vector<64x84xf32>
    %cst_42 = arith.constant 0.000000e+00 : f32
    %44 = vector.broadcast %cst_42 : f32 to vector<64x84xf32>
    %45 = arith.maximumf %43, %44 : vector<64x84xf32>
    %46 = arith.truncf %45 : vector<64x84xf32> to vector<64x84xbf16>
    %c0_43 = arith.constant 0 : index
    %c0_44 = arith.constant 0 : index
    %47 = vector.load %arg10[%c0_43, %c0_44] : memref<84x128xbf16, #tpu.memory_space<vmem>>, vector<84x128xbf16>
    %cst_45 = arith.constant dense<0.000000e+00> : vector<64x128xf32>
    %48 = tpu.matmul %46, %47, %cst_45 {dimension_numbers = #tpu.dot_dimension_numbers<[1], [0], [0], [1], [0, 0, 1, 1], [], []>} : vector<64x84xbf16>, vector<84x128xbf16>, vector<64x128xf32> -> vector<64x128xf32>
    %c0_46 = arith.constant 0 : index
    %c0_47 = arith.constant 0 : index
    %49 = vector.load %arg11[%c0_46, %c0_47] : memref<1x128xf32, #tpu.memory_space<vmem>>, vector<1x128xf32>
    %50 = vector.broadcast %49 : vector<1x128xf32> to vector<64x128xf32>
    %51 = arith.addf %48, %50 : vector<64x128xf32>
    %c0_48 = arith.constant 0 : index
    %c0_49 = arith.constant 0 : index
    %52 = vector.load %arg12[%c0_48, %c0_49] : memref<64x128xf32, #tpu.memory_space<vmem>>, vector<64x128xf32>
    tpu.vector_store %arg12[%c0_48, %c0_49], %51 {strides = array<i32>} : memref<64x128xf32, #tpu.memory_space<vmem>>, vector<64x128xf32>,
    return
  }
  func.func @transform_0(%arg0: i32) -> (i32, i32, i32) {
    %c0_i32 = arith.constant 0 : i32
    %c0_i32_0 = arith.constant 0 : i32
    %c0_i32_1 = arith.constant 0 : i32
    return %c0_i32, %arg0, %c0_i32_0 : i32, i32, i32
  }
  func.func @transform_1(%arg0: i32) -> (i32, i32, i32) {
    %c0_i32 = arith.constant 0 : i32
    %c0_i32_0 = arith.constant 0 : i32
    %c0_i32_1 = arith.constant 0 : i32
    %c0_i32_2 = arith.constant 0 : i32
    return %c0_i32, %c0_i32_0, %c0_i32_1 : i32, i32, i32
  }
  func.func @transform_2(%arg0: i32) -> (i32, i32) {
    %c0_i32 = arith.constant 0 : i32
    %c0_i32_0 = arith.constant 0 : i32
    %c0_i32_1 = arith.constant 0 : i32
    return %c0_i32, %c0_i32_0 : i32, i32
  }
  func.func @transform_3(%arg0: i32) -> (i32, i32, i32) {
    %c0_i32 = arith.constant 0 : i32
    %c0_i32_0 = arith.constant 0 : i32
    %c0_i32_1 = arith.constant 0 : i32
    %c0_i32_2 = arith.constant 0 : i32
    return %c0_i32, %c0_i32_0, %c0_i32_1 : i32, i32, i32
  }
  func.func @transform_4(%arg0: i32) -> (i32, i32) {
    %c0_i32 = arith.constant 0 : i32
    %c0_i32_0 = arith.constant 0 : i32
    %c0_i32_1 = arith.constant 0 : i32
    return %c0_i32, %c0_i32_0 : i32, i32
  }
  func.func @transform_5(%arg0: i32) -> (i32, i32, i32) {
    %c0_i32 = arith.constant 0 : i32
    %c0_i32_0 = arith.constant 0 : i32
    %c0_i32_1 = arith.constant 0 : i32
    %c0_i32_2 = arith.constant 0 : i32
    return %c0_i32, %c0_i32_0, %c0_i32_1 : i32, i32, i32
  }
  func.func @transform_6(%arg0: i32) -> (i32, i32) {
    %c0_i32 = arith.constant 0 : i32
    %c0_i32_0 = arith.constant 0 : i32
    %c0_i32_1 = arith.constant 0 : i32
    return %c0_i32, %c0_i32_0 : i32, i32
  }
  func.func @transform_7(%arg0: i32) -> (i32, i32) {
    %c0_i32 = arith.constant 0 : i32
    %c0_i32_0 = arith.constant 0 : i32
    %c0_i32_1 = arith.constant 0 : i32
    return %c0_i32, %c0_i32_0 : i32, i32
  }
  func.func @transform_8(%arg0: i32) -> (i32, i32) {
    %c0_i32 = arith.constant 0 : i32
    %c0_i32_0 = arith.constant 0 : i32
    %c0_i32_1 = arith.constant 0 : i32
    return %c0_i32, %c0_i32_0 : i32, i32
  }
  func.func @transform_9(%arg0: i32) -> (i32, i32) {
    %c0_i32 = arith.constant 0 : i32
    %c0_i32_0 = arith.constant 0 : i32
    %c0_i32_1 = arith.constant 0 : i32
    return %c0_i32, %c0_i32_0 : i32, i32
  }
  func.func @transform_10(%arg0: i32) -> (i32, i32) {
    %c0_i32 = arith.constant 0 : i32
    %c0_i32_0 = arith.constant 0 : i32
    %c0_i32_1 = arith.constant 0 : i32
    return %c0_i32, %c0_i32_0 : i32, i32
  }
  func.func @transform_11(%arg0: i32) -> (i32, i32) {
    %c0_i32 = arith.constant 0 : i32
    %c0_i32_0 = arith.constant 0 : i32
    return %arg0, %c0_i32 : i32, i32
  }
}

</mosaic_0001>

<bundles_post_ra>
// kernel: tile.13
= control target key start
LH: loop header
LB: loop body
LE: loop exit
PB: predicated region body
PF: predicated region fallthrough
CT: control target
= control target key end

     0   :  { %s40_s0 = inlined_call_operand.vmem [shape: f32[6], index: 0, kind: input, shape index: {}]   ;;  %s41_s1 = inlined_call_operand.vmem [shape: f32[28,6], index: 1, kind: output, shape index: {}]  }
   0x1   :  { %v4_v0 = vld [vmem:[%s40_s0] ss:$0 sm:$0xff] }
   0x2   :  { %5 = vst [vmem:[%s41_s1] sm:$0xff] %v4_v0 }
   0x3   :  { %12 = vst [vmem:[%s41_s1 + $0x8] sm:$0xff] %v4_v0 }
   0x4   :  { %13 = vst [vmem:[%s41_s1 + $0x10] sm:$0xff] %v4_v0 }
   0x5   :  { %14 = vst [vmem:[%s41_s1 + $0x18] sm:$0xff] %v4_v0 }

// kernel: tile.14
= control target key start
LH: loop header
LB: loop body
LE: loop exit
PB: predicated region body
PF: predicated region fallthrough
CT: control target
= control target key end

     0   :  { %vm9_vm0 = vcmask 15360   ;;  %s248_s12 = smov 126   ;;  %s249_s13 = smov 114   ;;  %vm3_vm1 = vcmask 48128   ;;  %vm13_vm2 = vcmask 31744   ;;  %vm16_vm3 = vcmask 1048560   ;;  %s378_s0 = inlined_call_operand.vmem [shape: f32[28,6], index: 0, kind: input, shape index: {}]   ;;  %s379_s1 = inlined_call_operand.vmem [shape: f32[1,168], index: 1, kind: output, shape index: {}]  }
   0x1   :  { %v192_v0 = vld [vmem:[%s378_s0 + $0x15] sm:$0x1]   ;;  %v195_v3 = vld [vmem:[%s378_s0 + $0x13] sm:$0x1]   ;;  %v197_v4 = vld [vmem:[%s378_s0 + $0x11] sm:$0x1]  }
   0x2   :  { %v193_v1 = vld [vmem:[%s378_s0 + $0x15] sm:$0x1]   ;;  %26 = vrot.lane.b32.xlu1 %v195_v3, %s249_s13  ;;  %s250_s16 = smov 102   ;;  %v194_v5 = vld [vmem:[%s378_s0 + $0x14] sm:$0x1]   ;;  %s251_s21 = smov 120  }
   0x3   :  { %v10_v2 = vsel %vm9_vm0, %v193_v1, %v192_v0  ;;  %38 = vrot.lane.b32.xlu2 %v197_v4, %s250_s16  ;;  %v196_v6 = vld [vmem:[%s378_s0 + $0x12] sm:$0x1]   ;;  %s252_s22 = smov 108   ;;  %v198_v7 = vld [vmem:[%s378_s0 + $0x10] sm:$0x1]   ;;  %s253_s25 = smov 96  }
   0x4   :  { %11 = vrot.lane.b32.xlu0 %v10_v2, %s248_s12  ;;  %v199_v8 = vld [vmem:[%s378_s0 + $0xf] sm:$0x1]   ;;  %v200_v9 = vld [vmem:[%s378_s0 + $0xe] sm:$0x1]   ;;  %s254_s30 = smov 90   ;;  %s255_s2 = smov 84  }
   0x5   :  { %v201_v10 = vld [vmem:[%s378_s0 + $0xd] sm:$0x1]   ;;  %s256_s5 = smov 78   ;;  %v202_v11 = vld [vmem:[%s378_s0 + $0xc] sm:$0x1]   ;;  %s257_s10 = smov 72  }
   0x6   :  { %v203_v12 = vld [vmem:[%s378_s0 + $0xb] sm:$0x1]   ;;  %s258_s11 = smov 66   ;;  %v204_v13 = vld [vmem:[%s378_s0 + $0xa] sm:$0x1]   ;;  %s259_s14 = smov 60  }
   0x7   :  { %v205_v14 = vld [vmem:[%s378_s0 + $0x9] sm:$0x1]   ;;  %v206_v15 = vld [vmem:[%s378_s0 + $0x8] sm:$0x1]   ;;  %s260_s19 = smov 54   ;;  %s261_s20 = smov 48  }
   0x8   :  { %v207_v16 = vld [vmem:[%s378_s0 + $0x7] sm:$0x1]   ;;  %s262_s23 = smov 42   ;;  %v208_v17 = vld [vmem:[%s378_s0 + $0x6] sm:$0x1]   ;;  %s263_s28 = smov 36  }
   0x9   :  { %v209_v18 = vld [vmem:[%s378_s0 + $0x1b] sm:$0x1]   ;;  %s264_s29 = smov 34   ;;  %v210_v19 = vld [vmem:[%s378_s0 + $0x5] sm:$0x1]   ;;  %s265_s3 = smov 30  }
   0xa   :  { %32 = vrot.lane.b32.xlu1 %v196_v6, %s252_s22  ;;  %v211_v20 = vld [vmem:[%s378_s0 + $0x1a] sm:$0x1]   ;;  %v212_v21 = vld [vmem:[%s378_s0 + $0x4] sm:$0x1]   ;;  %s266_s8 = smov 28   ;;  %s267_s9 = smov 24  }
   0xb   :  { %44 = vrot.lane.b32.xlu2 %v198_v7, %s253_s25  ;;  %v213_v22 = vld [vmem:[%s378_s0 + $0x19] sm:$0x1]   ;;  %s268_s12 = smov 22   ;;  %v214_v23 = vld [vmem:[%s378_s0 + $0x3] sm:$0x1]   ;;  %s269_s17 = smov 18  }
   0xc   :  { %20 = vrot.lane.b32.xlu0 %v194_v5, %s251_s21  ;;  %v215_v24 = vld [vmem:[%s378_s0 + $0x18] sm:$0x1]   ;;  %s270_s18 = smov 16   ;;  %v216_v25 = vld [vmem:[%s378_s0 + $0x2] sm:$0x1]   ;;  %s271_s21 = smov 12  }
   0xd   :  { %v217_v26 = vld [vmem:[%s378_s0 + $0x17] sm:$0x1]   ;;  %v218_v27 = vld [vmem:[%s378_s0 + $0x1] sm:$0x1]   ;;  %s272_s26 = smov 10   ;;  %s273_s27 = smov 6  }
   0xe   :  { %v219_v28 = vld [vmem:[%s378_s0 + $0x16] sm:$0x1]   ;;  %v2_v29 = vld [vmem:[%s378_s0] sm:$0x1]   ;;  %vm22_vm4 = vcmask 1032128   ;;  %vm28_vm5 = vcmask 982928  }
   0xf   :  { %4 = vst.msk [vmem:[#allocation0] sm:$0x1] %vm3_vm1, %v2_v29   ;;  %vm34_vm6 = vcmask 933728   ;;  %vm40_vm7 = vcmask 884528   ;;  %vm46_vm8 = vcmask 835328   ;;  %vm52_vm9 = vcmask 786128  }
  0x10   :  { %vm58_vm10 = vcmask 736928   ;;  %vm64_vm11 = vcmask 687728   ;;  %vm70_vm12 = vcmask 638528   ;;  %vm76_vm13 = vcmask 589328  }
  0x11   :  { %vm82_vm14 = vcmask 540128   ;;  %vm88_vm15 = vcmask 490928   ;;  %vm94_vm0 = vcmask 441728   ;;  %vm100_vm1 = vcmask 392528  }
  0x12   :  { %56 = vrot.lane.b32.xlu1 %v200_v9, %s255_s2 }
  0x13   :  { %62 = vrot.lane.b32.xlu2 %v201_v10, %s256_s5 }
  0x14   :  { %50 = vrot.lane.b32.xlu0 %v199_v8, %s254_s30  ;;  %s274_s30 = smov 4  }
  0x1a   :  { %74 = vrot.lane.b32.xlu1 %v203_v12, %s258_s11 }
  0x1b   :  { %80 = vrot.lane.b32.xlu2 %v204_v13, %s259_s14 }
  0x1c   :  { %68 = vrot.lane.b32.xlu0 %v202_v11, %s257_s10 }
  0x22   :  { %92 = vrot.lane.b32.xlu1 %v206_v15, %s261_s20 }
  0x23   :  { %98 = vrot.lane.b32.xlu2 %v207_v16, %s262_s23 }
  0x24   :  { %86 = vrot.lane.b32.xlu0 %v205_v14, %s260_s19 }
  0x2a   :  { %110 = vrot.lane.b32.xlu1 %v209_v18, %s264_s29 }
  0x2b   :  { %117 = vrot.lane.b32.xlu2 %v210_v19, %s265_s3 }
  0x2c   :  { %104 = vrot.lane.b32.xlu0 %v208_v17, %s263_s28 }
  0x32   :  { %130 = vrot.lane.b32.xlu1 %v212_v21, %s267_s9 }
  0x33   :  { %136 = vrot.lane.b32.xlu2 %v213_v22, %s268_s12 }
  0x34   :  { %123 = vrot.lane.b32.xlu0 %v211_v20, %s266_s8 }
  0x3a   :  { %149 = vrot.lane.b32.xlu1 %v215_v24, %s270_s18 }
  0x3b   :  { %156 = vrot.lane.b32.xlu2 %v216_v25, %s271_s21 }
  0x3c   :  { %143 = vrot.lane.b32.xlu0 %v214_v23, %s269_s17 }
  0x42   :  { %169 = vrot.lane.b32.xlu1 %v218_v27, %s273_s27 }
  0x43   :  { %175 = vrot.lane.b32.xlu2 %v219_v28, %s274_s30 }
  0x44   :  { %162 = vrot.lane.b32.xlu0 %v217_v26, %s272_s26 }
  0x5d   :  { %v39_v30 = vpop.permute.xlu2 %38  }
  0x65   :  { %v45_v31 = vpop.permute.xlu2 %44  }
  0x6d   :  { %v63_v32 = vpop.permute.xlu2 %62  }
  0x74   :  { %v27_v34 = vpop.permute.xlu1 %26  }
  0x75   :  { %v81_v35 = vpop.permute.xlu2 %80  }
  0x76   :  { %v12_v33 = vpop.permute.xlu0 %11  }
  0x77   :  { %15 = vst.msk [vmem:[#allocation0 + $0x8] sm:$0x1] %vm13_vm2, %v12_v33   ;;  %vm106_vm2 = vcmask 343328  }
  0x78   :  { %17 = vst.msk [vmem:[#allocation0] sm:$0x1] %vm16_vm3, %v12_v33   ;;  %vm119_vm3 = vcmask 294128  }
  0x7c   :  { %v33_v37 = vpop.permute.xlu1 %32  }
  0x7d   :  { %v99_v38 = vpop.permute.xlu2 %98  }
  0x7e   :  { %v21_v36 = vpop.permute.xlu0 %20  }
  0x7f   :  { %23 = vst.msk [vmem:[#allocation0] sm:$0x1] %vm22_vm4, %v21_v36   ;;  %vm112_vm4 = vcmask 326928  }
  0x80   :  { %29 = vst.msk [vmem:[#allocation0] sm:$0x1] %vm28_vm5, %v27_v34   ;;  %vm125_vm5 = vcmask 277728  }
  0x81   :  { %35 = vst.msk [vmem:[#allocation0] sm:$0x1] %vm34_vm6, %v33_v37   ;;  %vm138_vm6 = vcmask 228528  }
  0x82   :  { %41 = vst.msk [vmem:[#allocation0] sm:$0x1] %vm40_vm7, %v39_v30   ;;  %vm132_vm7 = vcmask 244928  }
  0x83   :  { %47 = vst.msk [vmem:[#allocation0] sm:$0x1] %vm46_vm8, %v45_v31   ;;  %vm145_vm8 = vcmask 195728  }
  0x84   :  { %v57_v40 = vpop.permute.xlu1 %56  }
  0x85   :  { %v118_v41 = vpop.permute.xlu2 %117  }
  0x86   :  { %v51_v39 = vpop.permute.xlu0 %50  }
  0x87   :  { %53 = vst.msk [vmem:[#allocation0] sm:$0x1] %vm52_vm9, %v51_v39   ;;  %vm158_vm9 = vcmask 146528  }
  0x88   :  { %59 = vst.msk [vmem:[#allocation0] sm:$0x1] %vm58_vm10, %v57_v40   ;;  %vm151_vm10 = vcmask 179328  }
  0x89   :  { %65 = vst.msk [vmem:[#allocation0] sm:$0x1] %vm64_vm11, %v63_v32   ;;  %vm164_vm11 = vcmask 130128  }
  0x8c   :  { %v75_v43 = vpop.permute.xlu1 %74  }
  0x8d   :  { %v137_v44 = vpop.permute.xlu2 %136  }
  0x8e   :  { %v69_v42 = vpop.permute.xlu0 %68  }
  0x8f   :  { %71 = vst.msk [vmem:[#allocation0] sm:$0x1] %vm70_vm12, %v69_v42   ;;  %vm177_vm12 = vcmask 80928  }
  0x90   :  { %77 = vst.msk [vmem:[#allocation0] sm:$0x1] %vm76_vm13, %v75_v43   ;;  %vm171_vm13 = vcmask 97328  }
  0x91   :  { %83 = vst.msk [vmem:[#allocation0] sm:$0x1] %vm82_vm14, %v81_v35  }
  0x94   :  { %v93_v46 = vpop.permute.xlu1 %92  }
  0x95   :  { %v157_v47 = vpop.permute.xlu2 %156  }
  0x96   :  { %v87_v45 = vpop.permute.xlu0 %86  }
  0x97   :  { %89 = vst.msk [vmem:[#allocation0] sm:$0x1] %vm88_vm15, %v87_v45  }
  0x98   :  { %95 = vst.msk [vmem:[#allocation0] sm:$0x1] %vm94_vm0, %v93_v46  }
  0x99   :  { %101 = vst.msk [vmem:[#allocation0] sm:$0x1] %vm100_vm1, %v99_v38  }
  0x9c   :  { %v111_v49 = vpop.permute.xlu1 %110  }
  0x9d   :  { %114 = vst.msk [vmem:[#allocation0 + $0x8] sm:$0x1] %vm112_vm4, %v111_v49   ;;  %v176_v50 = vpop.permute.xlu2 %175  }
  0x9e   :  { %v105_v48 = vpop.permute.xlu0 %104  }
  0x9f   :  { %107 = vst.msk [vmem:[#allocation0] sm:$0x1] %vm106_vm2, %v105_v48  }
  0xa0   :  { %120 = vst.msk [vmem:[#allocation0] sm:$0x1] %vm119_vm3, %v118_v41  }
  0xa4   :  { %v131_v52 = vpop.permute.xlu1 %130  }
  0xa5   :  { %133 = vst.msk [vmem:[#allocation0] sm:$0x1] %vm132_vm7, %v131_v52  }
  0xa6   :  { %v124_v51 = vpop.permute.xlu0 %123  }
  0xa7   :  { %127 = vst.msk [vmem:[#allocation0 + $0x8] sm:$0x1] %vm125_vm5, %v124_v51  }
  0xa8   :  { %140 = vst.msk [vmem:[#allocation0 + $0x8] sm:$0x1] %vm138_vm6, %v137_v44  }
  0xac   :  { %v150_v54 = vpop.permute.xlu1 %149  }
  0xad   :  { %153 = vst.msk [vmem:[#allocation0 + $0x8] sm:$0x1] %vm151_vm10, %v150_v54  }
  0xae   :  { %v144_v53 = vpop.permute.xlu0 %143  }
  0xaf   :  { %146 = vst.msk [vmem:[#allocation0] sm:$0x1] %vm145_vm8, %v144_v53  }
  0xb0   :  { %159 = vst.msk [vmem:[#allocation0] sm:$0x1] %vm158_vm9, %v157_v47  }
  0xb4   :  { %v170_v56 = vpop.permute.xlu1 %169  }
  0xb5   :  { %172 = vst.msk [vmem:[#allocation0] sm:$0x1] %vm171_vm13, %v170_v56  }
  0xb6   :  { %v163_v55 = vpop.permute.xlu0 %162  }
  0xb7   :  { %166 = vst.msk [vmem:[#allocation0 + $0x8] sm:$0x1] %vm164_vm11, %v163_v55  }
  0xb8   :  { %179 = vst.msk [vmem:[#allocation0 + $0x8] sm:$0x1] %vm177_vm12, %v176_v50  }
  0xbc   :  { %v182_v58 = vld [vmem:[#allocation0] sm:$0x1] }
  0xbd   :  { %185 = vst [vmem:[%s379_s1] sm:$0x1] %v182_v58 }
  0xbf   :  { %v187_v57 = vld [vmem:[#allocation0 + $0x8] sm:$0x1] }
  0xc0   :  { %220 = vst [vmem:[%s379_s1 + $0x1] sm:$0x1] %v187_v57 }

// kernel: tile.18
= control target key start
LH: loop header
LB: loop body
LE: loop exit
PB: predicated region body
PF: predicated region fallthrough
CT: control target
= control target key end

     0   :  { %s28_s0 = inlined_call_operand.vmem [shape: f32[16], index: 0, kind: input, shape index: {}]   ;;  %s29_s1 = inlined_call_operand.vmem [shape: f32[10,16], index: 1, kind: output, shape index: {}]  }
   0x1   :  { %v4_v0 = vld [vmem:[%s28_s0] ss:$0 sm:$0xff] }
   0x2   :  { %5 = vst [vmem:[%s29_s1] sm:$0xff] %v4_v0 }
   0x3   :  { %8 = vst [vmem:[%s29_s1 + $0x8] sm:$0xff] %v4_v0 }

// kernel: tile.19
= control target key start
LH: loop header
LB: loop body
LE: loop exit
PB: predicated region body
PF: predicated region fallthrough
CT: control target
= control target key end

     0   :  { %s76_s10 = smov 112   ;;  %s77_s11 = smov 80   ;;  %vm4_vm0 = vcmask 130048   ;;  %vm10_vm1 = vcmask 1048448   ;;  %vm16_vm2 = vcmask 917248   ;;  %vm22_vm3 = vcmask 786048   ;;  %s123_s0 = inlined_call_operand.vmem [shape: f32[10,16], index: 0, kind: input, shape index: {}]   ;;  %s124_s1 = inlined_call_operand.vmem [shape: f32[1,160], index: 1, kind: output, shape index: {}]  }
   0x1   :  { %v61_v0 = vld [vmem:[%s123_s0 + $0x7] sm:$0x1]   ;;  %v63_v1 = vld [vmem:[%s123_s0 + $0x5] sm:$0x1]   ;;  %v65_v2 = vld [vmem:[%s123_s0 + $0x3] sm:$0x1]  }
   0x2   :  { %8 = vrot.lane.b32.xlu0 %v61_v0, %s76_s10  ;;  %20 = vrot.lane.b32.xlu1 %v63_v1, %s77_s11  ;;  %s78_s14 = smov 48   ;;  %v62_v3 = vld [vmem:[%s123_s0 + $0x6] sm:$0x1]   ;;  %v64_v4 = vld [vmem:[%s123_s0 + $0x4] sm:$0x1]   ;;  %s79_s19 = smov 96  }
   0x3   :  { %32 = vrot.lane.b32.xlu2 %v65_v2, %s78_s14  ;;  %s80_s20 = smov 64   ;;  %v66_v5 = vld [vmem:[%s123_s0 + $0x2] sm:$0x1]   ;;  %s43_s23 = smov 3  ;;  %vm28_vm4 = vcmask 654848   ;;  %vm34_vm5 = vcmask 523648  }
   0x4   :  { %s81_s24 = smov 32   ;;  %v67_v6 = vld [vmem:[%s123_s0 + $0x1] ss:$8 sm:%s43_s23]   ;;  %s82_s27 = smov 16   ;;  %vm40_vm6 = vcmask 392448   ;;  %vm47_vm7 = vcmask 261248  }
   0x5   :  { %s2_s28 = smov 3 }
   0x6   :  { %v3_v7 = vld [vmem:[%s123_s0] ss:$8 sm:%s2_s28]  }
   0x7   :  { %5 = vst.msk [vmem:[#allocation0] ss:$8 sm:$0x3] %vm4_vm0, %v3_v7  }
   0xa   :  { %14 = vrot.lane.b32.xlu0 %v62_v3, %s79_s19  ;;  %26 = vrot.lane.b32.xlu1 %v64_v4, %s80_s20 }
   0xb   :  { %38 = vrot.lane.b32.xlu2 %v66_v5, %s81_s24 }
  0x12   :  { %45 = vrot.lane.b32.xlu0 %v67_v6, %s82_s27 }
  0x5d   :  { %v33_v8 = vpop.permute.xlu2 %32  }
  0x65   :  { %v39_v9 = vpop.permute.xlu2 %38  }
  0x74   :  { %v9_v10 = vpop.permute.xlu0 %8   ;;  %v21_v11 = vpop.permute.xlu1 %20  }
  0x75   :  { %11 = vst.msk [vmem:[#allocation0] sm:$0x1] %vm10_vm1, %v9_v10  }
  0x7c   :  { %v15_v12 = vpop.permute.xlu0 %14   ;;  %v27_v13 = vpop.permute.xlu1 %26  }
  0x7d   :  { %17 = vst.msk [vmem:[#allocation0] sm:$0x1] %vm16_vm2, %v15_v12  }
  0x7e   :  { %23 = vst.msk [vmem:[#allocation0] sm:$0x1] %vm22_vm3, %v21_v11  }
  0x7f   :  { %29 = vst.msk [vmem:[#allocation0] sm:$0x1] %vm28_vm4, %v27_v13  }
  0x80   :  { %35 = vst.msk [vmem:[#allocation0] sm:$0x1] %vm34_vm5, %v33_v8  }
  0x81   :  { %41 = vst.msk [vmem:[#allocation0] sm:$0x1] %vm40_vm6, %v39_v9  }
  0x84   :  { %v46_v14 = vpop.permute.xlu0 %45  }
  0x85   :  { %48 = vst.msk [vmem:[#allocation0] ss:$8 sm:$0x3] %vm47_vm7, %v46_v14  }
  0x8c   :  { %v51_v15 = vld [vmem:[#allocation0] sm:$0x1]  ;;  %v56_v16 = vld [vmem:[#allocation0 + $0x8] sm:$0x1] }
  0x8d   :  { %54 = vst [vmem:[%s124_s1] sm:$0x1] %v51_v15 }
  0x8e   :  { %68 = vst [vmem:[%s124_s1 + $0x1] sm:$0x1] %v56_v16 }

// kernel: net_cifar10_forward.1
= control target key start
LH: loop header
LB: loop body
LE: loop exit
PB: predicated region body
PF: predicated region fallthrough
CT: control target
= control target key end

     0   :  { %s7583_s17 = smov 0   ;;  %s10946_s0 = inlined_call_operand.vmem [shape: bf16[32,64,96], index: 0, kind: input, shape index: {}]   ;;  %s10947_s1 = inlined_call_operand.vmem [shape: bf16[5,96,168], index: 1, kind: input, shape index: {}]   ;;  %s10948_s2 = inlined_call_operand.vmem [shape: f32[1,168], index: 2, kind: input, shape index: {}]   ;;  %s10949_s3 = inlined_call_operand.vmem [shape: bf16[5,162,160], index: 3, kind: input, shape index: {}]   ;;  %s10950_s4 = inlined_call_operand.vmem [shape: f32[1,160], index: 4, kind: input, shape index: {}]   ;;  %s10951_s5 = inlined_call_operand.vmem [shape: bf16[5,144,120], index: 5, kind: input, shape index: {}]   ;;  %s10952_s6 = inlined_call_operand.vmem [shape: f32[1,120], index: 6, kind: input, shape index: {}]   ;;  %s10953_s7 = inlined_call_operand.vmem [shape: bf16[120,84], index: 7, kind: input, shape index: {}]   ;;  %s10954_s8 = inlined_call_operand.vmem [shape: f32[1,84], index: 8, kind: input, shape index: {}]   ;;  %s10955_s9 = inlined_call_operand.vmem [shape: bf16[84,128], index: 9, kind: input, shape index: {}]   ;;  %s10956_s10 = inlined_call_operand.vmem [shape: f32[1,128], index: 10, kind: input, shape index: {}]   ;;  %s10957_s11 = inlined_call_operand.vmem [shape: f32[64,128], index: 11, kind: output, shape index: {}]  }
   0x1 LB: > { %v5324_v0 = vld [vmem:[%s10947_s1 + $0xb0] sm:$0xf]  ;;  %v7093_v1 = vld [vmem:[%s10947_s1 + $0xb4] sm:$0xf0]  ;;  %v7092_v2 = vld [vmem:[%s10947_s1 + $0xb4] sm:$0xf]  ;;  %s7515_s17 = sphi %s7583_s17, %s44_s17  }
   0x2   : > { %v7597_v3 = vor.u32 %v7093_v1, %v5324_v0  ;;  %v5326_v4 = vld [vmem:[%s10947_s1 + $0xb8] sm:$0xf0]  ;;  %v5396_v5 = vld [vmem:[%s10947_s1 + $0x50] sm:$0xf]  ;;  %v7076_v6 = vld [vmem:[%s10947_s1 + $0x54] sm:$0xf0] }
   0x3   : > { %v7608_v7 = vor.u32 %v7092_v2, %v5326_v4  ;;  %v7610_v8 = vor.u32 %v7076_v6, %v5396_v5  ;;  %v7075_v9 = vld [vmem:[%s10947_s1 + $0x54] sm:$0xf]  ;;  %v5398_v10 = vld [vmem:[%s10947_s1 + $0x58] sm:$0xf0]  ;;  %v5316_v11 = vld [vmem:[%s10947_s1 + $0xa0] sm:$0xf] }
   0x4   : > { %189 = vmatpush.bf16.msra.mxu0 %v7597_v3  ;;  %v7622_v12 = vor.u32 %v7075_v9, %v5398_v10  ;;  %v7091_v13 = vld [vmem:[%s10947_s1 + $0xa4] sm:$0xf0]  ;;  %v7090_v14 = vld [vmem:[%s10947_s1 + $0xa4] sm:$0xf]  ;;  %v5318_v15 = vld [vmem:[%s10947_s1 + $0xa8] sm:$0xf0] }
   0x5   : > { %218 = vmatpush.bf16.msra.mxu1 %v7608_v7  ;;  %339 = vmatpush.bf16.msra.mxu2 %v7610_v8  ;;  %v7635_v16 = vor.u32 %v7091_v13, %v5316_v11  ;;  %v7637_v17 = vor.u32 %v7090_v14, %v5318_v15  ;;  %v5388_v18 = vld [vmem:[%s10947_s1 + $0x40] sm:$0xf]  ;;  %v7074_v19 = vld [vmem:[%s10947_s1 + $0x44] sm:$0xf0]  ;;  %v7073_v20 = vld [vmem:[%s10947_s1 + $0x44] sm:$0xf] }
   0x6   : > { %368 = vmatpush.bf16.msra.mxu3 %v7622_v12  ;;  %v7649_v21 = vor.u32 %v7074_v19, %v5388_v18  ;;  %v5390_v22 = vld [vmem:[%s10947_s1 + $0x48] sm:$0xf0]  ;;  %v5308_v23 = vld [vmem:[%s10947_s1 + $0x90] sm:$0xf]  ;;  %v7089_v24 = vld [vmem:[%s10947_s1 + $0x94] sm:$0xf0] }
   0x7   : > { %v7660_v25 = vor.u32 %v7073_v20, %v5390_v22  ;;  %v7088_v26 = vld [vmem:[%s10947_s1 + $0x94] sm:$0xf]  ;;  %v5310_v27 = vld [vmem:[%s10947_s1 + $0x98] sm:$0xf0]  ;;  %v5380_v28 = vld [vmem:[%s10947_s1 + $0x30] sm:$0xf]  ;;  %v7672_v29 = vor.u32 %v7089_v24, %v5308_v23 }
   0x8   : > { %190 = vmatpush.bf16.msra.mxu0 %v7635_v16  ;;  %v7072_v30 = vld [vmem:[%s10947_s1 + $0x34] sm:$0xf0]  ;;  %v7071_v31 = vld [vmem:[%s10947_s1 + $0x34] sm:$0xf]  ;;  %v5382_v32 = vld [vmem:[%s10947_s1 + $0x38] sm:$0xf0]  ;;  %v7685_v33 = vor.u32 %v7088_v26, %v5310_v27 }
   0x9   : > { %219 = vmatpush.bf16.msra.mxu1 %v7637_v17  ;;  %340 = vmatpush.bf16.msra.mxu2 %v7649_v21  ;;  %v7687_v34 = vor.u32 %v7072_v30, %v5380_v28  ;;  %v5300_v35 = vld [vmem:[%s10947_s1 + $0x80] sm:$0xf]  ;;  %v7087_v36 = vld [vmem:[%s10947_s1 + $0x84] sm:$0xf0]  ;;  %v7086_v37 = vld [vmem:[%s10947_s1 + $0x84] sm:$0xf]  ;;  %v7699_v38 = vor.u32 %v7071_v31, %v5382_v32 }
   0xa   : > { %369 = vmatpush.bf16.msra.mxu3 %v7660_v25  ;;  %v5302_v39 = vld [vmem:[%s10947_s1 + $0x88] sm:$0xf0]  ;;  %v5372_v40 = vld [vmem:[%s10947_s1 + $0x20] sm:$0xf]  ;;  %v7070_v41 = vld [vmem:[%s10947_s1 + $0x24] sm:$0xf0]  ;;  %v7717_v44 = vor.u32 %v7087_v36, %v5300_v35 }
   0xb   : > { %v7069_v42 = vld [vmem:[%s10947_s1 + $0x24] sm:$0xf]  ;;  %v5374_v43 = vld [vmem:[%s10947_s1 + $0x28] sm:$0xf0]  ;;  %v7721_v45 = vor.u32 %v7086_v37, %v5302_v39  ;;  %v5373_v46 = vor.u32 %v7070_v41, %v5372_v40  ;;  %v5292_v47 = vld [vmem:[%s10947_s1 + $0x70] sm:$0xf] }
   0xc   : > { %191 = vmatpush.bf16.msra.mxu0 %v7672_v29  ;;  %v7085_v48 = vld [vmem:[%s10947_s1 + $0x74] sm:$0xf0]  ;;  %v7084_v49 = vld [vmem:[%s10947_s1 + $0x74] sm:$0xf]  ;;  %v5377_v50 = vor.u32 %v7069_v42, %v5374_v43  ;;  %v5294_v51 = vld [vmem:[%s10947_s1 + $0x78] sm:$0xf0] }
   0xd   : > { %220 = vmatpush.bf16.msra.mxu1 %v7685_v33  ;;  %341 = vmatpush.bf16.msra.mxu2 %v7687_v34  ;;  %v5364_v52 = vld [vmem:[%s10947_s1 + $0x10] sm:$0xf]  ;;  %v7068_v53 = vld [vmem:[%s10947_s1 + $0x14] sm:$0xf0]  ;;  %v7067_v54 = vld [vmem:[%s10947_s1 + $0x14] sm:$0xf]  ;;  %v5293_v56 = vor.u32 %v7085_v48, %v5292_v47  ;;  %v5297_v58 = vor.u32 %v7084_v49, %v5294_v51 }
   0xe   : > { %370 = vmatpush.bf16.msra.mxu3 %v7699_v38  ;;  %v5366_v55 = vld [vmem:[%s10947_s1 + $0x18] sm:$0xf0]  ;;  %v5284_v57 = vld [vmem:[%s10947_s1 + $0x60] sm:$0xf]  ;;  %v5365_v59 = vor.u32 %v7068_v53, %v5364_v52  ;;  %v7083_v60 = vld [vmem:[%s10947_s1 + $0x64] sm:$0xf0] }
   0xf   : > { %v7082_v61 = vld [vmem:[%s10947_s1 + $0x64] sm:$0xf]  ;;  %s7060_s13 = sshll.u32 %s7515_s17, 6  ;;  %v5369_v62 = vor.u32 %v7067_v54, %v5366_v55  ;;  %v5286_v63 = vld [vmem:[%s10947_s1 + $0x68] sm:$0xf0]  ;;  %v5285_v5 = vor.u32 %v7083_v60, %v5284_v57  ;;  %vm174_vm0 = vcmask 785408  }
  0x10   : > { %192 = vmatpush.bf16.msra.mxu0 %v7717_v44  ;;  %v5356_v0 = vld [vmem:[%s10947_s1] sm:$0xf]  ;;  %v7066_v1 = vld [vmem:[%s10947_s1 + $0x4] sm:$0xf0]  ;;  %v7065_v2 = vld [vmem:[%s10947_s1 + $0x4] sm:$0xf]  ;;  %s7780_s27 = scalar_lea.vmem %s10946_s0, %s7060_s13  ;;  %v5289_v6 = vor.u32 %v7082_v61, %v5286_v63 }
  0x11   : > { %221 = vmatpush.bf16.msra.mxu1 %v7721_v45  ;;  %342 = vmatpush.bf16.msra.mxu2 %v5373_v46  ;;  %v5358_v4 = vld [vmem:[%s10947_s1 + $0x8] sm:$0xf0]  ;;  %v5357_v9 = vor.u32 %v7066_v1, %v5356_v0  ;;  %v7783_v11 = vld [vmem:[%s7780_s27 + $0x20] sm:$0xff]  ;;  %v5506_v14 = vld [vmem:[%s10947_s1 + $0x110] sm:$0xf]  ;;  %s7521_s29 = smov 122  }
  0x12   : > { %371 = vmatpush.bf16.msra.mxu3 %v5377_v50  ;;  %v5361_v10 = vor.u32 %v7065_v2, %v5358_v4  ;;  %v7061_v13 = vld [vmem:[%s7780_s27] sm:$0xff]  ;;  %v7110_v15 = vld [vmem:[%s10947_s1 + $0x114] sm:$0xf0]  ;;  %v5508_v18 = vld [vmem:[%s10947_s1 + $0x118] sm:$0xf0]  ;;  %vm1452_vm1 = vcmask 998400  }
  0x13   : > { %v5498_v19 = vld [vmem:[%s10947_s1 + $0x100] sm:$0xf]  ;;  %v7108_v20 = vld [vmem:[%s10947_s1 + $0x104] sm:$0xf0]  ;;  %v7107_v22 = vld [vmem:[%s10947_s1 + $0x104] sm:$0xf] }
  0x14   : > { %193 = vmatpush.bf16.msra.mxu0 %v5293_v56  ;;  %v5500_v23 = vld [vmem:[%s10947_s1 + $0x108] sm:$0xf0]  ;;  %v5499_v24 = vor.u32 %v7108_v20, %v5498_v19  ;;  %v7851_v26 = vld [vmem:[%s7780_s27 + $0x38] sm:$0xff]  ;;  %v5490_v28 = vld [vmem:[%s10947_s1 + $0xf0] sm:$0xf]  ;;  %vm1504_vm2 = vcmask 1043456  }
  0x15   : > { %222 = vmatpush.bf16.msra.mxu1 %v5297_v58  ;;  %343 = vmatpush.bf16.msra.mxu2 %v5365_v59  ;;  %v7064_v27 = vld [vmem:[%s7780_s27 + $0x18] sm:$0xff]  ;;  %v7105_v30 = vld [vmem:[%s10947_s1 + $0xf4] sm:$0xf]  ;;  %v5482_v35 = vld [vmem:[%s10947_s1 + $0xe0] sm:$0xf]  ;;  %vm1505_vm3 = vcmask 277508  }
  0x16   : > { %372 = vmatpush.bf16.msra.mxu3 %v5369_v62  ;;  %v5492_v32 = vld [vmem:[%s10947_s1 + $0xf8] sm:$0xf0]  ;;  %v7104_v36 = vld [vmem:[%s10947_s1 + $0xe4] sm:$0xf0]  ;;  %v7103_v37 = vld [vmem:[%s10947_s1 + $0xe4] sm:$0xf] }
  0x17   : > { %v5484_v39 = vld [vmem:[%s10947_s1 + $0xe8] sm:$0xf0]  ;;  %v5474_v40 = vld [vmem:[%s10947_s1 + $0xd0] sm:$0xf]  ;;  %v7102_v41 = vld [vmem:[%s10947_s1 + $0xd4] sm:$0xf0] }
  0x18   : > { %194 = vmatpush.bf16.msra.mxu0 %v5285_v5  ;;  %v5487_v42 = vor.u32 %v7103_v37, %v5484_v39  ;;  %v7101_v43 = vld [vmem:[%s10947_s1 + $0xd4] sm:$0xf]  ;;  %v7908_v47 = vld [vmem:[%s7780_s27 + $0x48] sm:$0xff]  ;;  %v5466_v48 = vld [vmem:[%s10947_s1 + $0xc0] sm:$0xf]  ;;  %s8599_s30 = scalar_lea.vmem [#allocation2], %s7060_s13 }
  0x19   : > { %223 = vmatpush.bf16.msra.mxu1 %v5289_v6  ;;  %344 = vmatpush.bf16.msra.mxu2 %v5357_v9  ;;  %v7100_v49 = vld [vmem:[%s10947_s1 + $0xc4] sm:$0xf0]  ;;  %v5468_v52 = vld [vmem:[%s10947_s1 + $0xc8] sm:$0xf0]  ;;  %v7931_v54 = vld [vmem:[%s7780_s27 + $0x50] sm:$0xff]  ;;  %s44_s17 = sadd.s32 1, %s7515_s17  }
  0x1a   : > { %373 = vmatpush.bf16.msra.mxu3 %v5361_v10  ;;  %v5467_v51 = vor.u32 %v7100_v49, %v5466_v48  ;;  %v5608_v55 = vld [vmem:[%s10947_s1 + $0x170] sm:$0xf]  ;;  %v7126_v57 = vld [vmem:[%s10947_s1 + $0x174] sm:$0xf]  ;;  %v7954_v61 = vld [vmem:[%s7780_s27 + $0x58] sm:$0xff]  ;;  %p41_p0 = scmp.ge.s32.totalorder %s44_s17, 14  }
  0x1b   : > { %5330 = vmatmul.msk.bf16.vlgmr.msra.gmra.mxu0 %vm174_vm0, %v7783_v11  ;;  %v7125_v63 = vld [vmem:[%s10947_s1 + $0x164] sm:$0xf0]  ;;  %v7124_v0 = vld [vmem:[%s10947_s1 + $0x164] sm:$0xf]  ;;  %v5602_v2 = vld [vmem:[%s10947_s1 + $0x168] sm:$0xf0] }
  0x1c   : > { %5334 = vmatmul.msk.bf16.vlgmr.msra.gmra.mxu1 %vm174_vm0, %v7783_v11  ;;  %5402 = vmatmul.msk.bf16.vlgmr.msra.gmra.mxu2 %vm174_vm0, %v7061_v13  ;;  %v5605_v4 = vor.u32 %v7124_v0, %v5602_v2  ;;  %v5570_v48 = vld [vmem:[%s10947_s1 + $0x128] sm:$0xf0]  ;;  %vm8593_vm4 = vmor %vm1505_vm3, %vm1504_vm2  ;;  %s8663_s13 = smov (%p41_p0), 0  }
  0x1d   : > { %499 = vmatpush.bf16.msrb.mxu2 %v7610_v8  ;;  %5406 = vmatmul.msk.bf16.vlgmr.msra.gmra.mxu3 %vm174_vm0, %v7061_v13  ;;  %v7817_v8 = vld [vmem:[%s7780_s27 + $0x30] sm:$0xff] }
  0x1e   : > { %528 = vmatpush.bf16.msrb.mxu3 %v7622_v12  ;;  %441 = vmatpush.bf16.msrb.mxu0 %v7597_v3  ;;  %v7805_v3 = vld [vmem:[%s7780_s27 + $0x28] sm:$0xff]  ;;  %v7063_v12 = vld [vmem:[%s7780_s27 + $0x10] sm:$0xff] }
  0x1f   : > { %470 = vmatpush.bf16.msrb.mxu1 %v7608_v7  ;;  %v7062_v7 = vld [vmem:[%s7780_s27 + $0x8] sm:$0xff] }
  0x21   : > { %500 = vmatpush.bf16.msrb.mxu2 %v7649_v21 }
  0x22   : > { %529 = vmatpush.bf16.msrb.mxu3 %v7660_v25  ;;  %442 = vmatpush.bf16.msrb.mxu0 %v7635_v16  ;;  %v7109_v16 = vld [vmem:[%s10947_s1 + $0x114] sm:$0xf]  ;;  %v5503_v25 = vor.u32 %v7107_v22, %v5500_v23 }
  0x23   : > { %471 = vmatpush.bf16.msrb.mxu1 %v7637_v17  ;;  %v5507_v17 = vor.u32 %v7110_v15, %v5506_v14  ;;  %v5511_v21 = vor.u32 %v7109_v16, %v5508_v18  ;;  %v7121_v14 = vld [vmem:[%s10947_s1 + $0x144] sm:$0xf0]  ;;  %v7120_v15 = vld [vmem:[%s10947_s1 + $0x144] sm:$0xf] }
  0x25   : > { %501 = vmatpush.bf16.msrb.mxu2 %v7687_v34  ;;  %v7873_v34 = vld [vmem:[%s7780_s27 + $0x40] sm:$0xff] }
  0x26   : > { %530 = vmatpush.bf16.msrb.mxu3 %v7699_v38  ;;  %443 = vmatpush.bf16.msrb.mxu0 %v7672_v29  ;;  %v7106_v29 = vld [vmem:[%s10947_s1 + $0xf4] sm:$0xf0]  ;;  %v5483_v38 = vor.u32 %v7104_v36, %v5482_v35  ;;  %v5578_v36 = vld [vmem:[%s10947_s1 + $0x138] sm:$0xf0] }
  0x27   : > { %472 = vmatpush.bf16.msrb.mxu1 %v7685_v33  ;;  %v5491_v31 = vor.u32 %v7106_v29, %v5490_v28  ;;  %v5495_v33 = vor.u32 %v7105_v30, %v5492_v32  ;;  %v8018_v29 = vld [vmem:[%s7780_s27 + $0x68] sm:$0xff]  ;;  %v5576_v32 = vld [vmem:[%s10947_s1 + $0x130] sm:$0xf] }
  0x29   : > { %502 = vmatpush.bf16.msrb.mxu2 %v5373_v46 }
  0x2a   : > { %531 = vmatpush.bf16.msrb.mxu3 %v5377_v50  ;;  %444 = vmatpush.bf16.msrb.mxu0 %v7717_v44  ;;  %v5476_v44 = vld [vmem:[%s10947_s1 + $0xd8] sm:$0xf0]  ;;  %v7099_v50 = vld [vmem:[%s10947_s1 + $0xc4] sm:$0xf] }
  0x2b   : > { %473 = vmatpush.bf16.msrb.mxu1 %v7721_v45  ;;  %5331 = vmatmul.msk.bf16.gmra.mxu0 %vm174_vm0, %v7805_v3  ;;  %v5475_v45 = vor.u32 %v7102_v41, %v5474_v40  ;;  %v5479_v46 = vor.u32 %v7101_v43, %v5476_v44  ;;  %v5471_v53 = vor.u32 %v7099_v50, %v5468_v52  ;;  %v5568_v44 = vld [vmem:[%s10947_s1 + $0x120] sm:$0xf] }
  0x2c   : > { %5335 = vmatmul.msk.bf16.gmra.mxu1 %vm174_vm0, %v7805_v3  ;;  %5403 = vmatmul.msk.bf16.gmra.mxu2 %vm174_vm0, %v7062_v7 }
  0x2d   : > { %503 = vmatpush.bf16.msrb.mxu2 %v5365_v59  ;;  %5407 = vmatmul.msk.bf16.gmra.mxu3 %vm174_vm0, %v7062_v7  ;;  %v5610_v59 = vld [vmem:[%s10947_s1 + $0x178] sm:$0xf0]  ;;  %v7989_v7 = vld [vmem:[%s7780_s27 + $0x60] sm:$0xff] }
  0x2e   : > { %532 = vmatpush.bf16.msrb.mxu3 %v5369_v62  ;;  %445 = vmatpush.bf16.msrb.mxu0 %v5293_v56  ;;  %v7127_v56 = vld [vmem:[%s10947_s1 + $0x174] sm:$0xf0]  ;;  %v5613_v60 = vor.u32 %v7126_v57, %v5610_v59  ;;  %v5600_v62 = vld [vmem:[%s10947_s1 + $0x160] sm:$0xf] }
  0x2f   : > { %474 = vmatpush.bf16.msrb.mxu1 %v5297_v58  ;;  %v5609_v58 = vor.u32 %v7127_v56, %v5608_v55  ;;  %v5601_v1 = vor.u32 %v7125_v63, %v5600_v62  ;;  %v8061_v55 = vld [vmem:[%s7780_s27 + $0x70] sm:$0xff]  ;;  %v7144_v59 = vld [vmem:[%s10947_s1 + $0x1d4] sm:$0xf0] }
  0x31   : > { %504 = vmatpush.bf16.msrb.mxu2 %v5357_v9  ;;  %v7122_v9 = vld [vmem:[%s10947_s1 + $0x154] sm:$0xf] }
  0x32   : > { %533 = vmatpush.bf16.msrb.mxu3 %v5361_v10  ;;  %446 = vmatpush.bf16.msrb.mxu0 %v5285_v5  ;;  %v5592_v5 = vld [vmem:[%s10947_s1 + $0x150] sm:$0xf] }
  0x33   : > { %475 = vmatpush.bf16.msrb.mxu1 %v5289_v6  ;;  %v7123_v6 = vld [vmem:[%s10947_s1 + $0x154] sm:$0xf0] }
  0x34   : > { %v5593_v10 = vor.u32 %v7123_v6, %v5592_v5 }
  0x35   : > { %748 = vmatpush.bf16.msra.mxu2 %v5507_v17 }
  0x36   : > { %630 = vmatpush.bf16.msra.mxu0 %v5507_v17  ;;  %777 = vmatpush.bf16.msra.mxu3 %v5511_v21  ;;  %v5586_v17 = vld [vmem:[%s10947_s1 + $0x148] sm:$0xf0] }
  0x37   : > { %659 = vmatpush.bf16.msra.mxu1 %v5511_v21  ;;  %v5589_v19 = vor.u32 %v7120_v15, %v5586_v17  ;;  %v7142_v15 = vld [vmem:[%s10947_s1 + $0x1c4] sm:$0xf0] }
  0x39   : > { %749 = vmatpush.bf16.msra.mxu2 %v5499_v24 }
  0x3a   : > { %631 = vmatpush.bf16.msra.mxu0 %v5499_v24  ;;  %778 = vmatpush.bf16.msra.mxu3 %v5503_v25 }
  0x3b   : > { %5332 = vmatmul.msk.bf16.gmra.mxu0 %vm174_vm0, %v7817_v8  ;;  %660 = vmatpush.bf16.msra.mxu1 %v5503_v25 }
  0x3c   : > { %5336 = vmatmul.msk.bf16.gmra.mxu1 %vm174_vm0, %v7817_v8  ;;  %5404 = vmatmul.msk.bf16.gmra.mxu2 %vm174_vm0, %v7063_v12 }
  0x3d   : > { %5408 = vmatmul.msk.bf16.gmra.mxu3 %vm174_vm0, %v7063_v12  ;;  %750 = vmatpush.bf16.msra.mxu2 %v5491_v31  ;;  %v5584_v12 = vld [vmem:[%s10947_s1 + $0x140] sm:$0xf] }
  0x3e   : > { %632 = vmatpush.bf16.msra.mxu0 %v5491_v31  ;;  %779 = vmatpush.bf16.msra.mxu3 %v5495_v33  ;;  %v5585_v16 = vor.u32 %v7121_v14, %v5584_v12  ;;  %v5702_v14 = vld [vmem:[%s10947_s1 + $0x1c0] sm:$0xf] }
  0x3f   : > { %661 = vmatpush.bf16.msra.mxu1 %v5495_v33  ;;  %v7119_v33 = vld [vmem:[%s10947_s1 + $0x134] sm:$0xf0]  ;;  %v5703_v17 = vor.u32 %v7142_v15, %v5702_v14 }
  0x40   : > { %v5577_v35 = vor.u32 %v7119_v33, %v5576_v32  ;;  %v7139_v32 = vld [vmem:[%s10947_s1 + $0x1b4] sm:$0xf] }
  0x41   : > { %751 = vmatpush.bf16.msra.mxu2 %v5483_v38 }
  0x42   : > { %633 = vmatpush.bf16.msra.mxu0 %v5483_v38  ;;  %780 = vmatpush.bf16.msra.mxu3 %v5487_v42 }
  0x43   : > { %662 = vmatpush.bf16.msra.mxu1 %v5487_v42 }
  0x45   : > { %752 = vmatpush.bf16.msra.mxu2 %v5475_v45 }
  0x46   : > { %634 = vmatpush.bf16.msra.mxu0 %v5475_v45  ;;  %781 = vmatpush.bf16.msra.mxu3 %v5479_v46  ;;  %v7117_v45 = vld [vmem:[%s10947_s1 + $0x124] sm:$0xf0] }
  0x47   : > { %663 = vmatpush.bf16.msra.mxu1 %v5479_v46  ;;  %v7116_v46 = vld [vmem:[%s10947_s1 + $0x124] sm:$0xf] }
  0x48   : > { %v5573_v49 = vor.u32 %v7116_v46, %v5570_v48  ;;  %v7138_v46 = vld [vmem:[%s10947_s1 + $0x1a4] sm:$0xf0] }
  0x49   : > { %753 = vmatpush.bf16.msra.mxu2 %v5467_v51 }
  0x4a   : > { %635 = vmatpush.bf16.msra.mxu0 %v5467_v51  ;;  %782 = vmatpush.bf16.msra.mxu3 %v5471_v53 }
  0x4b   : > { %5333 = vmatmul.msk.bf16.gmra.mxu0 %vm174_vm0, %v7851_v26  ;;  %664 = vmatpush.bf16.msra.mxu1 %v5471_v53 }
  0x4c   : > { %5337 = vmatmul.msk.bf16.gmra.mxu1 %vm174_vm0, %v7851_v26  ;;  %5405 = vmatmul.msk.bf16.gmra.mxu2 %vm174_vm0, %v7064_v27 }
  0x4d   : > { %5409 = vmatmul.msk.bf16.gmra.mxu3 %vm174_vm0, %v7064_v27 }
  0x5b   : > { %5436 = vmatmul.msk.bf16.vlgmr.msrb.gmra.mxu0 %vm174_vm0, %v7873_v34 }
  0x5c   : > { %5440 = vmatmul.msk.bf16.vlgmr.msrb.gmra.mxu1 %vm174_vm0, %v7873_v34  ;;  %5444 = vmatmul.msk.bf16.vlgmr.msrb.gmra.mxu2 %vm174_vm0, %v7783_v11 }
  0x5d   : > { %5448 = vmatmul.msk.bf16.vlgmr.msrb.gmra.mxu3 %vm174_vm0, %v7783_v11  ;;  %1013 = vmatpush.bf16.msrb.mxu2 %v5609_v58  ;;  %v5594_v11 = vld [vmem:[%s10947_s1 + $0x158] sm:$0xf0] }
  0x5e   : > { %895 = vmatpush.bf16.msrb.mxu0 %v5609_v58  ;;  %1042 = vmatpush.bf16.msrb.mxu3 %v5613_v60  ;;  %v5597_v13 = vor.u32 %v7122_v9, %v5594_v11  ;;  %v5710_v58 = vld [vmem:[%s10947_s1 + $0x1d0] sm:$0xf] }
  0x5f   : > { %924 = vmatpush.bf16.msrb.mxu1 %v5613_v60  ;;  %v7143_v60 = vld [vmem:[%s10947_s1 + $0x1d4] sm:$0xf]  ;;  %v5711_v62 = vor.u32 %v7144_v59, %v5710_v58 }
  0x61   : > { %1014 = vmatpush.bf16.msrb.mxu2 %v5601_v1 }
  0x62   : > { %1043 = vmatpush.bf16.msrb.mxu3 %v5605_v4  ;;  %896 = vmatpush.bf16.msrb.mxu0 %v5601_v1 }
  0x63   : > { %925 = vmatpush.bf16.msrb.mxu1 %v5605_v4 }
  0x65   : > { %1015 = vmatpush.bf16.msrb.mxu2 %v5593_v10 }
  0x66   : > { %897 = vmatpush.bf16.msrb.mxu0 %v5593_v10  ;;  %1044 = vmatpush.bf16.msrb.mxu3 %v5597_v13 }
  0x67   : > { %926 = vmatpush.bf16.msrb.mxu1 %v5597_v13 }
  0x69   : > { %1016 = vmatpush.bf16.msrb.mxu2 %v5585_v16 }
  0x6a   : > { %898 = vmatpush.bf16.msrb.mxu0 %v5585_v16  ;;  %1045 = vmatpush.bf16.msrb.mxu3 %v5589_v19  ;;  %v7141_v16 = vld [vmem:[%s10947_s1 + $0x1c4] sm:$0xf] }
  0x6b   : > { %5437 = vmatmul.msk.bf16.gmra.mxu0 %vm174_vm0, %v7908_v47  ;;  %927 = vmatpush.bf16.msrb.mxu1 %v5589_v19 }
  0x6c   : > { %5441 = vmatmul.msk.bf16.gmra.mxu1 %vm174_vm0, %v7908_v47  ;;  %5445 = vmatmul.msk.bf16.gmra.mxu2 %vm174_vm0, %v7805_v3 }
  0x6d   : > { %5449 = vmatmul.msk.bf16.gmra.mxu3 %vm174_vm0, %v7805_v3  ;;  %1017 = vmatpush.bf16.msrb.mxu2 %v5577_v35 }
  0x6e   : > { %899 = vmatpush.bf16.msrb.mxu0 %v5577_v35 }
  0x7b   : > { %5438 = vmatmul.msk.bf16.gmra.mxu0 %vm174_vm0, %v7931_v54 }
  0x7c   : > { %5442 = vmatmul.msk.bf16.gmra.mxu1 %vm174_vm0, %v7931_v54  ;;  %5446 = vmatmul.msk.bf16.gmra.mxu2 %vm174_vm0, %v7817_v8 }
  0x7d   : > { %5450 = vmatmul.msk.bf16.gmra.mxu3 %vm174_vm0, %v7817_v8 }
  0x8b   : > { %5439 = vmatmul.msk.bf16.gmra.mxu0 %vm174_vm0, %v7954_v61 }
  0x8c   : > { %5443 = vmatmul.msk.bf16.gmra.mxu1 %vm174_vm0, %v7954_v61  ;;  %5447 = vmatmul.msk.bf16.gmra.mxu2 %vm174_vm0, %v7851_v26 }
  0x8d   : > { %5451 = vmatmul.msk.bf16.gmra.mxu3 %vm174_vm0, %v7851_v26 }
  0x98   : > { %v196_v3 = vpop.f32.mrf.mxu0 }
  0x99   : > { %v225_v8 = vpop.f32.mrf.mxu1 }
  0x9b   : > { %5512 = vmatmul.msk.bf16.vlgmr.msra.gmra.mxu0 %vm174_vm0, %v7873_v34 }
  0x9c   : > { %5516 = vmatmul.msk.bf16.vlgmr.msra.gmra.mxu1 %vm174_vm0, %v7873_v34  ;;  %5546 = vmatmul.msk.bf16.vlgmr.msra.gmra.mxu2 %vm174_vm0, %v7989_v7  ;;  %v7118_v34 = vld [vmem:[%s10947_s1 + $0x134] sm:$0xf] }
  0x9d   : > { %5550 = vmatmul.msk.bf16.vlgmr.msra.gmra.mxu3 %vm174_vm0, %v7989_v7  ;;  %v5581_v37 = vor.u32 %v7118_v34, %v5578_v36  ;;  %v5696_v34 = vld [vmem:[%s10947_s1 + $0x1b8] sm:$0xf0] }
  0x9e   : > { %v5699_v35 = vor.u32 %v7139_v32, %v5696_v34 }
  0x9f   : > { %v346_v18 = vpop.f32.mrf.mxu2  ;;  %1046 = vmatpush.bf16.msrb.mxu3 %v5581_v37  ;;  %928 = vmatpush.bf16.msrb.mxu1 %v5581_v37 }
  0xa0   : > { %v8011_v20 = vadd.f32 %v346_v18, %v196_v3  ;;  %v375_v21 = vpop.f32.mrf.mxu3  ;;  %v198_v22 = vpop.f32.mrf.mxu0  ;;  %v8092_v3 = vld [vmem:[%s7780_s27 + $0x78] sm:$0xff]  ;;  %v5704_v18 = vld [vmem:[%s10947_s1 + $0x1c8] sm:$0xf0] }
  0xa1   : > { %v8013_v23 = vadd.f32 %v375_v21, %v225_v8  ;;  %v227_v24 = vpop.f32.mrf.mxu1  ;;  %v5707_v19 = vor.u32 %v7141_v16, %v5704_v18 }
  0xa3   : > { %1047 = vmatpush.bf16.msrb.mxu3 %v5573_v49  ;;  %929 = vmatpush.bf16.msrb.mxu1 %v5573_v49 }
  0xa7   : > { %v348_v25 = vpop.f32.mrf.mxu2 }
  0xa8   : > { %v8015_v26 = vadd.f32 %v348_v25, %v198_v22  ;;  %v377_v27 = vpop.f32.mrf.mxu3  ;;  %v201_v28 = vpop.f32.mrf.mxu0 }
  0xa9   : > { %v8020_v30 = vadd.f32 %v377_v27, %v227_v24  ;;  %v230_v31 = vpop.f32.mrf.mxu1 }
  0xab   : > { %5513 = vmatmul.msk.bf16.gmra.mxu0 %vm174_vm0, %v7908_v47 }
  0xac   : > { %5517 = vmatmul.msk.bf16.gmra.mxu1 %vm174_vm0, %v7908_v47  ;;  %5547 = vmatmul.msk.bf16.gmra.mxu2 %vm174_vm0, %v8018_v29  ;;  %v5569_v47 = vor.u32 %v7117_v45, %v5568_v44  ;;  %v5686_v45 = vld [vmem:[%s10947_s1 + $0x1a0] sm:$0xf] }
  0xad   : > { %5551 = vmatmul.msk.bf16.gmra.mxu3 %vm174_vm0, %v8018_v29  ;;  %v5687_v48 = vor.u32 %v7138_v46, %v5686_v45 }
  0xae   : > { %1018 = vmatpush.bf16.msrb.mxu2 %v5569_v47  ;;  %900 = vmatpush.bf16.msrb.mxu0 %v5569_v47  ;;  %v7137_v47 = vld [vmem:[%s10947_s1 + $0x1a4] sm:$0xf] }
  0xaf   : > { %v351_v38 = vpop.f32.mrf.mxu2 }
  0xb0   : > { %v8042_v39 = vadd.f32 %v351_v38, %v201_v28  ;;  %v380_v40 = vpop.f32.mrf.mxu3  ;;  %v203_v41 = vpop.f32.mrf.mxu0 }
  0xb1   : > { %v8044_v42 = vadd.f32 %v380_v40, %v230_v31  ;;  %v232_v43 = vpop.f32.mrf.mxu1  ;;  %v7140_v31 = vld [vmem:[%s10947_s1 + $0x1b4] sm:$0xf0] }
  0xb2   : > { %1278 = vmatpush.bf16.msra.mxu2 %v5711_v62  ;;  %1160 = vmatpush.bf16.msra.mxu0 %v5711_v62 }
  0xb6   : > { %1279 = vmatpush.bf16.msra.mxu2 %v5703_v17  ;;  %1161 = vmatpush.bf16.msra.mxu0 %v5703_v17 }
  0xb7   : > { %v353_v50 = vpop.f32.mrf.mxu2 }
  0xb8   : > { %v8058_v51 = vadd.f32 %v353_v50, %v203_v41  ;;  %v382_v52 = vpop.f32.mrf.mxu3  ;;  %v206_v53 = vpop.f32.mrf.mxu0  ;;  %v8135_v41 = vld [vmem:[%s7780_s27 + $0x80] sm:$0xff] }
  0xb9   : > { %v8063_v56 = vadd.f32 %v382_v52, %v232_v43  ;;  %v235_v57 = vpop.f32.mrf.mxu1 }
  0xbb   : > { %5514 = vmatmul.msk.bf16.gmra.mxu0 %vm174_vm0, %v7931_v54 }
  0xbc   : > { %5518 = vmatmul.msk.bf16.gmra.mxu1 %vm174_vm0, %v7931_v54  ;;  %5548 = vmatmul.msk.bf16.gmra.mxu2 %vm174_vm0, %v8061_v55  ;;  %v5712_v54 = vld [vmem:[%s10947_s1 + $0x1d8] sm:$0xf0] }
  0xbd   : > { %5552 = vmatmul.msk.bf16.gmra.mxu3 %vm174_vm0, %v8061_v55  ;;  %v5715_v0 = vor.u32 %v7143_v60, %v5712_v54 }
  0xbf   : > { %v356_v63 = vpop.f32.mrf.mxu2  ;;  %1307 = vmatpush.bf16.msra.mxu3 %v5715_v0  ;;  %1189 = vmatpush.bf16.msra.mxu1 %v5715_v0  ;;  %v8166_v0 = vld [vmem:[%s7780_s27 + $0x88] sm:$0xff] }
  0xc0   : > { %v8085_v1 = vadd.f32 %v356_v63, %v206_v53  ;;  %v385_v2 = vpop.f32.mrf.mxu3  ;;  %v208_v4 = vpop.f32.mrf.mxu0 }
  0xc1   : > { %v8087_v5 = vadd.f32 %v385_v2, %v235_v57  ;;  %v237_v6 = vpop.f32.mrf.mxu1 }
  0xc3   : > { %1308 = vmatpush.bf16.msra.mxu3 %v5707_v19  ;;  %1190 = vmatpush.bf16.msra.mxu1 %v5707_v19 }
  0xc7   : > { %v358_v9 = vpop.f32.mrf.mxu2  ;;  %1309 = vmatpush.bf16.msra.mxu3 %v5699_v35  ;;  %1191 = vmatpush.bf16.msra.mxu1 %v5699_v35 }
  0xc8   : > { %v8089_v10 = vadd.f32 %v358_v9, %v208_v4  ;;  %v387_v11 = vpop.f32.mrf.mxu3  ;;  %v211_v13 = vpop.f32.mrf.mxu0  ;;  %v7136_v9 = vld [vmem:[%s10947_s1 + $0x194] sm:$0xf0] }
  0xc9   : > { %v8094_v8 = vadd.f32 %v387_v11, %v237_v6  ;;  %v240_v12 = vpop.f32.mrf.mxu1  ;;  %v5678_v6 = vld [vmem:[%s10947_s1 + $0x190] sm:$0xf]  ;;  %v7135_v11 = vld [vmem:[%s10947_s1 + $0x194] sm:$0xf] }
  0xcb   : > { %5515 = vmatmul.msk.bf16.gmra.mxu0 %vm174_vm0, %v7954_v61 }
  0xcc   : > { %5519 = vmatmul.msk.bf16.gmra.mxu1 %vm174_vm0, %v7954_v61  ;;  %5549 = vmatmul.msk.bf16.gmra.mxu2 %vm174_vm0, %v8092_v3  ;;  %v5694_v61 = vld [vmem:[%s10947_s1 + $0x1b0] sm:$0xf] }
  0xcd   : > { %5553 = vmatmul.msk.bf16.gmra.mxu3 %vm174_vm0, %v8092_v3  ;;  %v5695_v33 = vor.u32 %v7140_v31, %v5694_v61  ;;  %v5672_v61 = vld [vmem:[%s10947_s1 + $0x188] sm:$0xf0] }
  0xcf   : > { %v361_v21 = vpop.f32.mrf.mxu2  ;;  %1280 = vmatpush.bf16.msra.mxu2 %v5695_v33  ;;  %1162 = vmatpush.bf16.msra.mxu0 %v5695_v33 }
  0xd0   : > { %v8116_v22 = vadd.f32 %v361_v21, %v211_v13  ;;  %v390_v24 = vpop.f32.mrf.mxu3  ;;  %v213_v25 = vpop.f32.mrf.mxu0  ;;  %v5679_v13 = vor.u32 %v7136_v9, %v5678_v6 }
  0xd1   : > { %v8118_v27 = vadd.f32 %v390_v24, %v240_v12  ;;  %v242_v28 = vpop.f32.mrf.mxu1  ;;  %v5680_v12 = vld [vmem:[%s10947_s1 + $0x198] sm:$0xf0]  ;;  %v7134_v24 = vld [vmem:[%s10947_s1 + $0x184] sm:$0xf0] }
  0xd2   : > { %v5683_v14 = vor.u32 %v7135_v11, %v5680_v12 }
  0xd3   : > { %1281 = vmatpush.bf16.msra.mxu2 %v5687_v48  ;;  %1163 = vmatpush.bf16.msra.mxu0 %v5687_v48 }
  0xd7   : > { %v363_v36 = vpop.f32.mrf.mxu2  ;;  %1282 = vmatpush.bf16.msra.mxu2 %v5679_v13  ;;  %1164 = vmatpush.bf16.msra.mxu0 %v5679_v13 }
  0xd8   : > { %v8132_v37 = vadd.f32 %v363_v36, %v213_v25  ;;  %v392_v38 = vpop.f32.mrf.mxu3  ;;  %v448_v40 = vpop.f32.mrf.mxu0  ;;  %v7133_v25 = vld [vmem:[%s10947_s1 + $0x184] sm:$0xf]  ;;  %v8209_v36 = vld [vmem:[%s7780_s27 + $0x90] sm:$0xff] }
  0xd9   : > { %v8137_v43 = vadd.f32 %v392_v38, %v242_v28  ;;  %v477_v44 = vpop.f32.mrf.mxu1  ;;  %v5675_v31 = vor.u32 %v7133_v25, %v5672_v61 }
  0xdb   : > { %5614 = vmatmul.msk.bf16.vlgmr.msrb.gmra.mxu0 %vm174_vm0, %v7989_v7 }
  0xdc   : > { %5618 = vmatmul.msk.bf16.vlgmr.msrb.gmra.mxu1 %vm174_vm0, %v7989_v7  ;;  %5648 = vmatmul.msk.bf16.vlgmr.msrb.gmra.mxu2 %vm174_vm0, %v8135_v41  ;;  %v5688_v7 = vld [vmem:[%s10947_s1 + $0x1a8] sm:$0xf0] }
  0xdd   : > { %5652 = vmatmul.msk.bf16.vlgmr.msrb.gmra.mxu3 %vm174_vm0, %v8135_v41  ;;  %v5691_v50 = vor.u32 %v7137_v47, %v5688_v7 }
  0xdf   : > { %v506_v49 = vpop.f32.mrf.mxu2  ;;  %1310 = vmatpush.bf16.msra.mxu3 %v5691_v50  ;;  %1192 = vmatpush.bf16.msra.mxu1 %v5691_v50 }
  0xe0   : > { %v8159_v52 = vadd.f32 %v506_v49, %v448_v40  ;;  %v535_v53 = vpop.f32.mrf.mxu3  ;;  %v450_v57 = vpop.f32.mrf.mxu0 }
  0xe1   : > { %v8161_v58 = vadd.f32 %v535_v53, %v477_v44  ;;  %v479_v59 = vpop.f32.mrf.mxu1 }
  0xe3   : > { %1311 = vmatpush.bf16.msra.mxu3 %v5683_v14  ;;  %1193 = vmatpush.bf16.msra.mxu1 %v5683_v14 }
  0xe7   : > { %v508_v60 = vpop.f32.mrf.mxu2  ;;  %1312 = vmatpush.bf16.msra.mxu3 %v5675_v31  ;;  %1194 = vmatpush.bf16.msra.mxu1 %v5675_v31 }
  0xe8   : > { %v8163_v62 = vadd.f32 %v508_v60, %v450_v57  ;;  %v537_v54 = vpop.f32.mrf.mxu3  ;;  %v453_v63 = vpop.f32.mrf.mxu0 }
  0xe9   : > { %v8168_v2 = vadd.f32 %v537_v54, %v479_v59  ;;  %v482_v4 = vpop.f32.mrf.mxu1 }
  0xeb   : > { %5615 = vmatmul.msk.bf16.gmra.mxu0 %vm174_vm0, %v8018_v29 }
  0xec   : > { %5619 = vmatmul.msk.bf16.gmra.mxu1 %vm174_vm0, %v8018_v29  ;;  %5649 = vmatmul.msk.bf16.gmra.mxu2 %vm174_vm0, %v8166_v0  ;;  %v5670_v29 = vld [vmem:[%s10947_s1 + $0x180] sm:$0xf] }
  0xed   : > { %5653 = vmatmul.msk.bf16.gmra.mxu3 %vm174_vm0, %v8166_v0  ;;  %v5671_v28 = vor.u32 %v7134_v24, %v5670_v29 }
  0xef   : > { %v511_v15 = vpop.f32.mrf.mxu2  ;;  %1283 = vmatpush.bf16.msra.mxu2 %v5671_v28  ;;  %1165 = vmatpush.bf16.msra.mxu0 %v5671_v28 }
  0xf0   : > { %v8190_v16 = vadd.f32 %v511_v15, %v453_v63  ;;  %v540_v17 = vpop.f32.mrf.mxu3  ;;  %v455_v18 = vpop.f32.mrf.mxu0 }
  0xf1   : > { %v8192_v19 = vadd.f32 %v540_v17, %v482_v4  ;;  %v484_v21 = vpop.f32.mrf.mxu1 }
  0xf7   : > { %v513_v32 = vpop.f32.mrf.mxu2 }
  0xf8   : > { %v8206_v33 = vadd.f32 %v513_v32, %v455_v18  ;;  %v542_v34 = vpop.f32.mrf.mxu3  ;;  %v458_v35 = vpop.f32.mrf.mxu0 }
  0xf9   : > { %v8211_v38 = vadd.f32 %v542_v34, %v484_v21  ;;  %v487_v40 = vpop.f32.mrf.mxu1 }
  0xfb   : > { %5616 = vmatmul.msk.bf16.gmra.mxu0 %vm174_vm0, %v8061_v55 }
  0xfc   : > { %5620 = vmatmul.msk.bf16.gmra.mxu1 %vm174_vm0, %v8061_v55  ;;  %5650 = vmatmul.msk.bf16.gmra.mxu2 %vm174_vm0, %v8209_v36  ;;  %v8228_v55 = vld [vmem:[%s7780_s27 + $0x98] sm:$0xff] }
  0xfd   : > { %5654 = vmatmul.msk.bf16.gmra.mxu3 %vm174_vm0, %v8209_v36 }
  0xff   : > { %v516_v44 = vpop.f32.mrf.mxu2 }
 0x100   : > { %v8221_v45 = vadd.f32 %v516_v44, %v458_v35  ;;  %v545_v46 = vpop.f32.mrf.mxu3  ;;  %v460_v47 = vpop.f32.mrf.mxu0 }
 0x101   : > { %v8223_v48 = vadd.f32 %v545_v46, %v487_v40  ;;  %v489_v7 = vpop.f32.mrf.mxu1 }
 0x107   : > { %v518_v49 = vpop.f32.mrf.mxu2 }
 0x108   : > { %v8225_v50 = vadd.f32 %v518_v49, %v460_v47  ;;  %v547_v53 = vpop.f32.mrf.mxu3  ;;  %v463_v57 = vpop.f32.mrf.mxu0 }
 0x109   : > { %v8230_v59 = vadd.f32 %v547_v53, %v489_v7  ;;  %v492_v60 = vpop.f32.mrf.mxu1 }
 0x10b   : > { %5617 = vmatmul.msk.bf16.gmra.mxu0 %vm174_vm0, %v8092_v3 }
 0x10c   : > { %5621 = vmatmul.msk.bf16.gmra.mxu1 %vm174_vm0, %v8092_v3  ;;  %5651 = vmatmul.msk.bf16.gmra.mxu2 %vm174_vm0, %v8228_v55  ;;  %v7146_v3 = vld [vmem:[%s7780_s27 + $0xa0] sm:$0xff] }
 0x10d   : > { %5655 = vmatmul.msk.bf16.gmra.mxu3 %vm174_vm0, %v8228_v55 }
 0x10f   : > { %v521_v54 = vpop.f32.mrf.mxu2 }
 0x110   : > { %v8240_v63 = vadd.f32 %v521_v54, %v463_v57  ;;  %v550_v4 = vpop.f32.mrf.mxu3  ;;  %v465_v6 = vpop.f32.mrf.mxu0 }
 0x111   : > { %v8242_v9 = vadd.f32 %v550_v4, %v492_v60  ;;  %v494_v11 = vpop.f32.mrf.mxu1 }
 0x117   : > { %v523_v13 = vpop.f32.mrf.mxu2 }
 0x118   : > { %v8244_v12 = vadd.f32 %v523_v13, %v465_v6  ;;  %v552_v14 = vpop.f32.mrf.mxu3  ;;  %v637_v15 = vpop.f32.mrf.mxu0 }
 0x119   : > { %v8247_v17 = vadd.f32 %v552_v14, %v494_v11  ;;  %v8250_v18 = vadd.f32 %v637_v15, %v8011_v20  ;;  %v666_v21 = vpop.f32.mrf.mxu1 }
 0x11a   : > { %v8253_v29 = vadd.f32 %v666_v21, %v8013_v23 }
 0x11b   : > { %5716 = vmatmul.msk.bf16.vlgmr.msra.gmra.mxu0 %vm174_vm0, %v8135_v41 }
 0x11c   : > { %5720 = vmatmul.msk.bf16.vlgmr.msra.gmra.mxu1 %vm174_vm0, %v8135_v41  ;;  %5750 = vmatmul.msk.bf16.vlgmr.msra.gmra.mxu2 %vm174_vm0, %v7146_v3 }
 0x11d   : > { %5754 = vmatmul.msk.bf16.vlgmr.msra.gmra.mxu3 %vm174_vm0, %v7146_v3 }
 0x11f   : > { %v755_v24 = vpop.f32.mrf.mxu2 }
 0x120   : > { %v8262_v25 = vadd.f32 %v755_v24, %v8159_v52  ;;  %v784_v20 = vpop.f32.mrf.mxu3  ;;  %v639_v28 = vpop.f32.mrf.mxu0  ;;  %v7147_v52 = vld [vmem:[%s7780_s27 + $0xa8] sm:$0xff] }
 0x121   : > { %v8265_v23 = vadd.f32 %v784_v20, %v8161_v58  ;;  %v8268_v61 = vadd.f32 %v639_v28, %v8015_v26  ;;  %v668_v31 = vpop.f32.mrf.mxu1 }
 0x122   : > { %v8271_v32 = vadd.f32 %v668_v31, %v8020_v30 }
 0x127   : > { %v757_v41 = vpop.f32.mrf.mxu2 }
 0x128   : > { %v8274_v34 = vadd.f32 %v757_v41, %v8163_v62  ;;  %v786_v35 = vpop.f32.mrf.mxu3  ;;  %v642_v40 = vpop.f32.mrf.mxu0 }
 0x129   : > { %v8278_v44 = vadd.f32 %v786_v35, %v8168_v2  ;;  %v8281_v58 = vadd.f32 %v642_v40, %v8042_v39  ;;  %v671_v46 = vpop.f32.mrf.mxu1 }
 0x12a   : > { %v8284_v26 = vadd.f32 %v671_v46, %v8044_v42 }
 0x12b   : > { %5717 = vmatmul.msk.bf16.gmra.mxu0 %vm174_vm0, %v8166_v0 }
 0x12c   : > { %5721 = vmatmul.msk.bf16.gmra.mxu1 %vm174_vm0, %v8166_v0  ;;  %5751 = vmatmul.msk.bf16.gmra.mxu2 %vm174_vm0, %v7147_v52 }
 0x12d   : > { %5755 = vmatmul.msk.bf16.gmra.mxu3 %vm174_vm0, %v7147_v52 }
 0x12f   : > { %v760_v30 = vpop.f32.mrf.mxu2 }
 0x130   : > { %v8293_v62 = vadd.f32 %v760_v30, %v8190_v16  ;;  %v789_v39 = vpop.f32.mrf.mxu3  ;;  %v644_v2 = vpop.f32.mrf.mxu0  ;;  %v7148_v16 = vld [vmem:[%s7780_s27 + $0xb0] sm:$0xff] }
 0x131   : > { %v8296_v42 = vadd.f32 %v789_v39, %v8192_v19  ;;  %v8299_v47 = vadd.f32 %v644_v2, %v8058_v51  ;;  %v673_v7 = vpop.f32.mrf.mxu1 }
 0x132   : > { %v8302_v49 = vadd.f32 %v673_v7, %v8063_v56 }
 0x137   : > { %v762_v0 = vpop.f32.mrf.mxu2 }
 0x138   : > { %v8305_v53 = vadd.f32 %v762_v0, %v8206_v33  ;;  %v791_v57 = vpop.f32.mrf.mxu3  ;;  %v647_v60 = vpop.f32.mrf.mxu0 }
 0x139   : > { %v8309_v54 = vadd.f32 %v791_v57, %v8211_v38  ;;  %v8312_v19 = vadd.f32 %v647_v60, %v8085_v1  ;;  %v676_v4 = vpop.f32.mrf.mxu1 }
 0x13a   : > { %v8315_v51 = vadd.f32 %v676_v4, %v8087_v5 }
 0x13b   : > { %5718 = vmatmul.msk.bf16.gmra.mxu0 %vm174_vm0, %v8209_v36 }
 0x13c   : > { %5722 = vmatmul.msk.bf16.gmra.mxu1 %vm174_vm0, %v8209_v36  ;;  %5752 = vmatmul.msk.bf16.gmra.mxu2 %vm174_vm0, %v7148_v16 }
 0x13d   : > { %5756 = vmatmul.msk.bf16.gmra.mxu3 %vm174_vm0, %v7148_v16 }
 0x13f   : > { %v765_v56 = vpop.f32.mrf.mxu2 }
 0x140   : > { %v8324_v33 = vadd.f32 %v765_v56, %v8221_v45  ;;  %v794_v1 = vpop.f32.mrf.mxu3  ;;  %v649_v38 = vpop.f32.mrf.mxu0  ;;  %v7149_v45 = vld [vmem:[%s7780_s27 + $0xb8] sm:$0xff] }
 0x141   : > { %v8327_v5 = vadd.f32 %v794_v1, %v8223_v48  ;;  %v8330_v6 = vadd.f32 %v649_v38, %v8089_v10  ;;  %v678_v11 = vpop.f32.mrf.mxu1 }
 0x142   : > { %v8333_v13 = vadd.f32 %v678_v11, %v8094_v8 }
 0x147   : > { %v767_v36 = vpop.f32.mrf.mxu2 }
 0x148   : > { %v8336_v14 = vadd.f32 %v767_v36, %v8225_v50  ;;  %v796_v15 = vpop.f32.mrf.mxu3  ;;  %v652_v3 = vpop.f32.mrf.mxu0 }
 0x149   : > { %v8340_v21 = vadd.f32 %v796_v15, %v8230_v59  ;;  %v8343_v48 = vadd.f32 %v652_v3, %v8116_v22  ;;  %v681_v24 = vpop.f32.mrf.mxu1 }
 0x14a   : > { %v8346_v10 = vadd.f32 %v681_v24, %v8118_v27 }
 0x14b   : > { %10958 = vst [vmem:[#allocation4_spill] sm:$0xff] %v8340_v21  ;;  %5719 = vmatmul.msk.bf16.gmra.mxu0 %vm174_vm0, %v8228_v55 }
 0x14c   : > { %10959 = vst [vmem:[#allocation5_spill] sm:$0xff] %v8343_v48  ;;  %5723 = vmatmul.msk.bf16.gmra.mxu1 %vm174_vm0, %v8228_v55  ;;  %5753 = vmatmul.msk.bf16.gmra.mxu2 %vm174_vm0, %v7149_v45 }
 0x14d   : > { %10960 = vst [vmem:[#allocation6_spill] sm:$0xff] %v8346_v10  ;;  %5757 = vmatmul.msk.bf16.gmra.mxu3 %vm174_vm0, %v7149_v45 }
 0x14f   : > { %v770_v8 = vpop.f32.mrf.mxu2 }
 0x150   : > { %v8355_v50 = vadd.f32 %v770_v8, %v8240_v63  ;;  %v799_v22 = vpop.f32.mrf.mxu3  ;;  %v654_v59 = vpop.f32.mrf.mxu0 }
 0x151   : > { %v8358_v20 = vadd.f32 %v799_v22, %v8242_v9  ;;  %v8361_v27 = vadd.f32 %v654_v59, %v8132_v37  ;;  %v683_v28 = vpop.f32.mrf.mxu1 }
 0x152   : > { %10961 = vst [vmem:[#allocation7_spill] sm:$0xff] %v8355_v50  ;;  %v8364_v31 = vadd.f32 %v683_v28, %v8137_v43 }
 0x153   : > { %10962 = vst [vmem:[#allocation8_spill] sm:$0xff] %v8358_v20 }
 0x154   : > { %10963 = vst [vmem:[#allocation9_spill] sm:$0xff] %v8361_v27 }
 0x155   : > { %10964 = vst [vmem:[#allocation10_spill] sm:$0xff] %v8364_v31 }
 0x157   : > { %v772_v55 = vpop.f32.mrf.mxu2 }
 0x158   : > { %v8367_v41 = vadd.f32 %v772_v55, %v8244_v12  ;;  %v801_v35 = vpop.f32.mrf.mxu3  ;;  %v902_v40 = vpop.f32.mrf.mxu0 }
 0x159   : > { %v8370_v63 = vadd.f32 %v801_v35, %v8247_v17  ;;  %v931_v52 = vpop.f32.mrf.mxu1  ;;  %v951_v27 = vadd.f32 %v902_v40, %v8250_v18 }
 0x15a   : > { %10965 = vst [vmem:[#allocation11_spill] sm:$0xff] %v8367_v41  ;;  %v1366_v41 = vld [vmem:[%s10948_s2] sm:$0x3] }
 0x15b   : > { %10966 = vst [vmem:[#allocation12_spill] sm:$0xff] %v8370_v63 }
 0x15f   : > { %v1020_v46 = vpop.f32.mrf.mxu2 }
 0x160   : > { %v1049_v9 = vpop.f32.mrf.mxu3  ;;  %v904_v30 = vpop.f32.mrf.mxu0  ;;  %v1069_v20 = vadd.f32 %v1020_v46, %v8262_v25 }
 0x161   : > { %v933_v39 = vpop.f32.mrf.mxu1 }
 0x167   : > { %v1022_v37 = vpop.f32.mrf.mxu2 }
 0x168   : > { %v1051_v2 = vpop.f32.mrf.mxu3  ;;  %v8372_v7 = vpop.f32.mrf.mxu0 }
 0x169   : > { %v8374_v43 = vpop.f32.mrf.mxu1  ;;  %v1072_v40 = vadd.f32 %v1051_v2, %v8278_v44 }
 0x16a   : > { %v956_v2 = vadd.f32 %v8374_v43, %v8284_v26 }
 0x16f   : > { %v8376_v0 = vpop.f32.mrf.mxu2 }
 0x170   : > { %v8378_v12 = vpop.f32.mrf.mxu3  ;;  %v8380_v57 = vpop.f32.mrf.mxu0 }
 0x171   : > { %v8382_v60 = vpop.f32.mrf.mxu1 }
 0x177   : > { %v8384_v17 = vpop.f32.mrf.mxu2 }
 0x178   : > { %v8386_v16 = vpop.f32.mrf.mxu3  ;;  %v8388_v4 = vpop.f32.mrf.mxu0 }
 0x179   : > { %v8390_v56 = vpop.f32.mrf.mxu1 }
 0x17f   : > { %v8392_v1 = vpop.f32.mrf.mxu2 }
 0x180   : > { %v8394_v38 = vpop.f32.mrf.mxu3  ;;  %v8396_v11 = vpop.f32.mrf.mxu0 }
 0x181   : > { %v8398_v36 = vpop.f32.mrf.mxu1 }
 0x187   : > { %v8400_v15 = vpop.f32.mrf.mxu2 }
 0x188   : > { %v8402_v3 = vpop.f32.mrf.mxu3  ;;  %v8404_v45 = vpop.f32.mrf.mxu0 }
 0x189   : > { %10967 = vst [vmem:[#allocation13_spill] sm:$0xff] %v8402_v3  ;;  %v8406_v24 = vpop.f32.mrf.mxu1  ;;  %v8429_v3 = vperm.slane %v1366_v41, 1 }
 0x18a   : > { %10968 = vst [vmem:[#allocation14_spill] sm:$0xff] %v8404_v45 }
 0x18b   : > { %10969 = vst [vmem:[#allocation15_spill] sm:$0xff] %v8406_v24 }
 0x18f   : > { %v8408_v8 = vpop.f32.mrf.mxu2 }
 0x190   : > { %10970 = vst [vmem:[#allocation16_spill] sm:$0xff] %v8408_v8  ;;  %v8410_v22 = vpop.f32.mrf.mxu3  ;;  %v8412_v59 = vpop.f32.mrf.mxu0 }
 0x191   : > { %10971 = vst [vmem:[#allocation17_spill] sm:$0xff] %v8410_v22  ;;  %v8414_v28 = vpop.f32.mrf.mxu1  ;;  %v952_v22 = vadd.f32 %v931_v52, %v8253_v29 }
 0x192   : > { %10972 = vst [vmem:[#allocation18_spill] sm:$0xff] %v8412_v59  ;;  %v1070_v59 = vadd.f32 %v1049_v9, %v8265_v23  ;;  %v953_v23 = vadd.f32 %v904_v30, %v8268_v61 }
 0x193   : > { %10973 = vst [vmem:[#allocation19_spill] sm:$0xff] %v8414_v28 }
 0x197   : > { %v8416_v55 = vpop.f32.mrf.mxu2 }
 0x198   : > { %10974 = vst [vmem:[#allocation20_spill] sm:$0xff] %v8416_v55  ;;  %v8418_v35 = vpop.f32.mrf.mxu3  ;;  %v1167_v63 = vpop.f32.mrf.mxu0 }
 0x199   : > { %10975 = vst [vmem:[#allocation21_spill] sm:$0xff] %v8418_v35  ;;  %v1196_v31 = vpop.f32.mrf.mxu1  ;;  %v1216_v28 = vadd.f32 %v1167_v63, %v951_v27  ;;  %v8427_v35 = vperm.slane %v1366_v41, 0 }
 0x19a   : > { %v1217_v50 = vadd.f32 %v1196_v31, %v952_v22  ;;  %v954_v31 = vadd.f32 %v933_v39, %v8271_v32  ;;  %v1073_v39 = vadd.f32 %v8376_v0, %v8293_v62 }
 0x19f   : > { %v1285_v24 = vpop.f32.mrf.mxu2 }
 0x1a0   : > { %v1334_v10 = vadd.f32 %v1285_v24, %v1069_v20  ;;  %v1314_v55 = vpop.f32.mrf.mxu3  ;;  %v1169_v8 = vpop.f32.mrf.mxu0  ;;  %v1071_v20 = vadd.f32 %v1022_v37, %v8274_v34  ;;  %v1074_v24 = vadd.f32 %v8378_v12, %v8296_v42  ;;  %v957_v12 = vadd.f32 %v8380_v57, %v8299_v47 }
 0x1a1   : > { %v1335_v45 = vadd.f32 %v1314_v55, %v1070_v59  ;;  %v1198_v48 = vpop.f32.mrf.mxu1 }
 0x1a2   : > { %v1350_v21 = vmax.f32 %v1216_v28, %v1334_v10  ;;  %v1219_v46 = vadd.f32 %v1198_v48, %v954_v31  ;;  %v955_v48 = vadd.f32 %v8372_v7, %v8281_v58 }
 0x1a3   : > { %v1351_v18 = vmax.f32 %v1217_v50, %v1335_v45  ;;  %v1218_v50 = vadd.f32 %v1169_v8, %v953_v23 }
 0x1a4   : > { %v8432_v25 = vadd.f32 %v8427_v35, %v1350_v21 }
 0x1a5   : > { %v8435_v29 = vadd.f32 %v8429_v3, %v1351_v18 }
 0x1a6   : > { %v1388_v27 = vmax.f32 %v8432_v25, 0.0 }
 0x1a7   : > { %v1287_v41 = vpop.f32.mrf.mxu2  ;;  %v1389_v10 = vmax.f32 %v8435_v29, 0.0 }
 0x1a8   : > { %v1336_v63 = vadd.f32 %v1287_v41, %v1071_v20  ;;  %v1316_v21 = vpop.f32.mrf.mxu3  ;;  %v1172_v52 = vpop.f32.mrf.mxu0  ;;  %v1075_v20 = vadd.f32 %v8384_v17, %v8305_v53  ;;  %v1076_v41 = vadd.f32 %v8386_v16, %v8309_v54  ;;  %v959_v16 = vadd.f32 %v8388_v4, %v8312_v19 }
 0x1a9   : > { %v1337_v9 = vadd.f32 %v1316_v21, %v1072_v40  ;;  %v1201_v45 = vpop.f32.mrf.mxu1  ;;  %v7422_v61 = vpack.i.bf16 %v1389_v10, %v1388_v27  ;;  %v1220_v59 = vadd.f32 %v1172_v52, %v955_v48  ;;  %v958_v40 = vadd.f32 %v8382_v60, %v8302_v49 }
 0x1aa   : > { %v1352_v34 = vmax.f32 %v1218_v50, %v1336_v63  ;;  %v1221_v23 = vadd.f32 %v1201_v45, %v956_v2  ;;  %v1078_v48 = vadd.f32 %v8394_v38, %v8327_v5  ;;  %v961_v38 = vadd.f32 %v8396_v11, %v8330_v6 }
 0x1ab   : > { %v1353_v30 = vmax.f32 %v1219_v46, %v1337_v9  ;;  %7423 = vrot.lane.b32.xlu0 %v7422_v61, %s7521_s29  ;;  %v1077_v61 = vadd.f32 %v8392_v1, %v8324_v33 }
 0x1ac   : > { %v8449_v32 = vadd.f32 %v8427_v35, %v1352_v34 }
 0x1ad   : > { %v8452_v44 = vadd.f32 %v8429_v3, %v1353_v30  ;;  %v960_v30 = vadd.f32 %v8390_v56, %v8315_v51 }
 0x1ae   : > { %v1390_v37 = vmax.f32 %v8449_v32, 0.0 }
 0x1af   : > { %v1391_v8 = vmax.f32 %v8452_v44, 0.0  ;;  %v1290_v22 = vpop.f32.mrf.mxu2 }
 0x1b0   : > { %v1338_v28 = vadd.f32 %v1290_v22, %v1073_v39  ;;  %v1319_v55 = vpop.f32.mrf.mxu3  ;;  %v1174_v18 = vpop.f32.mrf.mxu0 }
 0x1b1   : > { %v1339_v58 = vadd.f32 %v1319_v55, %v1074_v24  ;;  %v1203_v7 = vpop.f32.mrf.mxu1  ;;  %v7427_v62 = vpack.i.bf16 %v1391_v8, %v1390_v37  ;;  %v1222_v21 = vadd.f32 %v1174_v18, %v957_v12  ;;  %v1079_v18 = vadd.f32 %v8400_v15, %v8336_v14 }
 0x1b2   : > { %v1354_v0 = vmax.f32 %v1220_v59, %v1338_v28  ;;  %v1223_v45 = vadd.f32 %v1203_v7, %v958_v40  ;;  %v10976_v7 = vld [vmem:[#allocation4_spill] sm:$0xff] }
 0x1b3   : > { %v1355_v26 = vmax.f32 %v1221_v23, %v1339_v58  ;;  %7428 = vrot.lane.b32.xlu0 %v7427_v62, %s7521_s29  ;;  %v962_v58 = vadd.f32 %v8398_v36, %v8333_v13  ;;  %v10977_v62 = vld [vmem:[#allocation13_spill] sm:$0xff] }
 0x1b4   : > { %v8470_v42 = vadd.f32 %v8427_v35, %v1354_v0  ;;  %v1080_v0 = vadd.f32 %v10977_v62, %v10976_v7  ;;  %v10986_v7 = vld [vmem:[#allocation9_spill] sm:$0xff]  ;;  %v10987_v62 = vld [vmem:[#allocation18_spill] sm:$0xff] }
 0x1b5   : > { %v8473_v43 = vadd.f32 %v8429_v3, %v1355_v26 }
 0x1b6   : > { %v1392_v31 = vmax.f32 %v8470_v42, 0.0 }
 0x1b7   : > { %v1292_v50 = vpop.f32.mrf.mxu2  ;;  %v1393_v63 = vmax.f32 %v8473_v43, 0.0 }
 0x1b8   : > { %v1340_v52 = vadd.f32 %v1292_v50, %v1075_v20  ;;  %v1321_v46 = vpop.f32.mrf.mxu3  ;;  %v1177_v9 = vpop.f32.mrf.mxu0 }
 0x1b9   : > { %v1341_v47 = vadd.f32 %v1321_v46, %v1076_v41  ;;  %v1206_v57 = vpop.f32.mrf.mxu1  ;;  %v7432_v53 = vpack.i.bf16 %v1393_v63, %v1392_v31  ;;  %v1224_v24 = vadd.f32 %v1177_v9, %v959_v16  ;;  %v10978_v46 = vld [vmem:[#allocation5_spill] sm:$0xff]  ;;  %v10979_v9 = vld [vmem:[#allocation14_spill] sm:$0xff]  ;;  %v10983_v16 = vld [vmem:[#allocation15_spill] sm:$0xff] }
 0x1ba   : > { %v1356_v17 = vmax.f32 %v1222_v21, %v1340_v52  ;;  %v1225_v28 = vadd.f32 %v1206_v57, %v960_v30  ;;  %v10981_v57 = vld [vmem:[#allocation16_spill] sm:$0xff] }
 0x1bb   : > { %v1357_v49 = vmax.f32 %v1223_v45, %v1341_v47  ;;  %7433 = vrot.lane.b32.xlu1 %v7432_v53, %s7521_s29  ;;  %v963_v45 = vadd.f32 %v10979_v9, %v10978_v46  ;;  %v10980_v47 = vld [vmem:[#allocation7_spill] sm:$0xff]  ;;  %v10984_v30 = vld [vmem:[#allocation8_spill] sm:$0xff] }
 0x1bc   : > { %v8491_v54 = vadd.f32 %v8427_v35, %v1356_v17  ;;  %v1081_v53 = vadd.f32 %v10981_v57, %v10980_v47 }
 0x1bd   : > { %v8494_v60 = vadd.f32 %v8429_v3, %v1357_v49  ;;  %v10982_v49 = vld [vmem:[#allocation6_spill] sm:$0xff] }
 0x1be   : > { %v1394_v34 = vmax.f32 %v8491_v54, 0.0 }
 0x1bf   : > { %v1395_v39 = vmax.f32 %v8494_v60, 0.0  ;;  %v1295_v2 = vpop.f32.mrf.mxu2 }
 0x1c0   : > { %v1342_v22 = vadd.f32 %v1295_v2, %v1077_v61  ;;  %v1324_v59 = vpop.f32.mrf.mxu3  ;;  %v1179_v19 = vpop.f32.mrf.mxu0  ;;  %v964_v61 = vadd.f32 %v10983_v16, %v10982_v49 }
 0x1c1   : > { %v1343_v55 = vadd.f32 %v1324_v59, %v1078_v48  ;;  %v7437_v33 = vpack.i.bf16 %v1395_v39, %v1394_v34  ;;  %v1208_v1 = vpop.f32.mrf.mxu1  ;;  %v1226_v20 = vadd.f32 %v1179_v19, %v961_v38  ;;  %v10985_v48 = vld [vmem:[#allocation17_spill] sm:$0xff] }
 0x1c2   : > { %v1358_v4 = vmax.f32 %v1224_v24, %v1342_v22  ;;  %v1227_v50 = vadd.f32 %v1208_v1, %v962_v58  ;;  %v1082_v2 = vadd.f32 %v10985_v48, %v10984_v30 }
 0x1c3   : > { %v1359_v51 = vmax.f32 %v1225_v28, %v1343_v55  ;;  %7438 = vrot.lane.b32.xlu1 %v7437_v33, %s7521_s29 }
 0x1c4   : > { %v8512_v5 = vadd.f32 %v8427_v35, %v1358_v4 }
 0x1c5   : > { %v8515_v56 = vadd.f32 %v8429_v3, %v1359_v51 }
 0x1c6   : > { %v1396_v23 = vmax.f32 %v8512_v5, 0.0 }
 0x1c7   : > { %v1297_v26 = vpop.f32.mrf.mxu2  ;;  %v1397_v12 = vmax.f32 %v8515_v56, 0.0 }
 0x1c8   : > { %v1344_v40 = vadd.f32 %v1297_v26, %v1079_v18  ;;  %v1326_v41 = vpop.f32.mrf.mxu3  ;;  %v1182_v15 = vpop.f32.mrf.mxu0  ;;  %v10988_v26 = vld [vmem:[#allocation11_spill] sm:$0xff] }
 0x1c9   : > { %v1345_v21 = vadd.f32 %v1326_v41, %v1080_v0  ;;  %v7442_v6 = vpack.i.bf16 %v1397_v12, %v1396_v23  ;;  %v1211_v36 = vpop.f32.mrf.mxu1  ;;  %v1228_v59 = vadd.f32 %v1182_v15, %v963_v45  ;;  %v965_v0 = vadd.f32 %v10987_v62, %v10986_v7  ;;  %v10993_v15 = vld [vmem:[#allocation21_spill] sm:$0xff] }
 0x1ca   : > { %v1360_v14 = vmax.f32 %v1226_v20, %v1344_v40  ;;  %v1229_v19 = vadd.f32 %v1211_v36, %v964_v61  ;;  %v10989_v20 = vld [vmem:[#allocation20_spill] sm:$0xff] }
 0x1cb   : > { %v1361_v11 = vmax.f32 %v1227_v50, %v1345_v21  ;;  %7443 = vrot.lane.b32.xlu2 %v7442_v6, %s7521_s29  ;;  %v1083_v40 = vadd.f32 %v10989_v20, %v10988_v26  ;;  %v10990_v21 = vld [vmem:[#allocation10_spill] sm:$0xff]  ;;  %v10991_v6 = vld [vmem:[#allocation19_spill] sm:$0xff] }
 0x1cc   : > { %v8533_v13 = vadd.f32 %v8427_v35, %v1360_v14  ;;  %v966_v14 = vadd.f32 %v10991_v6, %v10990_v21 }
 0x1cd   : > { %v8536_v52 = vadd.f32 %v8429_v3, %v1361_v11  ;;  %v10992_v11 = vld [vmem:[#allocation12_spill] sm:$0xff] }
 0x1ce   : > { %v1398_v17 = vmax.f32 %v8533_v13, 0.0  ;;  %v1084_v36 = vadd.f32 %v10993_v15, %v10992_v11 }
 0x1cf   : > { %v1399_v24 = vmax.f32 %v8536_v52, 0.0  ;;  %v1300_v22 = vpop.f32.mrf.mxu2 }
 0x1d0   : > { %v1346_v28 = vadd.f32 %v1300_v22, %v1081_v53  ;;  %v1329_v55 = vpop.f32.mrf.mxu3  ;;  %v1184_v58 = vpop.f32.mrf.mxu0 }
 0x1d1   : > { %v1347_v33 = vadd.f32 %v1329_v55, %v1082_v2  ;;  %v7447_v4 = vpack.i.bf16 %v1399_v24, %v1398_v17  ;;  %v1213_v50 = vpop.f32.mrf.mxu1  ;;  %v1230_v45 = vadd.f32 %v1184_v58, %v965_v0 }
 0x1d2   : > { %v1362_v1 = vmax.f32 %v1228_v59, %v1346_v28  ;;  %v1231_v53 = vadd.f32 %v1213_v50, %v966_v14 }
 0x1d3   : > { %v1363_v51 = vmax.f32 %v1229_v19, %v1347_v33  ;;  %7448 = vrot.lane.b32.xlu2 %v7447_v4, %s7521_s29 }
 0x1d4   : > { %v8554_v38 = vadd.f32 %v8427_v35, %v1362_v1 }
 0x1d5   : > { %v8557_v18 = vadd.f32 %v8429_v3, %v1363_v51 }
 0x1d6   : > { %v1400_v41 = vmax.f32 %v8554_v38, 0.0 }
 0x1d7   : > { %v1401_v46 = vmax.f32 %v8557_v18, 0.0  ;;  %v1302_v9 = vpop.f32.mrf.mxu2 }
 0x1d8   : > { %v1348_v47 = vadd.f32 %v1302_v9, %v1083_v40  ;;  %v1331_v57 = vpop.f32.mrf.mxu3 }
 0x1d9   : > { %v1349_v49 = vadd.f32 %v1331_v57, %v1084_v36  ;;  %v7452_v16 = vpack.i.bf16 %v1401_v46, %v1400_v41 }
 0x1da   : > { %v1364_v61 = vmax.f32 %v1230_v45, %v1348_v47 }
 0x1db   : > { %v1365_v30 = vmax.f32 %v1231_v53, %v1349_v49  ;;  %7453 = vrot.lane.b32.xlu0 %v7452_v16, %s7521_s29 }
 0x1dc   : > { %v8575_v48 = vadd.f32 %v8427_v35, %v1364_v61 }
 0x1dd   : > { %v8578_v2 = vadd.f32 %v8429_v3, %v1365_v30 }
 0x1de   : > { %v1402_v22 = vmax.f32 %v8575_v48, 0.0 }
 0x1df   : > { %v1403_v59 = vmax.f32 %v8578_v2, 0.0 }
 0x1e1   : > { %v7457_v28 = vpack.i.bf16 %v1403_v59, %v1402_v22 }
 0x1e3   : > { %7458 = vrot.lane.b32.xlu1 %v7457_v28, %s7521_s29 }
 0x21d   : > { %v7424_v55 = vpop.permute.xlu0 %7423 }
 0x21e   : > { %v7426_v19 = vunpack.i.h.bf16 %v7424_v55  ;;  %v7425_v35 = vunpack.i.l.bf16 %v7424_v55 }
 0x220   : > { %v1478_v3 = vmax.f32 %v1389_v10, %v7426_v19  ;;  %v1453_v33 = vsel %vm1452_vm1, %v7425_v35, %v7426_v19 }
 0x221   : > { %v1477_v4 = vmax.f32 %v1388_v27, %v1453_v33 }
 0x223   : > { %v1493_v51 = vpack.c.bf16 %v1478_v3, %v1477_v4 }
 0x225   : > { %1507 = vst.msk [vmem:[%s8599_s30] sm:$0xff] %vm8593_vm4, %v1493_v51  ;;  %v7444_v29 = vpop.permute.xlu2 %7443  ;;  %v7429_v10 = vpop.permute.xlu0 %7428 }
 0x226   : > { %v7446_v58 = vunpack.i.h.bf16 %v7444_v29  ;;  %v7445_v25 = vunpack.i.l.bf16 %v7444_v29  ;;  %v7431_v27 = vunpack.i.h.bf16 %v7429_v10  ;;  %v7430_v7 = vunpack.i.l.bf16 %v7429_v10 }
 0x228   : > { %v1486_v62 = vmax.f32 %v1397_v12, %v7446_v58  ;;  %v1457_v0 = vsel %vm1452_vm1, %v7445_v25, %v7446_v58  ;;  %v1480_v26 = vmax.f32 %v1391_v8, %v7431_v27  ;;  %v1454_v20 = vsel %vm1452_vm1, %v7430_v7, %v7431_v27 }
 0x229   : > { %v1485_v40 = vmax.f32 %v1396_v23, %v1457_v0  ;;  %v1479_v50 = vmax.f32 %v1390_v37, %v1454_v20 }
 0x22b   : > { %v1497_v21 = vpack.c.bf16 %v1486_v62, %v1485_v40  ;;  %v1494_v6 = vpack.c.bf16 %v1480_v26, %v1479_v50 }
 0x22d   : > { %1511 = vst.msk [vmem:[%s8599_s30 + $0x20] sm:$0xff] %vm8593_vm4, %v1497_v21  ;;  %v7449_v56 = vpop.permute.xlu2 %7448  ;;  %v7434_v12 = vpop.permute.xlu1 %7433 }
 0x22e   : > { %1508 = vst.msk [vmem:[%s8599_s30 + $0x8] sm:$0xff] %vm8593_vm4, %v1494_v6  ;;  %v7451_v44 = vunpack.i.h.bf16 %v7449_v56  ;;  %v7450_v8 = vunpack.i.l.bf16 %v7449_v56  ;;  %v7436_v14 = vunpack.i.h.bf16 %v7434_v12  ;;  %v7435_v5 = vunpack.i.l.bf16 %v7434_v12 }
 0x230   : > { %v1488_v32 = vmax.f32 %v1399_v24, %v7451_v44  ;;  %v1458_v37 = vsel %vm1452_vm1, %v7450_v8, %v7451_v44  ;;  %v1482_v23 = vmax.f32 %v1393_v63, %v7436_v14  ;;  %v1455_v11 = vsel %vm1452_vm1, %v7435_v5, %v7436_v14 }
 0x231   : > { %v1487_v15 = vmax.f32 %v1398_v17, %v1458_v37  ;;  %v1481_v36 = vmax.f32 %v1392_v31, %v1455_v11 }
 0x233   : > { %v1498_v9 = vpack.c.bf16 %v1488_v32, %v1487_v15  ;;  %v1495_v45 = vpack.c.bf16 %v1482_v23, %v1481_v36 }
 0x235   : > { %1512 = vst.msk [vmem:[%s8599_s30 + $0x28] sm:$0xff] %vm8593_vm4, %v1498_v9  ;;  %v7439_v52 = vpop.permute.xlu1 %7438 }
 0x236   : > { %1509 = vst.msk [vmem:[%s8599_s30 + $0x10] sm:$0xff] %vm8593_vm4, %v1495_v45  ;;  %v7441_v43 = vunpack.i.h.bf16 %v7439_v52  ;;  %v7440_v63 = vunpack.i.l.bf16 %v7439_v52 }
 0x238   : > { %v1484_v24 = vmax.f32 %v1395_v39, %v7441_v43  ;;  %v1456_v13 = vsel %vm1452_vm1, %v7440_v63, %v7441_v43 }
 0x239   : > { %v1483_v42 = vmax.f32 %v1394_v34, %v1456_v13 }
 0x23b   : > { %v1496_v31 = vpack.c.bf16 %v1484_v24, %v1483_v42 }
 0x23d   : > { %1510 = vst.msk [vmem:[%s8599_s30 + $0x18] sm:$0xff] %vm8593_vm4, %v1496_v31 }
 0x24d   : > { %v7454_v17 = vpop.permute.xlu0 %7453 }
 0x24e   : > { %v7456_v47 = vunpack.i.h.bf16 %v7454_v17  ;;  %v7455_v57 = vunpack.i.l.bf16 %v7454_v17 }
 0x250   : > { %v1490_v53 = vmax.f32 %v1401_v46, %v7456_v47  ;;  %v1459_v49 = vsel %vm1452_vm1, %v7455_v57, %v7456_v47 }
 0x251   : > { %v1489_v60 = vmax.f32 %v1400_v41, %v1459_v49 }
 0x253   : > { %v1499_v39 = vpack.c.bf16 %v1490_v53, %v1489_v60 }
 0x255   : > { %1513 = vst.msk [vmem:[%s8599_s30 + $0x30] sm:$0xff] %vm8593_vm4, %v1499_v39  ;;  %v7459_v54 = vpop.permute.xlu1 %7458 }
 0x256   : > { %v7461_v34 = vunpack.i.h.bf16 %v7459_v54  ;;  %v7460_v16 = vunpack.i.l.bf16 %v7459_v54 }
 0x258   : > { %v1492_v61 = vmax.f32 %v1403_v59, %v7461_v34  ;;  %v1460_v30 = vsel %vm1452_vm1, %v7460_v16, %v7461_v34 }
 0x259   : > { %v1491_v18 = vmax.f32 %v1402_v22, %v1460_v30  ;;  %43 = sbr.rel (!%p41_p0) target bundleno = 1 (0x1), region = 108 }
 0x25b   : > { %v1500_v46 = vpack.c.bf16 %v1492_v61, %v1491_v18 }
 0x25d   : > { %1514 = vst.msk [vmem:[%s8599_s30 + $0x38] sm:$0xff] %vm8593_vm4, %v1500_v46 }
 0x25e LB: > { %v5884_v38 = vld [vmem:[%s10949_s3 + $0x118] sm:$0xf]  ;;  %v7205_v41 = vld [vmem:[%s10949_s3 + $0x11c] sm:$0xf0]  ;;  %v7204_v48 = vld [vmem:[%s10949_s3 + $0x11c] sm:$0xf]  ;;  %s7519_s13 = sphi %s8663_s13, %s1520_s13  }
 0x25f   : > { %v8677_v2 = vor.u32 %v7205_v41, %v5884_v38  ;;  %v5886_v22 = vld [vmem:[%s10949_s3 + $0x120] sm:$0xf0]  ;;  %v5793_v59 = vld [vmem:[%s10949_s3 + $0x148] sm:$0x11]  ;;  %vm1742_vm5 = vcmask 1040384   ;;  %s7152_s2 = sshll.u32 %s7519_s13, 7 }
 0x260   : > { %v8685_v28 = vor.u32 %v7204_v48, %v5886_v22  ;;  %v1685_v55 = vunpack.c.l.b16 %v5793_v59  ;;  %v1686_v19 = vunpack.c.h.b16 %v5793_v59  ;;  %v5876_v35 = vld [vmem:[%s10949_s3 + $0x108] sm:$0xf]  ;;  %v7203_v3 = vld [vmem:[%s10949_s3 + $0x10c] sm:$0xf0]  ;;  %v7202_v33 = vld [vmem:[%s10949_s3 + $0x10c] sm:$0xf] }
 0x261   : > { %1749 = vmatpush.bf16.msra.mxu0 %v8677_v2  ;;  %v5878_v4 = vld [vmem:[%s10949_s3 + $0x110] sm:$0xf0]  ;;  %v5900_v1 = vld [vmem:[%s10949_s3 + $0x138] sm:$0xf]  ;;  %v7209_v51 = vld [vmem:[%s10949_s3 + $0x13c] sm:$0xf0]  ;;  %v8707_v58 = vor.u32 %v7203_v3, %v5876_v35 }
 0x262   : > { %1807 = vmatpush.bf16.msra.mxu2 %v8685_v28  ;;  %v1707_v29 = vpack.c.b16 %v1685_v55, %v1685_v55  ;;  %v1708_v10 = vpack.c.b16 %v1686_v19, %v1686_v19  ;;  %v8709_v25 = vor.u32 %v7202_v33, %v5878_v4  ;;  %v7208_v27 = vld [vmem:[%s10949_s3 + $0x13c] sm:$0xf]  ;;  %v5902_v7 = vld [vmem:[%s10949_s3 + $0x140] sm:$0xf0]  ;;  %v5868_v62 = vld [vmem:[%s10949_s3 + $0xf8] sm:$0xf]  ;;  %v8737_v21 = vor.u32 %v7209_v51, %v5900_v1 }
 0x263   : > { %v7201_v0 = vld [vmem:[%s10949_s3 + $0xfc] sm:$0xf0]  ;;  %v7200_v26 = vld [vmem:[%s10949_s3 + $0xfc] sm:$0xf]  ;;  %v5870_v20 = vld [vmem:[%s10949_s3 + $0x100] sm:$0xf0]  ;;  %v8739_v6 = vor.u32 %v7208_v27, %v5902_v7 }
 0x264   : > { %v8730_v40 = vsel %vm1742_vm5, %v1707_v29, 0  ;;  %v8733_v50 = vsel %vm1742_vm5, %v1708_v10, 0  ;;  %v5892_v56 = vld [vmem:[%s10949_s3 + $0x128] sm:$0xf]  ;;  %v7207_v12 = vld [vmem:[%s10949_s3 + $0x12c] sm:$0xf0]  ;;  %v8752_v8 = vor.u32 %v7201_v0, %v5868_v62  ;;  %v8754_v14 = vor.u32 %v7200_v26, %v5870_v20 }
 0x265   : > { %1783 = vmatpush.bf16.msra.mxu1 %v8730_v40  ;;  %1841 = vmatpush.bf16.msra.mxu3 %v8733_v50  ;;  %v7206_v44 = vld [vmem:[%s10949_s3 + $0x12c] sm:$0xf]  ;;  %v5894_v5 = vld [vmem:[%s10949_s3 + $0x130] sm:$0xf0]  ;;  %v5860_v32 = vld [vmem:[%s10949_s3 + $0xe8] sm:$0xf]  ;;  %v8774_v15 = vor.u32 %v7207_v12, %v5892_v56 }
 0x266   : > { %1750 = vmatpush.bf16.msra.mxu0 %v8707_v58  ;;  %1808 = vmatpush.bf16.msra.mxu2 %v8709_v25  ;;  %v7199_v37 = vld [vmem:[%s10949_s3 + $0xec] sm:$0xf0]  ;;  %v7198_v23 = vld [vmem:[%s10949_s3 + $0xec] sm:$0xf]  ;;  %v5862_v11 = vld [vmem:[%s10949_s3 + $0xf0] sm:$0xf0]  ;;  %v8776_v36 = vor.u32 %v7206_v44, %v5894_v5 }
 0x267   : > { %s8778_s17 = scalar_lea.vmem [#allocation2], %s7152_s2  ;;  %v8784_v52 = vor.u32 %v7199_v37, %v5860_v32  ;;  %v8786_v43 = vor.u32 %v7198_v23, %v5862_v11  ;;  %v5852_v63 = vld [vmem:[%s10949_s3 + $0xd8] sm:$0xf]  ;;  %v7197_v24 = vld [vmem:[%s10949_s3 + $0xdc] sm:$0xf0]  ;;  %vm1729_vm6 = vcmask 277504  }
 0x268   : > { %v7182_v9 = vld [vmem:[%s8778_s17 + $0x44] sm:$0xf]  ;;  %v5798_v45 = vld [vmem:[%s8778_s17 + $0x48] sm:$0xf0]  ;;  %v7196_v13 = vld [vmem:[%s10949_s3 + $0xdc] sm:$0xf]  ;;  %v8809_v47 = vor.u32 %v7197_v24, %v5852_v63 }
 0x269   : > { %1784 = vmatpush.bf16.msra.mxu1 %v8737_v21  ;;  %1842 = vmatpush.bf16.msra.mxu3 %v8739_v6  ;;  %v5854_v42 = vld [vmem:[%s10949_s3 + $0xe0] sm:$0xf0]  ;;  %v8800_v31 = vor.u32 %v7182_v9, %v5798_v45  ;;  %v5844_v17 = vld [vmem:[%s10949_s3 + $0xc8] sm:$0xf]  ;;  %v7195_v53 = vld [vmem:[%s10949_s3 + $0xcc] sm:$0xf0] }
 0x26a   : > { %1751 = vmatpush.bf16.msra.mxu0 %v8752_v8  ;;  %1809 = vmatpush.bf16.msra.mxu2 %v8754_v14  ;;  %v8811_v57 = vor.u32 %v7196_v13, %v5854_v42  ;;  %v7194_v49 = vld [vmem:[%s10949_s3 + $0xcc] sm:$0xf]  ;;  %v5846_v60 = vld [vmem:[%s10949_s3 + $0xd0] sm:$0xf0]  ;;  %v1553_v39 = vld [vmem:[%s10949_s3 + $0xa0] sm:$0x11]  ;;  %v8845_v46 = vor.u32 %v7195_v53, %v5844_v17 }
 0x26b   : > { %v6004_v54 = vld [vmem:[%s10949_s3 + $0x70] sm:$0xf]  ;;  %v7176_v34 = vld [vmem:[%s10949_s3 + $0x74] sm:$0xf0]  ;;  %v1962_v16 = vunpack.c.l.b16 %v1553_v39  ;;  %v5996_v30 = vld [vmem:[%s10949_s3 + $0x60] sm:$0xf]  ;;  %v8847_v38 = vor.u32 %v7194_v49, %v5846_v60  ;;  %v1963_v4 = vunpack.c.h.b16 %v1553_v39 }
 0x26c   : > { %v8835_v61 = vor.u32 %v7176_v34, %v6004_v54  ;;  %v7174_v18 = vld [vmem:[%s10949_s3 + $0x64] sm:$0xf0]  ;;  %v5836_v41 = vld [vmem:[%s10949_s3 + $0xb8] sm:$0xf]  ;;  %v7193_v48 = vld [vmem:[%s10949_s3 + $0xbc] sm:$0xf0] }
 0x26d   : > { %1785 = vmatpush.bf16.msra.mxu1 %v8774_v15  ;;  %1843 = vmatpush.bf16.msra.mxu3 %v8776_v36  ;;  %v7192_v22 = vld [vmem:[%s10949_s3 + $0xbc] sm:$0xf]  ;;  %v1984_v59 = vpack.c.b16 %v1962_v16, %v1962_v16  ;;  %v5838_v55 = vld [vmem:[%s10949_s3 + $0xc0] sm:$0xf0]  ;;  %v8862_v19 = vor.u32 %v7174_v18, %v5996_v30  ;;  %v5988_v35 = vld [vmem:[%s10949_s3 + $0x50] sm:$0xf]  ;;  %v8884_v10 = vor.u32 %v7193_v48, %v5836_v41 }
 0x26e   : > { %1752 = vmatpush.bf16.msra.mxu0 %v8784_v52  ;;  %1810 = vmatpush.bf16.msra.mxu2 %v8786_v43  ;;  %v7172_v3 = vld [vmem:[%s10949_s3 + $0x54] sm:$0xf0]  ;;  %v6020_v1 = vld [vmem:[%s10949_s3 + $0x90] sm:$0xf]  ;;  %v8886_v27 = vor.u32 %v7192_v22, %v5838_v55  ;;  %v5828_v7 = vld [vmem:[%s10949_s3 + $0xa8] sm:$0xf]  ;;  %v1985_v56 = vpack.c.b16 %v1963_v4, %v1963_v4 }
 0x26f   : > { %v8871_v33 = vsel %vm1742_vm5, %v1984_v59, 0  ;;  %v7180_v51 = vld [vmem:[%s10949_s3 + $0x94] sm:$0xf0]  ;;  %v7191_v62 = vld [vmem:[%s10949_s3 + $0xac] sm:$0xf0]  ;;  %v8901_v20 = vor.u32 %v7172_v3, %v5988_v35  ;;  %s7522_s21 = smov 112  }
 0x270   : > { %5906 = vmatmul.msk.bf16.vlgmr.msra.gmra.mxu1 %vm1729_vm6, %v8800_v31  ;;  %5910 = vmatmul.msk.bf16.vlgmr.msra.gmra.mxu3 %vm1729_vm6, %v8800_v31  ;;  %v8880_v29 = vor.u32 %v7180_v51, %v6020_v1  ;;  %v7190_v0 = vld [vmem:[%s10949_s3 + $0xac] sm:$0xf]  ;;  %v5830_v26 = vld [vmem:[%s10949_s3 + $0xb0] sm:$0xf0]  ;;  %v6006_v44 = vld [vmem:[%s10949_s3 + $0x78] sm:$0xf0]  ;;  %v8914_v37 = vor.u32 %v7191_v62, %v5828_v7 }
 0x271   : > { %2024 = vmatpush.bf16.msrb.mxu1 %v8835_v61  ;;  %2058 = vmatpush.bf16.msrb.mxu3 %v8871_v33  ;;  %v7175_v12 = vld [vmem:[%s10949_s3 + $0x74] sm:$0xf]  ;;  %v5806_v32 = vld [vmem:[%s8778_s17 + $0x58] sm:$0xf0]  ;;  %v8916_v23 = vor.u32 %v7190_v0, %v5830_v26  ;;  %v5796_v11 = vld [vmem:[%s8778_s17 + $0x40] sm:$0xf] }
 0x272   : > { %1753 = vmatpush.bf16.msra.mxu0 %v8809_v47  ;;  %1811 = vmatpush.bf16.msra.mxu2 %v8811_v57  ;;  %v7184_v5 = vld [vmem:[%s8778_s17 + $0x54] sm:$0xf]  ;;  %v7183_v9 = vld [vmem:[%s8778_s17 + $0x44] sm:$0xf0]  ;;  %v7173_v45 = vld [vmem:[%s10949_s3 + $0x64] sm:$0xf]  ;;  %v8923_v63 = vor.u32 %v7175_v12, %v6006_v44 }
 0x273   : > { %v5998_v24 = vld [vmem:[%s10949_s3 + $0x68] sm:$0xf0]  ;;  %v5980_v13 = vld [vmem:[%s10949_s3 + $0x40] sm:$0xf]  ;;  %v7170_v42 = vld [vmem:[%s10949_s3 + $0x44] sm:$0xf0]  ;;  %v8935_v17 = vor.u32 %v7184_v5, %v5806_v32  ;;  %v8946_v39 = vor.u32 %v7183_v9, %v5796_v11 }
 0x274   : > { %v8938_v53 = vsel %vm1742_vm5, %v1985_v56, 0  ;;  %v7179_v49 = vld [vmem:[%s10949_s3 + $0x94] sm:$0xf]  ;;  %v6022_v60 = vld [vmem:[%s10949_s3 + $0x98] sm:$0xf0]  ;;  %v8950_v54 = vor.u32 %v7170_v42, %v5980_v13  ;;  %v8954_v34 = vor.u32 %v7173_v45, %v5998_v24  ;;  %vm3905_vm7 = vcmask 916480  }
 0x275   : > { %2025 = vmatpush.bf16.msrb.mxu1 %v8862_v19  ;;  %2059 = vmatpush.bf16.msrb.mxu3 %v8880_v29  ;;  %v8956_v16 = vor.u32 %v7179_v49, %v6022_v60  ;;  %v5972_v30 = vld [vmem:[%s10949_s3 + $0x30] sm:$0xf]  ;;  %v7168_v18 = vld [vmem:[%s10949_s3 + $0x34] sm:$0xf0]  ;;  %v7171_v41 = vld [vmem:[%s10949_s3 + $0x54] sm:$0xf] }
 0x276   : > { %1754 = vmatpush.bf16.msra.mxu0 %v8845_v46  ;;  %1812 = vmatpush.bf16.msra.mxu2 %v8847_v38  ;;  %v5990_v48 = vld [vmem:[%s10949_s3 + $0x58] sm:$0xf0]  ;;  %v8977_v22 = vor.u32 %v7168_v18, %v5972_v30  ;;  %v5964_v59 = vld [vmem:[%s10949_s3 + $0x20] sm:$0xf]  ;;  %v7166_v55 = vld [vmem:[%s10949_s3 + $0x24] sm:$0xf0] }
 0x277   : > { %v8986_v35 = vor.u32 %v7171_v41, %v5990_v48  ;;  %v6012_v3 = vld [vmem:[%s10949_s3 + $0x80] sm:$0xf]  ;;  %v7178_v4 = vld [vmem:[%s10949_s3 + $0x84] sm:$0xf0]  ;;  %v7177_v1 = vld [vmem:[%s10949_s3 + $0x84] sm:$0xf]  ;;  %v9012_v56 = vor.u32 %v7166_v55, %v5964_v59 }
 0x278   : > { %v7169_v51 = vld [vmem:[%s10949_s3 + $0x44] sm:$0xf]  ;;  %v5982_v7 = vld [vmem:[%s10949_s3 + $0x48] sm:$0xf0]  ;;  %v9004_v62 = vor.u32 %v7178_v4, %v6012_v3  ;;  %v5956_v44 = vld [vmem:[%s10949_s3 + $0x10] sm:$0xf] }
 0x279   : > { %2026 = vmatpush.bf16.msrb.mxu1 %v8901_v20  ;;  %v6014_v0 = vld [vmem:[%s10949_s3 + $0x88] sm:$0xf0]  ;;  %v9016_v12 = vor.u32 %v7169_v51, %v5982_v7  ;;  %v7164_v5 = vld [vmem:[%s10949_s3 + $0x14] sm:$0xf0]  ;;  %v7167_v32 = vld [vmem:[%s10949_s3 + $0x34] sm:$0xf] }
 0x27a   : > { %1755 = vmatpush.bf16.msra.mxu0 %v8884_v10  ;;  %1813 = vmatpush.bf16.msra.mxu2 %v8886_v27  ;;  %v9009_v26 = vor.u32 %v7177_v1, %v6014_v0  ;;  %v5974_v11 = vld [vmem:[%s10949_s3 + $0x38] sm:$0xf0]  ;;  %v7186_v9 = vld [vmem:[%s8778_s17 + $0x64] sm:$0xf]  ;;  %v5814_v45 = vld [vmem:[%s8778_s17 + $0x68] sm:$0xf0]  ;;  %v9038_v42 = vor.u32 %v7164_v5, %v5956_v44 }
 0x27b   : > { %2060 = vmatpush.bf16.msrb.mxu3 %v9004_v62  ;;  %v5804_v24 = vld [vmem:[%s8778_s17 + $0x50] sm:$0xf]  ;;  %v7185_v13 = vld [vmem:[%s8778_s17 + $0x54] sm:$0xf0]  ;;  %v9041_v49 = vor.u32 %v7167_v32, %v5974_v11  ;;  %v5948_v60 = vld [vmem:[%s10949_s3] sm:$0xf] }
 0x27c   : > { %v7165_v30 = vld [vmem:[%s10949_s3 + $0x24] sm:$0xf]  ;;  %v5966_v18 = vld [vmem:[%s10949_s3 + $0x28] sm:$0xf0]  ;;  %v9059_v41 = vor.u32 %v7185_v13, %v5804_v24  ;;  %v5822_v51 = vld [vmem:[%s8778_s17 + $0x78] sm:$0xf0] }
 0x27d   : > { %2027 = vmatpush.bf16.msrb.mxu1 %v8950_v54  ;;  %v9065_v59 = vor.u32 %v7165_v30, %v5966_v18  ;;  %v7161_v3 = vld [vmem:[%s10949_s3 + $0x4] sm:$0xf]  ;;  %v5950_v4 = vld [vmem:[%s10949_s3 + $0x8] sm:$0xf0]  ;;  %v5812_v7 = vld [vmem:[%s8778_s17 + $0x60] sm:$0xf] }
 0x27e   : > { %1756 = vmatpush.bf16.msra.mxu0 %v8914_v37  ;;  %1814 = vmatpush.bf16.msra.mxu2 %v8916_v23  ;;  %v9093_v1 = vor.u32 %v7161_v3, %v5950_v4  ;;  %v5820_v44 = vld [vmem:[%s8778_s17 + $0x70] sm:$0xf]  ;;  %v7189_v5 = vld [vmem:[%s8778_s17 + $0x74] sm:$0xf0]  ;;  %v7213_v13 = vld [vmem:[%s8778_s17 + $0x94] sm:$0xf] }
 0x27f   : > { %2234 = vmatpush.bf16.msra.mxu3 %v8730_v40  ;;  %v7162_v40 = vld [vmem:[%s10949_s3 + $0x4] sm:$0xf0]  ;;  %v7214_v24 = vld [vmem:[%s8778_s17 + $0x94] sm:$0xf0]  ;;  %s7306_s22 = sshll.u32 %s7519_s13, 6  ;;  %vm3958_vm8 = vcmask 130052  }
 0x280   : > { %5907 = vmatmul.msk.bf16.gmra.mxu1 %vm1729_vm6, %v8935_v17  ;;  %5911 = vmatmul.msk.bf16.gmra.mxu3 %vm1729_vm6, %v8935_v17  ;;  %v9062_v48 = vor.u32 %v7162_v40, %v5948_v60  ;;  %vm10602_vm9 = vmor %vm3958_vm8, %vm1504_vm2  ;;  %s10606_s23 = scalar_lea.vmem [#allocation3], %s7306_s22  ;;  %s1520_s13 = sadd.s32 1, %s7519_s13  }
 0x281   : > { %1757 = vmatmul.bf16.vlgmr.msra.gmra.mxu0 %v8946_v39  ;;  %1815 = vmatmul.bf16.vlgmr.msra.gmra.mxu2 %v8946_v39  ;;  %p1517_p1 = scmp.ge.s32.totalorder %s1520_s13, 5  }
 0x282   : > { %2116 = vmatpush.bf16.msrb.mxu2 %v8938_v53  ;;  %2082 = vmatpush.bf16.msrb.mxu0 %v8923_v63  ;;  %vm4112_vm10 = vcmask (%p1517_p1), 130048   ;;  %vm5019_vm11 = vcmask (%p1517_p1), 982016   ;;  %vm5138_vm12 = vcmask (%p1517_p1), 1041408   ;;  %vm5125_vm13 = vcmask (%p1517_p1), 687104  }
 0x283   : > { %2028 = vmatpush.bf16.msrb.mxu1 %v8977_v22  ;;  %2235 = vmatpush.bf16.msra.mxu3 %v8737_v21  ;;  %v7163_v21 = vld [vmem:[%s10949_s3 + $0x14] sm:$0xf] }
 0x286   : > { %2083 = vmatpush.bf16.msrb.mxu0 %v8954_v34  ;;  %2117 = vmatpush.bf16.msrb.mxu2 %v8956_v16 }
 0x287   : > { %2029 = vmatpush.bf16.msrb.mxu1 %v9012_v56  ;;  %2236 = vmatpush.bf16.msra.mxu3 %v8774_v15  ;;  %v7188_v15 = vld [vmem:[%s8778_s17 + $0x74] sm:$0xf] }
 0x288   : > { %v9102_v0 = vor.u32 %v7188_v15, %v5822_v51  ;;  %v7216_v15 = vld [vmem:[%s8778_s17 + $0xa4] sm:$0xf0]  ;;  %v7215_v51 = vld [vmem:[%s8778_s17 + $0xa4] sm:$0xf] }
 0x28a   : > { %2084 = vmatpush.bf16.msrb.mxu0 %v8986_v35  ;;  %2118 = vmatpush.bf16.msrb.mxu2 %v9009_v26 }
 0x28b   : > { %2030 = vmatpush.bf16.msrb.mxu1 %v9038_v42 }
 0x28e   : > { %2292 = vmatpush.bf16.msra.mxu2 %v8733_v50  ;;  %2085 = vmatpush.bf16.msrb.mxu0 %v9016_v12  ;;  %v9049_v50 = vor.u32 %v7186_v9, %v5814_v45  ;;  %v6054_v45 = vld [vmem:[%s8778_s17 + $0x90] sm:$0xf] }
 0x28f   : > { %2031 = vmatpush.bf16.msrb.mxu1 %v9062_v48  ;;  %v9192_v60 = vor.u32 %v7214_v24, %v6054_v45 }
 0x290   : > { %5908 = vmatmul.msk.bf16.gmra.mxu1 %vm1729_vm6, %v9049_v50  ;;  %5912 = vmatmul.msk.bf16.gmra.mxu3 %vm1729_vm6, %v9049_v50 }
 0x291   : > { %1762 = vmatmul.bf16.gmra.mxu0 %v9059_v41  ;;  %1820 = vmatmul.bf16.gmra.mxu2 %v9059_v41 }
 0x292   : > { %2293 = vmatpush.bf16.msra.mxu2 %v8739_v6  ;;  %2086 = vmatpush.bf16.msrb.mxu0 %v9041_v49  ;;  %v5958_v6 = vld [vmem:[%s10949_s3 + $0x18] sm:$0xf0] }
 0x293   : > { %v9082_v55 = vor.u32 %v7163_v21, %v5958_v6  ;;  %2200 = vmatpush.bf16.msra.mxu1 %v8677_v2  ;;  %v7187_v2 = vld [vmem:[%s8778_s17 + $0x64] sm:$0xf0] }
 0x296   : > { %2087 = vmatpush.bf16.msrb.mxu0 %v9065_v59  ;;  %2294 = vmatpush.bf16.msra.mxu2 %v8776_v36  ;;  %v9105_v36 = vor.u32 %v7187_v2, %v5812_v7  ;;  %v6064_v7 = vld [vmem:[%s8778_s17 + $0xa8] sm:$0xf0] }
 0x297   : > { %2201 = vmatpush.bf16.msra.mxu1 %v8707_v58  ;;  %v7154_v58 = vld [vmem:[%s8778_s17 + $0x4] sm:$0xf0] }
 0x29a   : > { %2088 = vmatpush.bf16.msrb.mxu0 %v9082_v55 }
 0x29b   : > { %2202 = vmatpush.bf16.msra.mxu1 %v8752_v8  ;;  %v7153_v8 = vld [vmem:[%s8778_s17 + $0x4] sm:$0xf] }
 0x29e   : > { %2089 = vmatpush.bf16.msrb.mxu0 %v9093_v1 }
 0x29f   : > { %2203 = vmatpush.bf16.msra.mxu1 %v8784_v52  ;;  %v5918_v52 = vld [vmem:[%s8778_s17 + $0x8] sm:$0xf0] }
 0x2a0   : > { %5909 = vmatmul.msk.bf16.gmra.mxu1 %vm1729_vm6, %v9102_v0  ;;  %5913 = vmatmul.msk.bf16.gmra.mxu3 %vm1729_vm6, %v9102_v0 }
 0x2a1   : > { %1767 = vmatmul.bf16.gmra.mxu0 %v9105_v36  ;;  %1825 = vmatmul.bf16.gmra.mxu2 %v9105_v36 }
 0x2a2   : > { %2258 = vmatpush.bf16.msra.mxu0 %v8685_v28  ;;  %v5916_v28 = vld [vmem:[%s8778_s17] sm:$0xf] }
 0x2a3   : > { %2204 = vmatpush.bf16.msra.mxu1 %v8809_v47  ;;  %v5917_v32 = vor.u32 %v7154_v58, %v5916_v28  ;;  %v9126_v47 = vor.u32 %v7189_v5, %v5820_v44 }
 0x2a6   : > { %2259 = vmatpush.bf16.msra.mxu0 %v8709_v25  ;;  %v5921_v25 = vor.u32 %v7153_v8, %v5918_v52  ;;  %v9214_v8 = vor.u32 %v7215_v51, %v6064_v7 }
 0x2a7   : > { %2205 = vmatpush.bf16.msra.mxu1 %v8845_v46  ;;  %v5926_v46 = vld [vmem:[%s8778_s17 + $0x18] sm:$0xf0] }
 0x2aa   : > { %2260 = vmatpush.bf16.msra.mxu0 %v8754_v14  ;;  %v5924_v14 = vld [vmem:[%s8778_s17 + $0x10] sm:$0xf] }
 0x2ab   : > { %2206 = vmatpush.bf16.msra.mxu1 %v8884_v10  ;;  %v5934_v10 = vld [vmem:[%s8778_s17 + $0x28] sm:$0xf0] }
 0x2ae   : > { %2261 = vmatpush.bf16.msra.mxu0 %v8786_v43  ;;  %v7156_v43 = vld [vmem:[%s8778_s17 + $0x14] sm:$0xf0] }
 0x2af   : > { %2207 = vmatpush.bf16.msra.mxu1 %v8914_v37  ;;  %v5940_v37 = vld [vmem:[%s8778_s17 + $0x30] sm:$0xf] }
 0x2b0   : > { %2032 = vmatmul.bf16.vlgmr.msrb.gmra.mxu1 %v5917_v32  ;;  %6026 = vmatmul.msk.bf16.vlgmr.msrb.gmra.mxu3 %vm1729_vm6, %v5921_v25 }
 0x2b1   : > { %1772 = vmatmul.bf16.gmra.mxu0 %v9126_v47  ;;  %1830 = vmatmul.bf16.gmra.mxu2 %v9126_v47 }
 0x2b2   : > { %2262 = vmatpush.bf16.msra.mxu0 %v8811_v57  ;;  %2350 = vmatpush.bf16.msrb.mxu3 %v8871_v33  ;;  %v7155_v57 = vld [vmem:[%s8778_s17 + $0x14] sm:$0xf]  ;;  %v7158_v33 = vld [vmem:[%s8778_s17 + $0x24] sm:$0xf0] }
 0x2b3   : > { %2316 = vmatpush.bf16.msrb.mxu1 %v8835_v61  ;;  %v5925_v61 = vor.u32 %v7156_v43, %v5924_v14 }
 0x2b6   : > { %2263 = vmatpush.bf16.msra.mxu0 %v8847_v38  ;;  %2351 = vmatpush.bf16.msrb.mxu3 %v8880_v29  ;;  %v5929_v38 = vor.u32 %v7155_v57, %v5926_v46  ;;  %v7157_v29 = vld [vmem:[%s8778_s17 + $0x24] sm:$0xf] }
 0x2b7   : > { %2317 = vmatpush.bf16.msrb.mxu1 %v8862_v19  ;;  %v5932_v19 = vld [vmem:[%s8778_s17 + $0x20] sm:$0xf] }
 0x2ba   : > { %2264 = vmatpush.bf16.msra.mxu0 %v8886_v27  ;;  %2352 = vmatpush.bf16.msrb.mxu3 %v9004_v62  ;;  %v5933_v27 = vor.u32 %v7158_v33, %v5932_v19  ;;  %v6048_v62 = vld [vmem:[%s8778_s17 + $0x88] sm:$0xf0]  ;;  %v7218_v19 = vld [vmem:[%s8778_s17 + $0xb4] sm:$0xf0]  ;;  %v7217_v33 = vld [vmem:[%s8778_s17 + $0xb4] sm:$0xf] }
 0x2bb   : > { %2318 = vmatpush.bf16.msrb.mxu1 %v8901_v20  ;;  %v5937_v20 = vor.u32 %v7157_v29, %v5934_v10  ;;  %v6072_v29 = vld [vmem:[%s8778_s17 + $0xb8] sm:$0xf0] }
 0x2be   : > { %2265 = vmatpush.bf16.msra.mxu0 %v8916_v23  ;;  %v7160_v23 = vld [vmem:[%s8778_s17 + $0x34] sm:$0xf0] }
 0x2bf   : > { %2319 = vmatpush.bf16.msrb.mxu1 %v8950_v54  ;;  %v5941_v54 = vor.u32 %v7160_v23, %v5940_v37  ;;  %v9236_v37 = vor.u32 %v7217_v33, %v6072_v29 }
 0x2c0   : > { %2037 = vmatmul.bf16.gmra.mxu1 %v5925_v61  ;;  %6027 = vmatmul.msk.bf16.gmra.mxu3 %vm1729_vm6, %v5929_v38 }
 0x2c1   : > { %2090 = vmatmul.bf16.vlgmr.msrb.gmra.mxu0 %v5917_v32  ;;  %6030 = vmatmul.msk.bf16.vlgmr.msrb.gmra.mxu2 %vm1729_vm6, %v5921_v25 }
 0x2c2   : > { %2408 = vmatpush.bf16.msrb.mxu2 %v8938_v53  ;;  %2374 = vmatpush.bf16.msrb.mxu0 %v8923_v63  ;;  %v7159_v63 = vld [vmem:[%s8778_s17 + $0x34] sm:$0xf]  ;;  %v5942_v53 = vld [vmem:[%s8778_s17 + $0x38] sm:$0xf0] }
 0x2c3   : > { %2320 = vmatpush.bf16.msrb.mxu1 %v8977_v22  ;;  %v7212_v22 = vld [vmem:[%s8778_s17 + $0x84] sm:$0xf0] }
 0x2c6   : > { %2375 = vmatpush.bf16.msrb.mxu0 %v8954_v34  ;;  %2409 = vmatpush.bf16.msrb.mxu2 %v8956_v16  ;;  %v5945_v34 = vor.u32 %v7159_v63, %v5942_v53  ;;  %v6046_v16 = vld [vmem:[%s8778_s17 + $0x80] sm:$0xf] }
 0x2c7   : > { %2321 = vmatpush.bf16.msrb.mxu1 %v9012_v56 }
 0x2ca   : > { %2376 = vmatpush.bf16.msrb.mxu0 %v8986_v35  ;;  %2410 = vmatpush.bf16.msrb.mxu2 %v9009_v26  ;;  %v7211_v35 = vld [vmem:[%s8778_s17 + $0x84] sm:$0xf]  ;;  %v9180_v26 = vor.u32 %v7212_v22, %v6046_v16 }
 0x2cb   : > { %2322 = vmatpush.bf16.msrb.mxu1 %v9038_v42  ;;  %v9182_v56 = vor.u32 %v7211_v35, %v6048_v62  ;;  %v6056_v42 = vld [vmem:[%s8778_s17 + $0x98] sm:$0xf0] }
 0x2cc   : > { %v9194_v40 = vor.u32 %v7213_v13, %v6056_v42 }
 0x2ce   : > { %2377 = vmatpush.bf16.msrb.mxu0 %v9016_v12 }
 0x2cf   : > { %2323 = vmatpush.bf16.msrb.mxu1 %v9062_v48 }
 0x2d0   : > { %2042 = vmatmul.bf16.gmra.mxu1 %v5933_v27  ;;  %6028 = vmatmul.msk.bf16.gmra.mxu3 %vm1729_vm6, %v5937_v20 }
 0x2d1   : > { %2095 = vmatmul.bf16.gmra.mxu0 %v5925_v61  ;;  %6031 = vmatmul.msk.bf16.gmra.mxu2 %vm1729_vm6, %v5929_v38  ;;  %v6070_v38 = vld [vmem:[%s8778_s17 + $0xb0] sm:$0xf] }
 0x2d2   : > { %2378 = vmatpush.bf16.msrb.mxu0 %v9041_v49 }
 0x2d6   : > { %2379 = vmatpush.bf16.msrb.mxu0 %v9065_v59 }
 0x2da   : > { %2380 = vmatpush.bf16.msrb.mxu0 %v9082_v55 }
 0x2de   : > { %2381 = vmatpush.bf16.msrb.mxu0 %v9093_v1  ;;  %v6062_v1 = vld [vmem:[%s8778_s17 + $0xa0] sm:$0xf] }
 0x2df   : > { %v9212_v58 = vor.u32 %v7216_v15, %v6062_v1 }
 0x2e0   : > { %2047 = vmatmul.bf16.gmra.mxu1 %v5941_v54  ;;  %6029 = vmatmul.msk.bf16.gmra.mxu3 %vm1729_vm6, %v5945_v34 }
 0x2e1   : > { %2100 = vmatmul.bf16.gmra.mxu0 %v5933_v27  ;;  %6032 = vmatmul.msk.bf16.gmra.mxu2 %vm1729_vm6, %v5937_v20  ;;  %v9234_v20 = vor.u32 %v7218_v19, %v6070_v38 }
 0x2ed   : > { %v1787_v12 = vpop.f32.mrf.mxu1 }
 0x2f0   : > { %2208 = vmatmul.bf16.vlgmr.msra.gmra.mxu1 %v9180_v26  ;;  %6076 = vmatmul.msk.bf16.vlgmr.msra.gmra.mxu3 %vm1729_vm6, %v9182_v56 }
 0x2f1   : > { %2105 = vmatmul.bf16.gmra.mxu0 %v5941_v54  ;;  %6033 = vmatmul.msk.bf16.gmra.mxu2 %vm1729_vm6, %v5945_v34  ;;  %v6112_v34 = vld [vmem:[%s10949_s3 + $0x1f0] sm:$0x11] }
 0x2f2   : > { %v2515_v16 = vunpack.c.l.b16 %v6112_v34  ;;  %v2516_v22 = vunpack.c.h.b16 %v6112_v34  ;;  %v6155_v34 = vld [vmem:[%s10949_s3 + $0x1a0] sm:$0xf] }
 0x2f3   : > { %v1845_v11 = vpop.f32.mrf.mxu3 }
 0x2f5   : > { %v1789_v9 = vpop.f32.mrf.mxu1 }
 0x2fb   : > { %v1847_v49 = vpop.f32.mrf.mxu3 }
 0x2fd   : > { %v1792_v30 = vpop.f32.mrf.mxu1 }
 0x2fe   : > { %v1758_v18 = vpop.f32.mrf.mxu0 }
 0x2ff   : > { %v9196_v48 = vadd.f32 %v1787_v12, %v1758_v18  ;;  %v2537_v12 = vpack.c.b16 %v2515_v16, %v2515_v16  ;;  %v7234_v18 = vld [vmem:[%s10949_s3 + $0x1c4] sm:$0xf0] }
 0x300   : > { %2213 = vmatmul.bf16.gmra.mxu1 %v9192_v60  ;;  %6077 = vmatmul.msk.bf16.gmra.mxu3 %vm1729_vm6, %v9194_v40  ;;  %v7230_v16 = vld [vmem:[%s10949_s3 + $0x1a4] sm:$0xf0] }
 0x301   : > { %2266 = vmatmul.bf16.vlgmr.msra.gmra.mxu0 %v9180_v26  ;;  %6080 = vmatmul.msk.bf16.vlgmr.msra.gmra.mxu2 %vm1729_vm6, %v9182_v56  ;;  %v9254_v13 = vsel %vm1742_vm5, %v2537_v12, 0  ;;  %v6157_v12 = vld [vmem:[%s10949_s3 + $0x1a8] sm:$0xf0] }
 0x302   : > { %2599 = vmatpush.bf16.msra.mxu3 %v9254_v13 }
 0x303   : > { %v1850_v59 = vpop.f32.mrf.mxu3 }
 0x304   : > { %v1816_v21 = vpop.f32.mrf.mxu2 }
 0x305   : > { %v9204_v6 = vadd.f32 %v1845_v11, %v1816_v21  ;;  %v1794_v55 = vpop.f32.mrf.mxu1  ;;  %v2538_v11 = vpack.c.b16 %v2516_v22, %v2516_v22  ;;  %v6187_v22 = vld [vmem:[%s10949_s3 + $0x1e0] sm:$0xf] }
 0x306   : > { %v1760_v3 = vpop.f32.mrf.mxu0 }
 0x307   : > { %v9206_v4 = vadd.f32 %v1789_v9, %v1760_v3  ;;  %v9257_v42 = vsel %vm1742_vm5, %v2538_v11, 0 }
 0x308   : > { %2657 = vmatpush.bf16.msra.mxu2 %v9257_v42 }
 0x30b   : > { %v1852_v2 = vpop.f32.mrf.mxu3 }
 0x30c   : > { %v1818_v28 = vpop.f32.mrf.mxu2 }
 0x30d   : > { %v9216_v52 = vadd.f32 %v1847_v49, %v1818_v28  ;;  %v1797_v44 = vpop.f32.mrf.mxu1 }
 0x30e   : > { %v1763_v5 = vpop.f32.mrf.mxu0 }
 0x30f   : > { %v9218_v32 = vadd.f32 %v1792_v30, %v1763_v5  ;;  %v6171_v30 = vld [vmem:[%s10949_s3 + $0x1c0] sm:$0xf]  ;;  %v6163_v5 = vld [vmem:[%s10949_s3 + $0x1b0] sm:$0xf] }
 0x310   : > { %2218 = vmatmul.bf16.gmra.mxu1 %v9212_v58  ;;  %6078 = vmatmul.msk.bf16.gmra.mxu3 %vm1729_vm6, %v9214_v8  ;;  %v9272_v21 = vor.u32 %v7234_v18, %v6171_v30  ;;  %v6189_v30 = vld [vmem:[%s10949_s3 + $0x1e8] sm:$0xf0] }
 0x311   : > { %2271 = vmatmul.bf16.gmra.mxu0 %v9192_v60  ;;  %6081 = vmatmul.msk.bf16.gmra.mxu2 %vm1729_vm6, %v9194_v40 }
 0x312   : > { %2565 = vmatpush.bf16.msra.mxu1 %v9272_v21 }
 0x313   : > { %v1855_v25 = vpop.f32.mrf.mxu3 }
 0x314   : > { %v1821_v14 = vpop.f32.mrf.mxu2 }
 0x315   : > { %v9226_v43 = vadd.f32 %v1850_v59, %v1821_v14  ;;  %v1799_v57 = vpop.f32.mrf.mxu1  ;;  %v7233_v59 = vld [vmem:[%s10949_s3 + $0x1c4] sm:$0xf]  ;;  %v7231_v14 = vld [vmem:[%s10949_s3 + $0x1b4] sm:$0xf] }
 0x316   : > { %v1765_v46 = vpop.f32.mrf.mxu0 }
 0x317   : > { %v9228_v61 = vadd.f32 %v1794_v55, %v1765_v46  ;;  %v6173_v55 = vld [vmem:[%s10949_s3 + $0x1c8] sm:$0xf0] }
 0x318   : > { %v9277_v3 = vor.u32 %v7233_v59, %v6173_v55 }
 0x31a   : > { %2623 = vmatpush.bf16.msra.mxu0 %v9277_v3 }
 0x31b   : > { %v1857_v10 = vpop.f32.mrf.mxu3 }
 0x31c   : > { %v1823_v27 = vpop.f32.mrf.mxu2 }
 0x31d   : > { %v9238_v23 = vadd.f32 %v1852_v2, %v1823_v27  ;;  %v1802_v63 = vpop.f32.mrf.mxu1 }
 0x31e   : > { %v1768_v53 = vpop.f32.mrf.mxu0 }
 0x31f   : > { %v9240_v54 = vadd.f32 %v1797_v44, %v1768_v53 }
 0x320   : > { %2223 = vmatmul.bf16.gmra.mxu1 %v9234_v20  ;;  %6079 = vmatmul.msk.bf16.gmra.mxu3 %vm1729_vm6, %v9236_v37 }
 0x321   : > { %2276 = vmatmul.bf16.gmra.mxu0 %v9212_v58  ;;  %6082 = vmatmul.msk.bf16.gmra.mxu2 %vm1729_vm6, %v9214_v8 }
 0x323   : > { %v1860_v35 = vpop.f32.mrf.mxu3 }
 0x324   : > { %v1826_v62 = vpop.f32.mrf.mxu2 }
 0x325   : > { %v9251_v9 = vadd.f32 %v1855_v25, %v1826_v62  ;;  %v1804_v45 = vpop.f32.mrf.mxu1  ;;  %v7232_v25 = vld [vmem:[%s10949_s3 + $0x1b4] sm:$0xf0]  ;;  %v7229_v62 = vld [vmem:[%s10949_s3 + $0x1a4] sm:$0xf] }
 0x326   : > { %v1770_v24 = vpop.f32.mrf.mxu0 }
 0x327   : > { %v9259_v49 = vadd.f32 %v1799_v57, %v1770_v24  ;;  %v6165_v57 = vld [vmem:[%s10949_s3 + $0x1b8] sm:$0xf0]  ;;  %v7237_v24 = vld [vmem:[%s10949_s3 + $0x1e4] sm:$0xf] }
 0x328   : > { %v9306_v46 = vor.u32 %v7231_v14, %v6165_v57  ;;  %v9348_v18 = vor.u32 %v7237_v24, %v6189_v30  ;;  %v6147_v14 = vld [vmem:[%s10949_s3 + $0x190] sm:$0xf]  ;;  %v7228_v57 = vld [vmem:[%s10949_s3 + $0x194] sm:$0xf0]  ;;  %v6141_v24 = vld [vmem:[%s10949_s3 + $0x188] sm:$0xf0] }
 0x32a   : > { %2624 = vmatpush.bf16.msra.mxu0 %v9306_v46  ;;  %2658 = vmatpush.bf16.msra.mxu2 %v9348_v18 }
 0x32b   : > { %v1862_v1 = vpop.f32.mrf.mxu3 }
 0x32c   : > { %v1828_v15 = vpop.f32.mrf.mxu2 }
 0x32d   : > { %v9281_v51 = vadd.f32 %v1857_v10, %v1828_v15  ;;  %v2033_v7 = vpop.f32.mrf.mxu1 }
 0x32e   : > { %v2034_v2 = vadd.f32 %v2033_v7, %v9196_v48  ;;  %v1773_v28 = vpop.f32.mrf.mxu0  ;;  %v9298_v48 = vor.u32 %v7232_v25, %v6163_v5 }
 0x32f   : > { %v9284_v44 = vadd.f32 %v1802_v63, %v1773_v28 }
 0x330   : > { %2324 = vmatmul.bf16.vlgmr.msrb.gmra.mxu1 %v8946_v39  ;;  %6084 = vmatmul.msk.bf16.vlgmr.msrb.gmra.mxu3 %vm1729_vm6, %v8800_v31 }
 0x331   : > { %2281 = vmatmul.bf16.gmra.mxu0 %v9234_v20  ;;  %6083 = vmatmul.msk.bf16.gmra.mxu2 %vm1729_vm6, %v9236_v37 }
 0x332   : > { %2566 = vmatpush.bf16.msra.mxu1 %v9298_v48 }
 0x333   : > { %v2062_v38 = vpop.f32.mrf.mxu3 }
 0x334   : > { %v9310_v19 = vadd.f32 %v2062_v38, %v2034_v2  ;;  %v1831_v33 = vpop.f32.mrf.mxu2  ;;  %v7227_v38 = vld [vmem:[%s10949_s3 + $0x194] sm:$0xf] }
 0x335   : > { %v9312_v29 = vadd.f32 %v1860_v35, %v1831_v33  ;;  %v2035_v10 = vpop.f32.mrf.mxu1  ;;  %v9326_v35 = vor.u32 %v7230_v16, %v6155_v34 }
 0x336   : > { %v2036_v27 = vadd.f32 %v2035_v10, %v9206_v4  ;;  %v1775_v63 = vpop.f32.mrf.mxu0  ;;  %v7238_v4 = vld [vmem:[%s10949_s3 + $0x1e4] sm:$0xf0] }
 0x337   : > { %v9315_v53 = vadd.f32 %v1804_v45, %v1775_v63  ;;  %v9337_v11 = vor.u32 %v7238_v4, %v6187_v22  ;;  %v9339_v45 = vor.u32 %v7229_v62, %v6157_v12  ;;  %2567 = vmatpush.bf16.msra.mxu1 %v9326_v35  ;;  %v6139_v63 = vld [vmem:[%s10949_s3 + $0x180] sm:$0xf]  ;;  %v7225_v12 = vld [vmem:[%s10949_s3 + $0x184] sm:$0xf] }
 0x338   : > { %v9404_v30 = vor.u32 %v7225_v12, %v6141_v24  ;;  %v7223_v12 = vld [vmem:[%s10949_s3 + $0x174] sm:$0xf]  ;;  %v6133_v24 = vld [vmem:[%s10949_s3 + $0x178] sm:$0xf0] }
 0x339   : > { %2600 = vmatpush.bf16.msra.mxu3 %v9337_v11  ;;  %2625 = vmatpush.bf16.msra.mxu0 %v9339_v45 }
 0x33b   : > { %v2064_v59 = vpop.f32.mrf.mxu3 }
 0x33c   : > { %v9352_v55 = vadd.f32 %v2064_v59, %v2036_v27  ;;  %v1833_v15 = vpop.f32.mrf.mxu2  ;;  %v6131_v59 = vld [vmem:[%s10949_s3 + $0x170] sm:$0xf] }
 0x33d   : > { %v9355_v7 = vadd.f32 %v1862_v1, %v1833_v15  ;;  %v2038_v2 = vpop.f32.mrf.mxu1  ;;  %v6179_v15 = vld [vmem:[%s10949_s3 + $0x1d0] sm:$0xf] }
 0x33e   : > { %v2039_v28 = vadd.f32 %v2038_v2, %v9218_v32  ;;  %v2091_v5 = vpop.f32.mrf.mxu0  ;;  %v9371_v32 = vor.u32 %v7228_v57, %v6147_v14  ;;  %v7236_v2 = vld [vmem:[%s10949_s3 + $0x1d4] sm:$0xf0]  ;;  %v6123_v57 = vld [vmem:[%s10949_s3 + $0x160] sm:$0xf] }
 0x33f   : > { %v2092_v25 = vadd.f32 %v2091_v5, %v9204_v6  ;;  %v6149_v6 = vld [vmem:[%s10949_s3 + $0x198] sm:$0xf0]  ;;  %v6180_v5 = vor.u32 %v7236_v2, %v6179_v15 }
 0x340   : > { %2329 = vmatmul.bf16.gmra.mxu1 %v9059_v41  ;;  %6085 = vmatmul.msk.bf16.gmra.mxu3 %vm1729_vm6, %v8935_v17  ;;  %v9379_v1 = vor.u32 %v7227_v38, %v6149_v6  ;;  %v7222_v38 = vld [vmem:[%s10949_s3 + $0x164] sm:$0xf0] }
 0x341   : > { %2382 = vmatmul.bf16.vlgmr.msrb.gmra.mxu0 %v8946_v39  ;;  %6088 = vmatmul.msk.bf16.vlgmr.msrb.gmra.mxu2 %vm1729_vm6, %v8800_v31  ;;  %v7226_v39 = vld [vmem:[%s10949_s3 + $0x184] sm:$0xf0] }
 0x342   : > { %2568 = vmatpush.bf16.msra.mxu1 %v9371_v32  ;;  %2626 = vmatpush.bf16.msra.mxu0 %v9379_v1  ;;  %v9393_v16 = vor.u32 %v7226_v39, %v6139_v63  ;;  %v6181_v63 = vld [vmem:[%s10949_s3 + $0x1d8] sm:$0xf0]  ;;  %v9438_v39 = vor.u32 %v7222_v38, %v6123_v57  ;;  %v7221_v38 = vld [vmem:[%s10949_s3 + $0x164] sm:$0xf] }
 0x343   : > { %v2067_v33 = vpop.f32.mrf.mxu3  ;;  %2601 = vmatpush.bf16.msra.mxu3 %v6180_v5 }
 0x344   : > { %v9383_v10 = vadd.f32 %v2067_v33, %v2039_v28  ;;  %v2120_v27 = vpop.f32.mrf.mxu2 }
 0x345   : > { %v9391_v34 = vadd.f32 %v2120_v27, %v2092_v25  ;;  %v2040_v31 = vpop.f32.mrf.mxu1  ;;  %v7235_v27 = vld [vmem:[%s10949_s3 + $0x1d4] sm:$0xf] }
 0x346   : > { %v2041_v22 = vadd.f32 %v2040_v31, %v9228_v61  ;;  %v2093_v4 = vpop.f32.mrf.mxu0  ;;  %2569 = vmatpush.bf16.msra.mxu1 %v9393_v16  ;;  %2627 = vmatpush.bf16.msra.mxu0 %v9404_v30 }
 0x347   : > { %v2094_v62 = vadd.f32 %v2093_v4, %v9216_v52  ;;  %v7224_v52 = vld [vmem:[%s10949_s3 + $0x174] sm:$0xf0]  ;;  %v6184_v4 = vor.u32 %v7235_v27, %v6181_v63  ;;  %2791 = vmatpush.bf16.msrb.mxu3 %v9254_v13 }
 0x348   : > { %v9412_v61 = vor.u32 %v7224_v52, %v6131_v59  ;;  %v7220_v13 = vld [vmem:[%s10949_s3 + $0x154] sm:$0xf0] }
 0x349   : > { %2659 = vmatpush.bf16.msra.mxu2 %v6184_v4 }
 0x34a   : > { %2570 = vmatpush.bf16.msra.mxu1 %v9412_v61 }
 0x34b   : > { %v2069_v28 = vpop.f32.mrf.mxu3  ;;  %2792 = vmatpush.bf16.msrb.mxu3 %v9337_v11 }
 0x34c   : > { %v9422_v25 = vadd.f32 %v2069_v28, %v2041_v22  ;;  %v2122_v14 = vpop.f32.mrf.mxu2 }
 0x34d   : > { %v9430_v6 = vadd.f32 %v2122_v14, %v2094_v62  ;;  %v2043_v33 = vpop.f32.mrf.mxu1  ;;  %2849 = vmatpush.bf16.msrb.mxu2 %v9257_v42  ;;  %v6125_v42 = vld [vmem:[%s10949_s3 + $0x168] sm:$0xf0] }
 0x34e   : > { %v2044_v31 = vadd.f32 %v2043_v33, %v9240_v54  ;;  %v2096_v22 = vpop.f32.mrf.mxu0  ;;  %2571 = vmatpush.bf16.msra.mxu1 %v9438_v39  ;;  %v9453_v54 = vor.u32 %v7223_v12, %v6133_v24 }
 0x34f   : > { %v2097_v62 = vadd.f32 %v2096_v22, %v9226_v43  ;;  %v6115_v43 = vld [vmem:[%s10949_s3 + $0x150] sm:$0xf]  ;;  %2793 = vmatpush.bf16.msrb.mxu3 %v6180_v5 }
 0x350   : > { %2334 = vmatmul.bf16.gmra.mxu1 %v9105_v36  ;;  %6086 = vmatmul.msk.bf16.gmra.mxu3 %vm1729_vm6, %v9049_v50  ;;  %v9464_v59 = vor.u32 %v7220_v13, %v6115_v43 }
 0x351   : > { %2387 = vmatmul.bf16.gmra.mxu0 %v9059_v41  ;;  %6089 = vmatmul.msk.bf16.gmra.mxu2 %vm1729_vm6, %v8935_v17 }
 0x352   : > { %2628 = vmatpush.bf16.msra.mxu0 %v9453_v54  ;;  %2572 = vmatpush.bf16.msra.mxu1 %v9464_v59 }
 0x353   : > { %v2072_v52 = vpop.f32.mrf.mxu3  ;;  %2850 = vmatpush.bf16.msrb.mxu2 %v9348_v18 }
 0x354   : > { %v9469_v15 = vadd.f32 %v2072_v52, %v2044_v31  ;;  %v2125_v2 = vpop.f32.mrf.mxu2 }
 0x355   : > { %v9473_v41 = vadd.f32 %v2125_v2, %v2097_v62  ;;  %v2045_v17 = vpop.f32.mrf.mxu1 }
 0x356   : > { %2757 = vmatpush.bf16.msrb.mxu1 %v9272_v21  ;;  %v2046_v28 = vadd.f32 %v2045_v17, %v9259_v49  ;;  %v2098_v14 = vpop.f32.mrf.mxu0  ;;  %v6128_v21 = vor.u32 %v7221_v38, %v6125_v42  ;;  %v6117_v49 = vld [vmem:[%s10949_s3 + $0x158] sm:$0xf0] }
 0x357   : > { %v2099_v57 = vadd.f32 %v2098_v14, %v9238_v23  ;;  %v7219_v23 = vld [vmem:[%s10949_s3 + $0x154] sm:$0xf]  ;;  %2851 = vmatpush.bf16.msrb.mxu2 %v6184_v4 }
 0x358   : > { %2629 = vmatpush.bf16.msra.mxu0 %v6128_v21  ;;  %v6120_v63 = vor.u32 %v7219_v23, %v6117_v49 }
 0x35a   : > { %2758 = vmatpush.bf16.msrb.mxu1 %v9298_v48 }
 0x35b   : > { %v2074_v11 = vpop.f32.mrf.mxu3 }
 0x35c   : > { %v9491_v33 = vadd.f32 %v2074_v11, %v2046_v28  ;;  %v2127_v27 = vpop.f32.mrf.mxu2  ;;  %2630 = vmatpush.bf16.msra.mxu0 %v6120_v63 }
 0x35d   : > { %v9494_v18 = vadd.f32 %v2127_v27, %v2099_v57  ;;  %v2048_v48 = vpop.f32.mrf.mxu1 }
 0x35e   : > { %2759 = vmatpush.bf16.msrb.mxu1 %v9326_v35  ;;  %v2049_v5 = vadd.f32 %v2048_v48, %v9284_v44  ;;  %v2101_v31 = vpop.f32.mrf.mxu0 }
 0x35f   : > { %v2102_v22 = vadd.f32 %v2101_v31, %v9251_v9 }
 0x360   : > { %2815 = vmatpush.bf16.msrb.mxu0 %v9277_v3  ;;  %2339 = vmatmul.bf16.gmra.mxu1 %v9126_v47 }
 0x361   : > { %6087 = vmatmul.msk.bf16.gmra.mxu3 %vm1729_vm6, %v9102_v0  ;;  %2392 = vmatmul.bf16.gmra.mxu0 %v9105_v36 }
 0x362   : > { %6090 = vmatmul.msk.bf16.gmra.mxu2 %vm1729_vm6, %v9049_v50  ;;  %2760 = vmatpush.bf16.msrb.mxu1 %v9371_v32 }
 0x363   : > { %v2077_v35 = vpop.f32.mrf.mxu3 }
 0x364   : > { %2816 = vmatpush.bf16.msrb.mxu0 %v9306_v46  ;;  %v9507_v44 = vadd.f32 %v2077_v35, %v2049_v5  ;;  %v2130_v9 = vpop.f32.mrf.mxu2 }
 0x365   : > { %v9509_v4 = vadd.f32 %v2130_v9, %v2102_v22  ;;  %v2050_v3 = vpop.f32.mrf.mxu1 }
 0x366   : > { %v2051_v62 = vadd.f32 %v2050_v3, %v9315_v53  ;;  %v2103_v12 = vpop.f32.mrf.mxu0  ;;  %2761 = vmatpush.bf16.msrb.mxu1 %v9393_v16 }
 0x367   : > { %v2104_v36 = vadd.f32 %v2103_v12, %v9281_v51 }
 0x368   : > { %2817 = vmatpush.bf16.msrb.mxu0 %v9339_v45 }
 0x36a   : > { %2762 = vmatpush.bf16.msrb.mxu1 %v9412_v61 }
 0x36b   : > { %v2079_v50 = vpop.f32.mrf.mxu3 }
 0x36c   : > { %2818 = vmatpush.bf16.msrb.mxu0 %v9379_v1  ;;  %v9517_v46 = vadd.f32 %v2079_v50, %v2051_v62  ;;  %v2132_v32 = vpop.f32.mrf.mxu2 }
 0x36d   : > { %v9519_v24 = vadd.f32 %v2132_v32, %v2104_v36  ;;  %v2209_v43 = vpop.f32.mrf.mxu1 }
 0x36e   : > { %v2106_v13 = vpop.f32.mrf.mxu0  ;;  %2763 = vmatpush.bf16.msrb.mxu1 %v9438_v39 }
 0x36f   : > { %v2107_v53 = vadd.f32 %v2106_v13, %v9312_v29 }
 0x370   : > { %2819 = vmatpush.bf16.msrb.mxu0 %v9404_v30  ;;  %2573 = vmatmul.bf16.vlgmr.msra.gmra.mxu1 %v9180_v26 }
 0x371   : > { %6193 = vmatmul.msk.bf16.vlgmr.msra.gmra.mxu3 %vm1729_vm6, %v9182_v56  ;;  %2397 = vmatmul.bf16.gmra.mxu0 %v9126_v47 }
 0x372   : > { %6091 = vmatmul.msk.bf16.gmra.mxu2 %vm1729_vm6, %v9102_v0  ;;  %2764 = vmatpush.bf16.msrb.mxu1 %v9464_v59 }
 0x373   : > { %v2238_v51 = vpop.f32.mrf.mxu3 }
 0x374   : > { %2820 = vmatpush.bf16.msrb.mxu0 %v9453_v54  ;;  %v9532_v45 = vadd.f32 %v2238_v51, %v2209_v43  ;;  %v2135_v29 = vpop.f32.mrf.mxu2 }
 0x375   : > { %v9534_v1 = vadd.f32 %v2135_v29, %v2107_v53  ;;  %v2211_v16 = vpop.f32.mrf.mxu1 }
 0x376   : > { %v2108_v30 = vpop.f32.mrf.mxu0 }
 0x377   : > { %v2109_v61 = vadd.f32 %v2108_v30, %v9355_v7  ;;  %v7263_v30 = vld [vmem:[%s10949_s3 + $0x26c] sm:$0xf0] }
 0x378   : > { %2821 = vmatpush.bf16.msrb.mxu0 %v6128_v21 }
 0x37b   : > { %v2240_v39 = vpop.f32.mrf.mxu3 }
 0x37c   : > { %2822 = vmatpush.bf16.msrb.mxu0 %v6120_v63  ;;  %v9537_v47 = vadd.f32 %v2240_v39, %v2211_v16  ;;  %v2137_v0 = vpop.f32.mrf.mxu2  ;;  %v6330_v16 = vld [vmem:[%s10949_s3 + $0x268] sm:$0xf]  ;;  %v7240_v39 = vld [vmem:[%s8778_s17 + $0xc4] sm:$0xf] }
 0x37d   : > { %v9539_v52 = vadd.f32 %v2137_v0, %v2109_v61  ;;  %v2214_v59 = vpop.f32.mrf.mxu1  ;;  %v7262_v61 = vld [vmem:[%s10949_s3 + $0x26c] sm:$0xf]  ;;  %v9600_v0 = vor.u32 %v7263_v30, %v6330_v16  ;;  %v6314_v16 = vld [vmem:[%s10949_s3 + $0x248] sm:$0xf]  ;;  %v7259_v30 = vld [vmem:[%s10949_s3 + $0x24c] sm:$0xf0] }
 0x37e   : > { %v2267_v2 = vpop.f32.mrf.mxu0 }
 0x37f   : > { %10996 = vst [vmem:[#allocation22_spill] sm:$0xff] %v9539_v52  ;;  %3022 = vmatpush.bf16.msra.mxu1 %v9600_v0 }
 0x380   : > { %2578 = vmatmul.bf16.gmra.mxu1 %v9192_v60 }
 0x381   : > { %6194 = vmatmul.msk.bf16.gmra.mxu3 %vm1729_vm6, %v9194_v40  ;;  %2631 = vmatmul.bf16.vlgmr.msra.gmra.mxu0 %v9180_v26 }
 0x382   : > { %6197 = vmatmul.msk.bf16.vlgmr.msra.gmra.mxu2 %vm1729_vm6, %v9182_v56 }
 0x383   : > { %v2243_v7 = vpop.f32.mrf.mxu3 }
 0x384   : > { %v9547_v54 = vadd.f32 %v2243_v7, %v2214_v59  ;;  %v2296_v17 = vpop.f32.mrf.mxu2  ;;  %v6332_v59 = vld [vmem:[%s10949_s3 + $0x270] sm:$0xf0]  ;;  %v6213_v7 = vld [vmem:[%s8778_s17 + $0xc0] sm:$0xf] }
 0x385   : > { %v9549_v28 = vadd.f32 %v2296_v17, %v2267_v2  ;;  %v2216_v14 = vpop.f32.mrf.mxu1  ;;  %v6215_v2 = vld [vmem:[%s8778_s17 + $0xc8] sm:$0xf0]  ;;  %v7241_v17 = vld [vmem:[%s8778_s17 + $0xc4] sm:$0xf0] }
 0x386   : > { %v2269_v57 = vpop.f32.mrf.mxu0 }
 0x38b   : > { %v2245_v38 = vpop.f32.mrf.mxu3 }
 0x38c   : > { %v9551_v42 = vadd.f32 %v2245_v38, %v2216_v14  ;;  %v2298_v21 = vpop.f32.mrf.mxu2  ;;  %v9608_v14 = vor.u32 %v7262_v61, %v6332_v59  ;;  %v6346_v61 = vld [vmem:[%s10949_s3 + $0x288] sm:$0xf]  ;;  %v7258_v59 = vld [vmem:[%s10949_s3 + $0x24c] sm:$0xf] }
 0x38d   : > { %v9553_v11 = vadd.f32 %v2298_v21, %v2269_v57  ;;  %v2219_v23 = vpop.f32.mrf.mxu1 }
 0x38e   : > { %v2272_v49 = vpop.f32.mrf.mxu0  ;;  %3080 = vmatpush.bf16.msra.mxu0 %v9608_v14 }
 0x390   : > { %2583 = vmatmul.bf16.gmra.mxu1 %v9212_v58 }
 0x391   : > { %6195 = vmatmul.msk.bf16.gmra.mxu3 %vm1729_vm6, %v9214_v8  ;;  %2636 = vmatmul.bf16.gmra.mxu0 %v9192_v60  ;;  %v6271_v60 = vld [vmem:[%s10949_s3 + $0x298] sm:$0x11] }
 0x392   : > { %6198 = vmatmul.msk.bf16.gmra.mxu2 %vm1729_vm6, %v9194_v40  ;;  %v2972_v40 = vunpack.c.l.b16 %v6271_v60  ;;  %v2973_v12 = vunpack.c.h.b16 %v6271_v60 }
 0x393   : > { %v2248_v26 = vpop.f32.mrf.mxu3 }
 0x394   : > { %v9561_v56 = vadd.f32 %v2248_v26, %v2219_v23  ;;  %v2301_v27 = vpop.f32.mrf.mxu2  ;;  %v2994_v43 = vpack.c.b16 %v2972_v40, %v2972_v40  ;;  %v2995_v13 = vpack.c.b16 %v2973_v12, %v2973_v12  ;;  %v9614_v23 = vor.u32 %v7240_v39, %v6215_v2  ;;  %v6316_v2 = vld [vmem:[%s10949_s3 + $0x250] sm:$0xf0] }
 0x395   : > { %v9563_v63 = vadd.f32 %v2301_v27, %v2272_v49  ;;  %v2221_v48 = vpop.f32.mrf.mxu1  ;;  %v9616_v49 = vor.u32 %v7241_v17, %v6213_v7  ;;  %v9662_v39 = vor.u32 %v7259_v30, %v6314_v16  ;;  %v7243_v7 = vld [vmem:[%s8778_s17 + $0xd4] sm:$0xf0] }
 0x396   : > { %v2274_v5 = vpop.f32.mrf.mxu0  ;;  %v9583_v51 = vsel %vm1742_vm5, %v2994_v43, 0  ;;  %v9586_v29 = vsel %vm1742_vm5, %v2995_v13, 0 }
 0x397   : > { %3056 = vmatpush.bf16.msra.mxu3 %v9583_v51  ;;  %3114 = vmatpush.bf16.msra.mxu2 %v9586_v29 }
 0x39b   : > { %v2250_v31 = vpop.f32.mrf.mxu3 }
 0x39c   : > { %v9565_v22 = vadd.f32 %v2250_v31, %v2221_v48  ;;  %v2303_v35 = vpop.f32.mrf.mxu2  ;;  %v6322_v31 = vld [vmem:[%s10949_s3 + $0x258] sm:$0xf] }
 0x39d   : > { %v9567_v9 = vadd.f32 %v2303_v35, %v2274_v5  ;;  %v2224_v3 = vpop.f32.mrf.mxu1  ;;  %v7261_v35 = vld [vmem:[%s10949_s3 + $0x25c] sm:$0xf0] }
 0x39e   : > { %v2277_v62 = vpop.f32.mrf.mxu0 }
 0x3a0   : > { %2588 = vmatmul.bf16.gmra.mxu1 %v9234_v20 }
 0x3a1   : > { %6196 = vmatmul.msk.bf16.gmra.mxu3 %vm1729_vm6, %v9236_v37  ;;  %2641 = vmatmul.bf16.gmra.mxu0 %v9212_v58 }
 0x3a2   : > { %6199 = vmatmul.msk.bf16.gmra.mxu2 %vm1729_vm6, %v9214_v8 }
 0x3a3   : > { %v2253_v36 = vpop.f32.mrf.mxu3 }
 0x3a4   : > { %v9578_v50 = vadd.f32 %v2253_v36, %v2224_v3  ;;  %v2306_v32 = vpop.f32.mrf.mxu2  ;;  %v7260_v3 = vld [vmem:[%s10949_s3 + $0x25c] sm:$0xf] }
 0x3a5   : > { %v9580_v58 = vadd.f32 %v2306_v32, %v2277_v62  ;;  %v2226_v53 = vpop.f32.mrf.mxu1  ;;  %v6324_v62 = vld [vmem:[%s10949_s3 + $0x260] sm:$0xf0] }
 0x3a6   : > { %v2279_v8 = vpop.f32.mrf.mxu0  ;;  %v9641_v60 = vor.u32 %v7260_v3, %v6324_v62 }
 0x3a8   : > { %3081 = vmatpush.bf16.msra.mxu0 %v9641_v60 }
 0x3ab   : > { %v2255_v57 = vpop.f32.mrf.mxu3 }
 0x3ac   : > { %v9612_v38 = vadd.f32 %v2255_v57, %v2226_v53  ;;  %v2308_v21 = vpop.f32.mrf.mxu2  ;;  %v7242_v53 = vld [vmem:[%s8778_s17 + $0xd4] sm:$0xf]  ;;  %v9676_v57 = vor.u32 %v7258_v59, %v6316_v2  ;;  %v6298_v59 = vld [vmem:[%s10949_s3 + $0x228] sm:$0xf]  ;;  %v7255_v2 = vld [vmem:[%s10949_s3 + $0x22c] sm:$0xf0] }
 0x3ad   : > { %v9618_v26 = vadd.f32 %v2308_v21, %v2279_v8  ;;  %v2325_v27 = vpop.f32.mrf.mxu1  ;;  %v6223_v8 = vld [vmem:[%s8778_s17 + $0xd8] sm:$0xf0]  ;;  %v7266_v21 = vld [vmem:[%s10949_s3 + $0x28c] sm:$0xf] }
 0x3ae   : > { %v2326_v48 = vadd.f32 %v2325_v27, %v9532_v45  ;;  %v2282_v5 = vpop.f32.mrf.mxu0  ;;  %v9633_v45 = vor.u32 %v7261_v35, %v6322_v31  ;;  %v6348_v27 = vld [vmem:[%s10949_s3 + $0x290] sm:$0xf0]  ;;  %3082 = vmatpush.bf16.msra.mxu0 %v9676_v57  ;;  %v9691_v3 = vor.u32 %v7242_v53, %v6223_v8  ;;  %v7257_v53 = vld [vmem:[%s10949_s3 + $0x23c] sm:$0xf0]  ;;  %v7256_v8 = vld [vmem:[%s10949_s3 + $0x23c] sm:$0xf] }
 0x3b0   : > { %2765 = vmatmul.bf16.vlgmr.msrb.gmra.mxu1 %v9616_v49 }
 0x3b1   : > { %6243 = vmatmul.msk.bf16.vlgmr.msrb.gmra.mxu3 %vm1729_vm6, %v9614_v23  ;;  %2646 = vmatmul.bf16.gmra.mxu0 %v9234_v20 }
 0x3b2   : > { %6200 = vmatmul.msk.bf16.gmra.mxu2 %vm1729_vm6, %v9236_v37  ;;  %3023 = vmatpush.bf16.msra.mxu1 %v9633_v45  ;;  %v6221_v37 = vld [vmem:[%s8778_s17 + $0xd0] sm:$0xf] }
 0x3b3   : > { %v2354_v40 = vpop.f32.mrf.mxu3  ;;  %v9693_v62 = vor.u32 %v7243_v7, %v6221_v37 }
 0x3b4   : > { %v9645_v12 = vadd.f32 %v2354_v40, %v2326_v48  ;;  %v2311_v36 = vpop.f32.mrf.mxu2  ;;  %v9685_v48 = vor.u32 %v7266_v21, %v6348_v27  ;;  %v9734_v27 = vor.u32 %v7255_v2, %v6298_v59  ;;  %v7265_v59 = vld [vmem:[%s10949_s3 + $0x27c] sm:$0xf0] }
 0x3b5   : > { %v9647_v32 = vadd.f32 %v2311_v36, %v2282_v5  ;;  %v2327_v43 = vpop.f32.mrf.mxu1 }
 0x3b6   : > { %v2328_v13 = vadd.f32 %v2327_v43, %v9537_v47  ;;  %v2284_v20 = vpop.f32.mrf.mxu0  ;;  %v7267_v47 = vld [vmem:[%s10949_s3 + $0x28c] sm:$0xf0]  ;;  %3024 = vmatpush.bf16.msra.mxu1 %v9662_v39  ;;  %3115 = vmatpush.bf16.msra.mxu2 %v9685_v48 }
 0x3b7   : > { %v9674_v17 = vor.u32 %v7267_v47, %v6346_v61 }
 0x3b9   : > { %3057 = vmatpush.bf16.msra.mxu3 %v9674_v17 }
 0x3bb   : > { %v2356_v5 = vpop.f32.mrf.mxu3 }
 0x3bc   : > { %v9689_v31 = vadd.f32 %v2356_v5, %v2328_v13  ;;  %v2313_v35 = vpop.f32.mrf.mxu2  ;;  %v6306_v13 = vld [vmem:[%s10949_s3 + $0x238] sm:$0xf] }
 0x3bd   : > { %v9696_v40 = vadd.f32 %v2313_v35, %v2284_v20  ;;  %v2330_v36 = vpop.f32.mrf.mxu1 }
 0x3be   : > { %v2331_v43 = vadd.f32 %v2330_v36, %v9547_v54  ;;  %v2383_v16 = vpop.f32.mrf.mxu0  ;;  %v9712_v54 = vor.u32 %v7257_v53, %v6306_v13  ;;  %v6231_v53 = vld [vmem:[%s8778_s17 + $0xe8] sm:$0xf0] }
 0x3bf   : > { %v2384_v30 = vadd.f32 %v2383_v16, %v9549_v28  ;;  %v6308_v28 = vld [vmem:[%s10949_s3 + $0x240] sm:$0xf0]  ;;  %v6300_v16 = vld [vmem:[%s10949_s3 + $0x230] sm:$0xf0] }
 0x3c0   : > { %2770 = vmatmul.bf16.gmra.mxu1 %v9693_v62  ;;  %v9720_v20 = vor.u32 %v7256_v8, %v6308_v28  ;;  %v6229_v8 = vld [vmem:[%s8778_s17 + $0xe0] sm:$0xf]  ;;  %v7245_v28 = vld [vmem:[%s8778_s17 + $0xe4] sm:$0xf0] }
 0x3c1   : > { %6244 = vmatmul.msk.bf16.gmra.mxu3 %vm1729_vm6, %v9691_v3  ;;  %2823 = vmatmul.bf16.vlgmr.msrb.gmra.mxu0 %v9616_v49 }
 0x3c2   : > { %6247 = vmatmul.msk.bf16.vlgmr.msrb.gmra.mxu2 %vm1729_vm6, %v9614_v23  ;;  %3025 = vmatpush.bf16.msra.mxu1 %v9712_v54 }
 0x3c3   : > { %v2359_v37 = vpop.f32.mrf.mxu3  ;;  %3083 = vmatpush.bf16.msra.mxu0 %v9720_v20 }
 0x3c4   : > { %v9724_v61 = vadd.f32 %v2359_v37, %v2331_v43  ;;  %v2412_v47 = vpop.f32.mrf.mxu2  ;;  %v7254_v43 = vld [vmem:[%s10949_s3 + $0x22c] sm:$0xf] }
 0x3c5   : > { %v9732_v7 = vadd.f32 %v2412_v47, %v2384_v30  ;;  %v2332_v21 = vpop.f32.mrf.mxu1  ;;  %v7244_v30 = vld [vmem:[%s8778_s17 + $0xe4] sm:$0xf]  ;;  %v9746_v13 = vor.u32 %v7254_v43, %v6300_v16  ;;  %v6338_v47 = vld [vmem:[%s10949_s3 + $0x278] sm:$0xf] }
 0x3c6   : > { %10997 = vst [vmem:[#allocation23_spill] sm:$0xff] %v9724_v61  ;;  %v2333_v5 = vadd.f32 %v2332_v21, %v9551_v42  ;;  %v2385_v35 = vpop.f32.mrf.mxu0  ;;  %3026 = vmatpush.bf16.msra.mxu1 %v9734_v27  ;;  %v6290_v42 = vld [vmem:[%s10949_s3 + $0x218] sm:$0xf]  ;;  %v6339_v21 = vor.u32 %v7265_v59, %v6338_v47  ;;  %v9769_v16 = vor.u32 %v7244_v30, %v6231_v53  ;;  %v6340_v30 = vld [vmem:[%s10949_s3 + $0x280] sm:$0xf0] }
 0x3c7   : > { %10998 = vst [vmem:[#allocation24_spill] sm:$0xff] %v9732_v7  ;;  %v2386_v36 = vadd.f32 %v2385_v35, %v9553_v11  ;;  %v7253_v11 = vld [vmem:[%s10949_s3 + $0x21c] sm:$0xf0]  ;;  %3084 = vmatpush.bf16.msra.mxu0 %v9746_v13  ;;  %v7251_v7 = vld [vmem:[%s10949_s3 + $0x20c] sm:$0xf0] }
 0x3c8   : > { %v9757_v37 = vor.u32 %v7253_v11, %v6290_v42  ;;  %v9771_v42 = vor.u32 %v7245_v28, %v6229_v8  ;;  %v6282_v11 = vld [vmem:[%s10949_s3 + $0x208] sm:$0xf]  ;;  %3058 = vmatpush.bf16.msra.mxu3 %v6339_v21  ;;  %v7252_v59 = vld [vmem:[%s10949_s3 + $0x21c] sm:$0xf] }
 0x3c9   : > { %v9787_v53 = vor.u32 %v7251_v7, %v6282_v11 }
 0x3ca   : > { %3027 = vmatpush.bf16.msra.mxu1 %v9757_v37 }
 0x3cb   : > { %v2361_v2 = vpop.f32.mrf.mxu3 }
 0x3cc   : > { %v9767_v35 = vadd.f32 %v2361_v2, %v2333_v5  ;;  %v2414_v43 = vpop.f32.mrf.mxu2  ;;  %v7264_v5 = vld [vmem:[%s10949_s3 + $0x27c] sm:$0xf]  ;;  %3248 = vmatpush.bf16.msrb.mxu3 %v9583_v51  ;;  %v6292_v2 = vld [vmem:[%s10949_s3 + $0x220] sm:$0xf0] }
 0x3cd   : > { %v9779_v61 = vadd.f32 %v2414_v43, %v2386_v36  ;;  %v2335_v52 = vpop.f32.mrf.mxu1  ;;  %v6343_v47 = vor.u32 %v7264_v5, %v6340_v30 }
 0x3ce   : > { %v2336_v8 = vadd.f32 %v2335_v52, %v9561_v56  ;;  %v2388_v28 = vpop.f32.mrf.mxu0  ;;  %3028 = vmatpush.bf16.msra.mxu1 %v9787_v53  ;;  %v9802_v52 = vor.u32 %v7252_v59, %v6292_v2  ;;  %v6274_v56 = vld [vmem:[%s10949_s3 + $0x1f8] sm:$0xf] }
 0x3cf   : > { %v2389_v36 = vadd.f32 %v2388_v28, %v9563_v63  ;;  %v7249_v63 = vld [vmem:[%s10949_s3 + $0x1fc] sm:$0xf0]  ;;  %3116 = vmatpush.bf16.msra.mxu2 %v6343_v47 }
 0x3d0   : > { %2775 = vmatmul.bf16.gmra.mxu1 %v9771_v42  ;;  %v9813_v51 = vor.u32 %v7249_v63, %v6274_v56  ;;  %3085 = vmatpush.bf16.msra.mxu0 %v9802_v52  ;;  %v7247_v56 = vld [vmem:[%s8778_s17 + $0xf4] sm:$0xf0]  ;;  %v7248_v63 = vld [vmem:[%s10949_s3 + $0x1fc] sm:$0xf] }
 0x3d1   : > { %6245 = vmatmul.msk.bf16.gmra.mxu3 %vm1729_vm6, %v9769_v16  ;;  %2828 = vmatmul.bf16.gmra.mxu0 %v9693_v62 }
 0x3d2   : > { %6248 = vmatmul.msk.bf16.gmra.mxu2 %vm1729_vm6, %v9691_v3  ;;  %3029 = vmatpush.bf16.msra.mxu1 %v9813_v51 }
 0x3d3   : > { %v2364_v7 = vpop.f32.mrf.mxu3  ;;  %3306 = vmatpush.bf16.msrb.mxu2 %v9586_v29  ;;  %3249 = vmatpush.bf16.msrb.mxu3 %v9674_v17  ;;  %v7250_v29 = vld [vmem:[%s10949_s3 + $0x20c] sm:$0xf] }
 0x3d4   : > { %v9818_v43 = vadd.f32 %v2364_v7, %v2336_v8  ;;  %v2417_v11 = vpop.f32.mrf.mxu2  ;;  %v6284_v8 = vld [vmem:[%s10949_s3 + $0x210] sm:$0xf0] }
 0x3d5   : > { %v9822_v5 = vadd.f32 %v2417_v11, %v2389_v36  ;;  %v2337_v30 = vpop.f32.mrf.mxu1  ;;  %v9834_v17 = vor.u32 %v7250_v29, %v6284_v8  ;;  %v6237_v36 = vld [vmem:[%s8778_s17 + $0xf0] sm:$0xf] }
 0x3d6   : > { %10999 = vst [vmem:[#allocation25_spill] sm:$0xff] %v9818_v43  ;;  %3214 = vmatpush.bf16.msrb.mxu1 %v9600_v0  ;;  %v2338_v28 = vadd.f32 %v2337_v30, %v9565_v22  ;;  %v2390_v59 = vpop.f32.mrf.mxu0  ;;  %v7246_v0 = vld [vmem:[%s8778_s17 + $0xf4] sm:$0xf]  ;;  %v6239_v22 = vld [vmem:[%s8778_s17 + $0xf8] sm:$0xf0] }
 0x3d7   : > { %11000 = vst [vmem:[#allocation26_spill] sm:$0xff] %v9822_v5  ;;  %v2391_v2 = vadd.f32 %v2390_v59, %v9567_v9  ;;  %3307 = vmatpush.bf16.msrb.mxu2 %v9685_v48  ;;  %3250 = vmatpush.bf16.msrb.mxu3 %v6339_v21  ;;  %v6276_v48 = vld [vmem:[%s10949_s3 + $0x200] sm:$0xf0]  ;;  %v9851_v21 = vor.u32 %v7247_v56, %v6237_v36 }
 0x3d8   : > { %3086 = vmatpush.bf16.msra.mxu0 %v9834_v17  ;;  %v6279_v30 = vor.u32 %v7248_v63, %v6276_v48 }
 0x3da   : > { %3215 = vmatpush.bf16.msrb.mxu1 %v9633_v45  ;;  %v9849_v45 = vor.u32 %v7246_v0, %v6239_v22 }
 0x3db   : > { %v2366_v9 = vpop.f32.mrf.mxu3  ;;  %3308 = vmatpush.bf16.msrb.mxu2 %v6343_v47 }
 0x3dc   : > { %v9847_v7 = vadd.f32 %v2366_v9, %v2338_v28  ;;  %v2419_v11 = vpop.f32.mrf.mxu2  ;;  %3087 = vmatpush.bf16.msra.mxu0 %v6279_v30 }
 0x3dd   : > { %v9854_v59 = vadd.f32 %v2419_v11, %v2391_v2  ;;  %v2340_v29 = vpop.f32.mrf.mxu1 }
 0x3de   : > { %3216 = vmatpush.bf16.msrb.mxu1 %v9662_v39  ;;  %v2341_v8 = vadd.f32 %v2340_v29, %v9578_v50  ;;  %v2393_v5 = vpop.f32.mrf.mxu0 }
 0x3df   : > { %v2394_v43 = vadd.f32 %v2393_v5, %v9580_v58 }
 0x3e0   : > { %3272 = vmatpush.bf16.msrb.mxu0 %v9608_v14  ;;  %2780 = vmatmul.bf16.gmra.mxu1 %v9851_v21 }
 0x3e1   : > { %6246 = vmatmul.msk.bf16.gmra.mxu3 %vm1729_vm6, %v9849_v45  ;;  %2833 = vmatmul.bf16.gmra.mxu0 %v9771_v42 }
 0x3e2   : > { %6249 = vmatmul.msk.bf16.gmra.mxu2 %vm1729_vm6, %v9769_v16  ;;  %3217 = vmatpush.bf16.msrb.mxu1 %v9712_v54 }
 0x3e4   : > { %v2369_v39 = vpop.f32.mrf.mxu3  ;;  %3273 = vmatpush.bf16.msrb.mxu0 %v9641_v60 }
 0x3e5   : > { %v9867_v50 = vadd.f32 %v2369_v39, %v2341_v8  ;;  %v2422_v58 = vpop.f32.mrf.mxu2  ;;  %v2342_v14 = vpop.f32.mrf.mxu1 }
 0x3e6   : > { %v9869_v47 = vadd.f32 %v2422_v58, %v2394_v43  ;;  %v2343_v5 = vadd.f32 %v2342_v14, %v9612_v38  ;;  %v2395_v28 = vpop.f32.mrf.mxu0  ;;  %3218 = vmatpush.bf16.msrb.mxu1 %v9734_v27 }
 0x3e7   : > { %v2396_v2 = vadd.f32 %v2395_v28, %v9618_v26 }
 0x3e8   : > { %3274 = vmatpush.bf16.msrb.mxu0 %v9676_v57 }
 0x3ea   : > { %3219 = vmatpush.bf16.msrb.mxu1 %v9757_v37 }
 0x3ec   : > { %v2371_v54 = vpop.f32.mrf.mxu3  ;;  %3275 = vmatpush.bf16.msrb.mxu0 %v9720_v20 }
 0x3ed   : > { %v9877_v60 = vadd.f32 %v2371_v54, %v2343_v5  ;;  %v2424_v0 = vpop.f32.mrf.mxu2  ;;  %v2574_v22 = vpop.f32.mrf.mxu1 }
 0x3ee   : > { %v9879_v43 = vadd.f32 %v2424_v0, %v2396_v2  ;;  %v2398_v36 = vpop.f32.mrf.mxu0  ;;  %3220 = vmatpush.bf16.msrb.mxu1 %v9787_v53 }
 0x3ef   : > { %v2399_v38 = vadd.f32 %v2398_v36, %v9647_v32 }
 0x3f0   : > { %3276 = vmatpush.bf16.msrb.mxu0 %v9746_v13  ;;  %3030 = vmatmul.bf16.vlgmr.msra.gmra.mxu1 %v9616_v49 }
 0x3f1   : > { %6352 = vmatmul.msk.bf16.vlgmr.msra.gmra.mxu3 %vm1729_vm6, %v9614_v23  ;;  %2838 = vmatmul.bf16.gmra.mxu0 %v9851_v21 }
 0x3f2   : > { %6250 = vmatmul.msk.bf16.gmra.mxu2 %vm1729_vm6, %v9849_v45  ;;  %3221 = vmatpush.bf16.msrb.mxu1 %v9813_v51 }
 0x3f4   : > { %v2603_v26 = vpop.f32.mrf.mxu3  ;;  %3277 = vmatpush.bf16.msrb.mxu0 %v9802_v52 }
 0x3f5   : > { %v2604_v57 = vadd.f32 %v2603_v26, %v2574_v22  ;;  %v2427_v20 = vpop.f32.mrf.mxu2  ;;  %v2576_v27 = vpop.f32.mrf.mxu1 }
 0x3f6   : > { %v9892_v32 = vadd.f32 %v2427_v20, %v2399_v38  ;;  %v2400_v37 = vpop.f32.mrf.mxu0 }
 0x3f7   : > { %v9895_v13 = vadd.f32 %v2604_v57, %v9310_v19  ;;  %v2401_v53 = vadd.f32 %v2400_v37, %v9696_v40 }
 0x3f8   : > { %3278 = vmatpush.bf16.msrb.mxu0 %v9834_v17 }
 0x3fc   : > { %v2605_v56 = vpop.f32.mrf.mxu3  ;;  %3279 = vmatpush.bf16.msrb.mxu0 %v6279_v30 }
 0x3fd   : > { %v2606_v9 = vadd.f32 %v2605_v56, %v2576_v27  ;;  %v2429_v51 = vpop.f32.mrf.mxu2  ;;  %v2579_v52 = vpop.f32.mrf.mxu1 }
 0x3fe   : > { %v9899_v63 = vadd.f32 %v2429_v51, %v2401_v53  ;;  %v2632_v11 = vpop.f32.mrf.mxu0 }
 0x3ff   : > { %v9902_v48 = vadd.f32 %v2606_v9, %v9352_v55 }
 0x400   : > { %3035 = vmatmul.bf16.gmra.mxu1 %v9693_v62 }
 0x401   : > { %6353 = vmatmul.msk.bf16.gmra.mxu3 %vm1729_vm6, %v9691_v3  ;;  %3088 = vmatmul.bf16.vlgmr.msra.gmra.mxu0 %v9616_v49 }
 0x402   : > { %6356 = vmatmul.msk.bf16.vlgmr.msra.gmra.mxu2 %vm1729_vm6, %v9614_v23 }
 0x404   : > { %v2608_v19 = vpop.f32.mrf.mxu3 }
 0x405   : > { %v2609_v40 = vadd.f32 %v2608_v19, %v2579_v52  ;;  %v2661_v17 = vpop.f32.mrf.mxu2  ;;  %v2581_v29 = vpop.f32.mrf.mxu1 }
 0x406   : > { %v2662_v30 = vadd.f32 %v2661_v17, %v2632_v11  ;;  %v2634_v55 = vpop.f32.mrf.mxu0 }
 0x407   : > { %v9911_v8 = vadd.f32 %v2609_v40, %v9383_v10 }
 0x408   : > { %v9914_v39 = vadd.f32 %v2662_v30, %v9391_v34 }
 0x40c   : > { %v2610_v58 = vpop.f32.mrf.mxu3 }
 0x40d   : > { %v2611_v14 = vadd.f32 %v2610_v58, %v2581_v29  ;;  %v2663_v5 = vpop.f32.mrf.mxu2  ;;  %v2584_v49 = vpop.f32.mrf.mxu1  ;;  %v6489_v29 = vld [vmem:[%s10949_s3 + $0x310] sm:$0xf]  ;;  %v7269_v58 = vld [vmem:[%s8778_s17 + $0x104] sm:$0xf] }
 0x40e   : > { %v2664_v28 = vadd.f32 %v2663_v5, %v2634_v55  ;;  %v2637_v23 = vpop.f32.mrf.mxu0  ;;  %v7291_v55 = vld [vmem:[%s10949_s3 + $0x314] sm:$0xf]  ;;  %v6374_v5 = vld [vmem:[%s8778_s17 + $0x108] sm:$0xf0] }
 0x40f   : > { %v9917_v2 = vadd.f32 %v2611_v14, %v9422_v25 }
 0x410   : > { %v9920_v54 = vadd.f32 %v2664_v28, %v9430_v6  ;;  %3040 = vmatmul.bf16.gmra.mxu1 %v9771_v42  ;;  %v6372_v28 = vld [vmem:[%s8778_s17 + $0x100] sm:$0xf] }
 0x411   : > { %6354 = vmatmul.msk.bf16.gmra.mxu3 %vm1729_vm6, %v9769_v16  ;;  %3093 = vmatmul.bf16.gmra.mxu0 %v9693_v62 }
 0x412   : > { %6357 = vmatmul.msk.bf16.gmra.mxu2 %vm1729_vm6, %v9691_v3 }
 0x414   : > { %v2613_v10 = vpop.f32.mrf.mxu3 }
 0x415   : > { %v2614_v34 = vadd.f32 %v2613_v10, %v2584_v49  ;;  %v2666_v0 = vpop.f32.mrf.mxu2  ;;  %v2586_v25 = vpop.f32.mrf.mxu1  ;;  %v7270_v49 = vld [vmem:[%s8778_s17 + $0x104] sm:$0xf0] }
 0x416   : > { %v2667_v22 = vadd.f32 %v2666_v0, %v2637_v23  ;;  %v2639_v6 = vpop.f32.mrf.mxu0 }
 0x417   : > { %v9929_v36 = vadd.f32 %v2614_v34, %v9469_v15  ;;  %v6430_v15 = vld [vmem:[%s10949_s3 + $0x340] sm:$0x11] }
 0x418   : > { %v9932_v38 = vadd.f32 %v2667_v22, %v9473_v41  ;;  %v3429_v41 = vunpack.c.l.b16 %v6430_v15  ;;  %v9985_v22 = vor.u32 %v7269_v58, %v6374_v5  ;;  %v7287_v58 = vld [vmem:[%s10949_s3 + $0x2f4] sm:$0xf]  ;;  %v7272_v5 = vld [vmem:[%s8778_s17 + $0x114] sm:$0xf0] }
 0x41a   : > { %v3451_v51 = vpack.c.b16 %v3429_v41, %v3429_v41 }
 0x41c   : > { %v2615_v26 = vpop.f32.mrf.mxu3  ;;  %v9953_v40 = vsel %vm1742_vm5, %v3451_v51, 0 }
 0x41d   : > { %v2616_v57 = vadd.f32 %v2615_v26, %v2586_v25  ;;  %v2668_v20 = vpop.f32.mrf.mxu2  ;;  %v2589_v62 = vpop.f32.mrf.mxu1  ;;  %3513 = vmatpush.bf16.msra.mxu3 %v9953_v40  ;;  %v9987_v25 = vor.u32 %v7270_v49, %v6372_v28 }
 0x41e   : > { %v2669_v27 = vadd.f32 %v2668_v20, %v2639_v6  ;;  %v2642_v3 = vpop.f32.mrf.mxu0 }
 0x41f   : > { %v9935_v37 = vadd.f32 %v2616_v57, %v9491_v33  ;;  %v3430_v33 = vunpack.c.h.b16 %v6430_v15  ;;  %v7289_v15 = vld [vmem:[%s10949_s3 + $0x304] sm:$0xf] }
 0x420   : > { %v9938_v53 = vadd.f32 %v2669_v27, %v9494_v18  ;;  %3045 = vmatmul.bf16.gmra.mxu1 %v9851_v21 }
 0x421   : > { %6355 = vmatmul.msk.bf16.gmra.mxu3 %vm1729_vm6, %v9849_v45  ;;  %3098 = vmatmul.bf16.gmra.mxu0 %v9771_v42  ;;  %v3452_v52 = vpack.c.b16 %v3430_v33, %v3430_v33 }
 0x422   : > { %6358 = vmatmul.msk.bf16.gmra.mxu2 %vm1729_vm6, %v9769_v16 }
 0x423   : > { %v9956_v17 = vsel %vm1742_vm5, %v3452_v52, 0 }
 0x424   : > { %v2618_v56 = vpop.f32.mrf.mxu3  ;;  %3571 = vmatpush.bf16.msra.mxu2 %v9956_v17 }
 0x425   : > { %v2619_v9 = vadd.f32 %v2618_v56, %v2589_v62  ;;  %v2671_v18 = vpop.f32.mrf.mxu2  ;;  %v2591_v19 = vpop.f32.mrf.mxu1  ;;  %v6481_v62 = vld [vmem:[%s10949_s3 + $0x300] sm:$0xf] }
 0x426   : > { %v2672_v11 = vadd.f32 %v2671_v18, %v2642_v3  ;;  %v2644_v16 = vpop.f32.mrf.mxu0  ;;  %v7290_v3 = vld [vmem:[%s10949_s3 + $0x304] sm:$0xf0] }
 0x427   : > { %v9950_v42 = vadd.f32 %v2619_v9, %v9507_v44  ;;  %v7292_v44 = vld [vmem:[%s10949_s3 + $0x314] sm:$0xf0] }
 0x428   : > { %v9959_v30 = vadd.f32 %v2672_v11, %v9509_v4  ;;  %v9973_v14 = vor.u32 %v7292_v44, %v6489_v29  ;;  %v6491_v4 = vld [vmem:[%s10949_s3 + $0x318] sm:$0xf0]  ;;  %v6473_v29 = vld [vmem:[%s10949_s3 + $0x2f0] sm:$0xf]  ;;  %v7288_v44 = vld [vmem:[%s10949_s3 + $0x2f4] sm:$0xf0] }
 0x429   : > { %v9981_v23 = vor.u32 %v7291_v55, %v6491_v4  ;;  %v10037_v55 = vor.u32 %v7288_v44, %v6473_v29  ;;  %v6475_v4 = vld [vmem:[%s10949_s3 + $0x2f8] sm:$0xf0] }
 0x42a   : > { %3479 = vmatpush.bf16.msra.mxu1 %v9973_v14  ;;  %v10051_v49 = vor.u32 %v7287_v58, %v6475_v4  ;;  %v7284_v58 = vld [vmem:[%s10949_s3 + $0x2d4] sm:$0xf0] }
 0x42b   : > { %3537 = vmatpush.bf16.msra.mxu0 %v9981_v23 }
 0x42c   : > { %v2620_v10 = vpop.f32.mrf.mxu3 }
 0x42d   : > { %v2621_v34 = vadd.f32 %v2620_v10, %v2591_v19  ;;  %v2673_v0 = vpop.f32.mrf.mxu2  ;;  %v2766_v26 = vpop.f32.mrf.mxu1  ;;  %v6382_v19 = vld [vmem:[%s8778_s17 + $0x118] sm:$0xf0]  ;;  %v7295_v10 = vld [vmem:[%s10949_s3 + $0x334] sm:$0xf] }
 0x42e   : > { %v2674_v6 = vadd.f32 %v2673_v0, %v2644_v16  ;;  %v2647_v20 = vpop.f32.mrf.mxu0  ;;  %v6380_v16 = vld [vmem:[%s8778_s17 + $0x110] sm:$0xf] }
 0x42f   : > { %v9990_v57 = vadd.f32 %v2621_v34, %v9517_v46  ;;  %v10007_v46 = vor.u32 %v7290_v3, %v6481_v62  ;;  %v6507_v34 = vld [vmem:[%s10949_s3 + $0x338] sm:$0xf0]  ;;  %v10066_v3 = vor.u32 %v7272_v5, %v6380_v16 }
 0x430   : > { %v9993_v27 = vadd.f32 %v2674_v6, %v9519_v24  ;;  %3222 = vmatmul.bf16.vlgmr.msrb.gmra.mxu1 %v9987_v25  ;;  %v6483_v24 = vld [vmem:[%s10949_s3 + $0x308] sm:$0xf0]  ;;  %v10060_v0 = vor.u32 %v7295_v10, %v6507_v34 }
 0x431   : > { %6402 = vmatmul.msk.bf16.vlgmr.msrb.gmra.mxu3 %vm1729_vm6, %v9985_v22  ;;  %3103 = vmatmul.bf16.gmra.mxu0 %v9851_v21  ;;  %v10015_v41 = vor.u32 %v7289_v15, %v6483_v24  ;;  %v11004_v34 = vld [vmem:[#allocation23_spill] sm:$0xff] }
 0x432   : > { %6359 = vmatmul.msk.bf16.gmra.mxu2 %vm1729_vm6, %v9849_v45  ;;  %3480 = vmatpush.bf16.msra.mxu1 %v10007_v46  ;;  %v7271_v45 = vld [vmem:[%s8778_s17 + $0x114] sm:$0xf] }
 0x433   : > { %3538 = vmatpush.bf16.msra.mxu0 %v10015_v41  ;;  %v10064_v62 = vor.u32 %v7271_v45, %v6382_v19  ;;  %3572 = vmatpush.bf16.msra.mxu2 %v10060_v0  ;;  %v7286_v45 = vld [vmem:[%s10949_s3 + $0x2e4] sm:$0xf0]  ;;  %v6467_v19 = vld [vmem:[%s10949_s3 + $0x2e8] sm:$0xf0] }
 0x434   : > { %v2795_v33 = vpop.f32.mrf.mxu3 }
 0x435   : > { %v2796_v56 = vadd.f32 %v2795_v33, %v2766_v26  ;;  %v2676_v9 = vpop.f32.mrf.mxu2  ;;  %v2768_v51 = vpop.f32.mrf.mxu1 }
 0x436   : > { %v2677_v18 = vadd.f32 %v2676_v9, %v2647_v20  ;;  %v2649_v11 = vpop.f32.mrf.mxu0  ;;  %3481 = vmatpush.bf16.msra.mxu1 %v10037_v55  ;;  %v11002_v9 = vld [vmem:[#allocation22_spill] sm:$0xff] }
 0x437   : > { %v10020_v52 = vadd.f32 %v2796_v56, %v9645_v12  ;;  %v6505_v12 = vld [vmem:[%s10949_s3 + $0x330] sm:$0xf]  ;;  %3539 = vmatpush.bf16.msra.mxu0 %v10051_v49 }
 0x438   : > { %v10023_v21 = vadd.f32 %v2677_v18, %v9534_v1  ;;  %v7296_v1 = vld [vmem:[%s10949_s3 + $0x334] sm:$0xf0] }
 0x439   : > { %v10049_v28 = vor.u32 %v7296_v1, %v6505_v12  ;;  %v6457_v1 = vld [vmem:[%s10949_s3 + $0x2d0] sm:$0xf] }
 0x43a   : > { %v10105_v10 = vor.u32 %v7284_v58, %v6457_v1  ;;  %v6497_v1 = vld [vmem:[%s10949_s3 + $0x320] sm:$0xf]  ;;  %v7294_v58 = vld [vmem:[%s10949_s3 + $0x324] sm:$0xf0] }
 0x43b   : > { %3514 = vmatpush.bf16.msra.mxu3 %v10049_v28 }
 0x43c   : > { %v2797_v6 = vpop.f32.mrf.mxu3 }
 0x43d   : > { %v2798_v26 = vadd.f32 %v2797_v6, %v2768_v51  ;;  %v2678_v20 = vpop.f32.mrf.mxu2  ;;  %v2771_v24 = vpop.f32.mrf.mxu1  ;;  %v6465_v51 = vld [vmem:[%s10949_s3 + $0x2e0] sm:$0xf] }
 0x43e   : > { %v2679_v15 = vadd.f32 %v2678_v20, %v2649_v11  ;;  %v2824_v56 = vpop.f32.mrf.mxu0  ;;  %v7285_v11 = vld [vmem:[%s10949_s3 + $0x2e4] sm:$0xf]  ;;  %v11006_v20 = vld [vmem:[#allocation24_spill] sm:$0xff] }
 0x43f   : > { %v10070_v33 = vadd.f32 %v2798_v26, %v9689_v31  ;;  %v10087_v31 = vor.u32 %v7286_v45, %v6465_v51  ;;  %v10095_v16 = vor.u32 %v7285_v11, %v6467_v19  ;;  %v6449_v45 = vld [vmem:[%s10949_s3 + $0x2c0] sm:$0xf]  ;;  %v7282_v11 = vld [vmem:[%s10949_s3 + $0x2c4] sm:$0xf0]  ;;  %v6390_v19 = vld [vmem:[%s8778_s17 + $0x128] sm:$0xf0] }
 0x440   : > { %v10073_v18 = vadd.f32 %v2679_v15, %v11002_v9  ;;  %3227 = vmatmul.bf16.gmra.mxu1 %v10066_v3  ;;  %v7273_v9 = vld [vmem:[%s8778_s17 + $0x124] sm:$0xf] }
 0x441   : > { %11001 = vst [vmem:[#allocation27_spill] sm:$0xff] %v10070_v33  ;;  %6403 = vmatmul.msk.bf16.gmra.mxu3 %vm1729_vm6, %v10064_v62  ;;  %3280 = vmatmul.bf16.vlgmr.msrb.gmra.mxu0 %v9987_v25 }
 0x442   : > { %11003 = vst [vmem:[#allocation22_spill] sm:$0xff] %v10073_v18  ;;  %6406 = vmatmul.msk.bf16.vlgmr.msrb.gmra.mxu2 %vm1729_vm6, %v9985_v22  ;;  %3482 = vmatpush.bf16.msra.mxu1 %v10087_v31 }
 0x443   : > { %3540 = vmatpush.bf16.msra.mxu0 %v10095_v16 }
 0x444   : > { %v2800_v29 = vpop.f32.mrf.mxu3 }
 0x445   : > { %v2801_v44 = vadd.f32 %v2800_v29, %v2771_v24  ;;  %v2853_v12 = vpop.f32.mrf.mxu2  ;;  %v2773_v5 = vpop.f32.mrf.mxu1  ;;  %v7283_v24 = vld [vmem:[%s10949_s3 + $0x2d4] sm:$0xf]  ;;  %v6388_v29 = vld [vmem:[%s8778_s17 + $0x120] sm:$0xf] }
 0x446   : > { %v2854_v4 = vadd.f32 %v2853_v12, %v2824_v56  ;;  %v2826_v26 = vpop.f32.mrf.mxu0  ;;  %3483 = vmatpush.bf16.msra.mxu1 %v10105_v10  ;;  %v6459_v56 = vld [vmem:[%s10949_s3 + $0x2d8] sm:$0xf0]  ;;  %v10132_v12 = vor.u32 %v7282_v11, %v6449_v45  ;;  %v6441_v11 = vld [vmem:[%s10949_s3 + $0x2b0] sm:$0xf] }
 0x447   : > { %v10108_v6 = vadd.f32 %v2801_v44, %v11004_v34  ;;  %v10121_v51 = vor.u32 %v7283_v24, %v6459_v56  ;;  %v7274_v44 = vld [vmem:[%s8778_s17 + $0x124] sm:$0xf0]  ;;  %v6498_v34 = vor.u32 %v7294_v58, %v6497_v1  ;;  %v10142_v56 = vor.u32 %v7273_v9, %v6390_v19 }
 0x448   : > { %v10111_v15 = vadd.f32 %v2854_v4, %v11006_v20  ;;  %v10144_v45 = vor.u32 %v7274_v44, %v6388_v29  ;;  %v7293_v29 = vld [vmem:[%s10949_s3 + $0x324] sm:$0xf] }
 0x449   : > { %11005 = vst [vmem:[#allocation23_spill] sm:$0xff] %v10108_v6  ;;  %3541 = vmatpush.bf16.msra.mxu0 %v10121_v51  ;;  %3515 = vmatpush.bf16.msra.mxu3 %v6498_v34 }
 0x44a   : > { %11007 = vst [vmem:[#allocation24_spill] sm:$0xff] %v10111_v15  ;;  %3484 = vmatpush.bf16.msra.mxu1 %v10132_v12  ;;  %v7280_v15 = vld [vmem:[%s10949_s3 + $0x2b4] sm:$0xf0] }
 0x44b   : > { %v10152_v33 = vor.u32 %v7280_v15, %v6441_v11  ;;  %v7278_v15 = vld [vmem:[%s10949_s3 + $0x2a4] sm:$0xf0] }
 0x44c   : > { %v2802_v4 = vpop.f32.mrf.mxu3 }
 0x44d   : > { %v2803_v20 = vadd.f32 %v2802_v4, %v2773_v5  ;;  %v2855_v24 = vpop.f32.mrf.mxu2  ;;  %v2776_v18 = vpop.f32.mrf.mxu1  ;;  %3705 = vmatpush.bf16.msrb.mxu3 %v9953_v40  ;;  %v6451_v40 = vld [vmem:[%s10949_s3 + $0x2c8] sm:$0xf0] }
 0x44e   : > { %v2856_v6 = vadd.f32 %v2855_v24, %v2826_v26  ;;  %v2829_v9 = vpop.f32.mrf.mxu0  ;;  %v6499_v26 = vld [vmem:[%s10949_s3 + $0x328] sm:$0xf0]  ;;  %3485 = vmatpush.bf16.msra.mxu1 %v10152_v33 }
 0x44f   : > { %v10155_v5 = vadd.f32 %v2803_v20, %v9767_v35  ;;  %v7281_v35 = vld [vmem:[%s10949_s3 + $0x2c4] sm:$0xf] }
 0x450   : > { %v10159_v19 = vadd.f32 %v2856_v6, %v9779_v61  ;;  %3232 = vmatmul.bf16.gmra.mxu1 %v10144_v45  ;;  %v6502_v61 = vor.u32 %v7293_v29, %v6499_v26  ;;  %v6433_v6 = vld [vmem:[%s10949_s3 + $0x2a0] sm:$0xf]  ;;  %v10186_v44 = vor.u32 %v7281_v35, %v6451_v40  ;;  %v11008_v29 = vld [vmem:[#allocation25_spill] sm:$0xff] }
 0x451   : > { %6404 = vmatmul.msk.bf16.gmra.mxu3 %vm1729_vm6, %v10142_v56  ;;  %3285 = vmatmul.bf16.gmra.mxu0 %v10066_v3  ;;  %v10188_v1 = vor.u32 %v7278_v15, %v6433_v6  ;;  %v11009_v35 = vld [vmem:[#allocation26_spill] sm:$0xff]  ;;  %v7275_v6 = vld [vmem:[%s8778_s17 + $0x134] sm:$0xf]  ;;  %v7276_v15 = vld [vmem:[%s8778_s17 + $0x134] sm:$0xf0] }
 0x452   : > { %6407 = vmatmul.msk.bf16.gmra.mxu2 %vm1729_vm6, %v10064_v62  ;;  %3706 = vmatpush.bf16.msrb.mxu3 %v10049_v28 }
 0x453   : > { %3573 = vmatpush.bf16.msra.mxu2 %v6502_v61  ;;  %3542 = vmatpush.bf16.msra.mxu0 %v10186_v44 }
 0x454   : > { %v2805_v58 = vpop.f32.mrf.mxu3  ;;  %3486 = vmatpush.bf16.msra.mxu1 %v10188_v1 }
 0x455   : > { %v2806_v4 = vadd.f32 %v2805_v58, %v2776_v18  ;;  %v2858_v20 = vpop.f32.mrf.mxu2  ;;  %v2778_v11 = vpop.f32.mrf.mxu1  ;;  %v7279_v18 = vld [vmem:[%s10949_s3 + $0x2b4] sm:$0xf] }
 0x456   : > { %v2859_v24 = vadd.f32 %v2858_v20, %v2829_v9  ;;  %v2831_v28 = vpop.f32.mrf.mxu0  ;;  %3707 = vmatpush.bf16.msrb.mxu3 %v6498_v34  ;;  %v6396_v34 = vld [vmem:[%s8778_s17 + $0x130] sm:$0xf]  ;;  %v7277_v20 = vld [vmem:[%s10949_s3 + $0x2a4] sm:$0xf] }
 0x457   : > { %3763 = vmatpush.bf16.msrb.mxu2 %v9956_v17  ;;  %v10196_v26 = vadd.f32 %v2806_v4, %v11008_v29  ;;  %v6443_v17 = vld [vmem:[%s10949_s3 + $0x2b8] sm:$0xf0] }
 0x458   : > { %3671 = vmatpush.bf16.msrb.mxu1 %v9973_v14  ;;  %v10199_v40 = vadd.f32 %v2859_v24, %v11009_v35  ;;  %v6398_v14 = vld [vmem:[%s8778_s17 + $0x138] sm:$0xf0]  ;;  %v10209_v9 = vor.u32 %v7279_v18, %v6443_v17  ;;  %v6435_v24 = vld [vmem:[%s10949_s3 + $0x2a8] sm:$0xf0] }
 0x459   : > { %v10216_v4 = vor.u32 %v7275_v6, %v6398_v14 }
 0x45a   : > { %11010 = vst [vmem:[#allocation25_spill] sm:$0xff] %v10199_v40  ;;  %3543 = vmatpush.bf16.msra.mxu0 %v10209_v9 }
 0x45b   : > { %3764 = vmatpush.bf16.msrb.mxu2 %v10060_v0  ;;  %v6438_v0 = vor.u32 %v7277_v20, %v6435_v24 }
 0x45c   : > { %3672 = vmatpush.bf16.msrb.mxu1 %v10007_v46  ;;  %v2807_v58 = vpop.f32.mrf.mxu3  ;;  %v10224_v46 = vor.u32 %v7276_v15, %v6396_v34 }
 0x45d   : > { %v2808_v29 = vadd.f32 %v2807_v58, %v2778_v11  ;;  %v2860_v35 = vpop.f32.mrf.mxu2  ;;  %v2781_v17 = vpop.f32.mrf.mxu1 }
 0x45e   : > { %v2861_v18 = vadd.f32 %v2860_v35, %v2831_v28  ;;  %v2834_v14 = vpop.f32.mrf.mxu0  ;;  %3544 = vmatpush.bf16.msra.mxu0 %v6438_v0 }
 0x45f   : > { %3765 = vmatpush.bf16.msrb.mxu2 %v6502_v61  ;;  %v10228_v6 = vadd.f32 %v2808_v29, %v9847_v7 }
 0x460   : > { %3673 = vmatpush.bf16.msrb.mxu1 %v10037_v55  ;;  %v10231_v40 = vadd.f32 %v2861_v18, %v9854_v59 }
 0x461   : > { %6405 = vmatmul.msk.bf16.gmra.mxu3 %vm1729_vm6, %v10216_v4  ;;  %3237 = vmatmul.bf16.gmra.mxu1 %v10224_v46 }
 0x462   : > { %3729 = vmatpush.bf16.msrb.mxu0 %v9981_v23  ;;  %6408 = vmatmul.msk.bf16.gmra.mxu2 %vm1729_vm6, %v10142_v56 }
 0x463   : > { %3290 = vmatmul.bf16.gmra.mxu0 %v10144_v45 }
 0x464   : > { %3674 = vmatpush.bf16.msrb.mxu1 %v10087_v31  ;;  %v2810_v7 = vpop.f32.mrf.mxu3 }
 0x465   : > { %v2811_v55 = vadd.f32 %v2810_v7, %v2781_v17  ;;  %v2863_v59 = vpop.f32.mrf.mxu2  ;;  %v2783_v11 = vpop.f32.mrf.mxu1 }
 0x466   : > { %3730 = vmatpush.bf16.msrb.mxu0 %v10015_v41  ;;  %v2864_v61 = vadd.f32 %v2863_v59, %v2834_v14  ;;  %v2836_v28 = vpop.f32.mrf.mxu0 }
 0x467   : > { %v10243_v23 = vadd.f32 %v2811_v55, %v9867_v50 }
 0x468   : > { %3675 = vmatpush.bf16.msrb.mxu1 %v10105_v10  ;;  %v10247_v34 = vadd.f32 %v2864_v61, %v9869_v47 }
 0x46a   : > { %3731 = vmatpush.bf16.msrb.mxu0 %v10051_v49 }
 0x46c   : > { %3676 = vmatpush.bf16.msrb.mxu1 %v10132_v12  ;;  %v2812_v31 = vpop.f32.mrf.mxu3 }
 0x46d   : > { %v2813_v41 = vadd.f32 %v2812_v31, %v2783_v11  ;;  %v2865_v15 = vpop.f32.mrf.mxu2  ;;  %v3031_v20 = vpop.f32.mrf.mxu1 }
 0x46e   : > { %3732 = vmatpush.bf16.msrb.mxu0 %v10095_v16  ;;  %v2866_v58 = vadd.f32 %v2865_v15, %v2836_v28  ;;  %v2839_v24 = vpop.f32.mrf.mxu0 }
 0x46f   : > { %v10253_v50 = vadd.f32 %v2813_v41, %v9877_v60 }
 0x470   : > { %3677 = vmatpush.bf16.msrb.mxu1 %v10152_v33  ;;  %v10257_v47 = vadd.f32 %v2866_v58, %v9879_v43 }
 0x471   : > { %6511 = vmatmul.msk.bf16.vlgmr.msra.gmra.mxu3 %vm1729_vm6, %v9985_v22  ;;  %3487 = vmatmul.bf16.vlgmr.msra.gmra.mxu1 %v9987_v25 }
 0x472   : > { %3733 = vmatpush.bf16.msrb.mxu0 %v10121_v51  ;;  %6409 = vmatmul.msk.bf16.gmra.mxu2 %vm1729_vm6, %v10216_v4 }
 0x473   : > { %3295 = vmatmul.bf16.gmra.mxu0 %v10224_v46 }
 0x474   : > { %3678 = vmatpush.bf16.msrb.mxu1 %v10188_v1  ;;  %v3060_v60 = vpop.f32.mrf.mxu3 }
 0x475   : > { %v3061_v49 = vadd.f32 %v3060_v60, %v3031_v20  ;;  %v2868_v43 = vpop.f32.mrf.mxu2  ;;  %v3033_v16 = vpop.f32.mrf.mxu1 }
 0x476   : > { %3734 = vmatpush.bf16.msrb.mxu0 %v10186_v44  ;;  %v2869_v33 = vadd.f32 %v2868_v43, %v2839_v24  ;;  %v2841_v51 = vpop.f32.mrf.mxu0 }
 0x477   : > { %v10269_v10 = vadd.f32 %v3061_v49, %v9895_v13 }
 0x478   : > { %v10272_v12 = vadd.f32 %v2869_v33, %v9892_v32 }
 0x47a   : > { %3735 = vmatpush.bf16.msrb.mxu0 %v10209_v9 }
 0x47c   : > { %v3062_v29 = vpop.f32.mrf.mxu3 }
 0x47d   : > { %v3063_v35 = vadd.f32 %v3062_v29, %v3033_v16  ;;  %v2870_v1 = vpop.f32.mrf.mxu2  ;;  %v3036_v17 = vpop.f32.mrf.mxu1 }
 0x47e   : > { %3736 = vmatpush.bf16.msrb.mxu0 %v6438_v0  ;;  %v2871_v18 = vadd.f32 %v2870_v1, %v2841_v51  ;;  %v3089_v14 = vpop.f32.mrf.mxu0 }
 0x47f   : > { %v10276_v44 = vadd.f32 %v3063_v35, %v9902_v48 }
 0x480   : > { %v10279_v7 = vadd.f32 %v2871_v18, %v9899_v63 }
 0x481   : > { %6512 = vmatmul.msk.bf16.gmra.mxu3 %vm1729_vm6, %v10064_v62  ;;  %3492 = vmatmul.bf16.gmra.mxu1 %v10066_v3 }
 0x482   : > { %6515 = vmatmul.msk.bf16.vlgmr.msra.gmra.mxu2 %vm1729_vm6, %v9985_v22 }
 0x483   : > { %3545 = vmatmul.bf16.vlgmr.msra.gmra.mxu0 %v9987_v25 }
 0x484   : > { %v3065_v32 = vpop.f32.mrf.mxu3 }
 0x485   : > { %v3066_v13 = vadd.f32 %v3065_v32, %v3036_v17  ;;  %v3118_v9 = vpop.f32.mrf.mxu2  ;;  %v3038_v48 = vpop.f32.mrf.mxu1  ;;  %v6533_v32 = vld [vmem:[%s8778_s17 + $0x148] sm:$0xf0] }
 0x486   : > { %v3119_v0 = vadd.f32 %v3118_v9, %v3089_v14  ;;  %v3091_v63 = vpop.f32.mrf.mxu0  ;;  %v7298_v14 = vld [vmem:[%s8778_s17 + $0x144] sm:$0xf]  ;;  %v7299_v9 = vld [vmem:[%s8778_s17 + $0x144] sm:$0xf0] }
 0x487   : > { %v10288_v55 = vadd.f32 %v3066_v13, %v9911_v8  ;;  %v6531_v13 = vld [vmem:[%s8778_s17 + $0x140] sm:$0xf] }
 0x488   : > { %v10291_v59 = vadd.f32 %v3119_v0, %v9914_v39 }
 0x48c   : > { %v3067_v61 = vpop.f32.mrf.mxu3 }
 0x48d   : > { %v3068_v11 = vadd.f32 %v3067_v61, %v3038_v48  ;;  %v3120_v28 = vpop.f32.mrf.mxu2  ;;  %v3041_v25 = vpop.f32.mrf.mxu1 }
 0x48e   : > { %v3121_v31 = vadd.f32 %v3120_v28, %v3091_v63  ;;  %v3094_v22 = vpop.f32.mrf.mxu0  ;;  %v6532_v63 = vor.u32 %v7299_v9, %v6531_v13  ;;  %v11013_v13 = vld [vmem:[#allocation23_spill] sm:$0xff] }
 0x48f   : > { %v10294_v41 = vadd.f32 %v3068_v11, %v9917_v2 }
 0x490   : > { %v10297_v15 = vadd.f32 %v3121_v31, %v9920_v54 }
 0x491   : > { %6513 = vmatmul.msk.bf16.gmra.mxu3 %vm1729_vm6, %v10142_v56  ;;  %3497 = vmatmul.bf16.gmra.mxu1 %v10144_v45 }
 0x492   : > { %6516 = vmatmul.msk.bf16.gmra.mxu2 %vm1729_vm6, %v10064_v62 }
 0x493   : > { %3550 = vmatmul.bf16.gmra.mxu0 %v10066_v3 }
 0x494   : > { %v3070_v8 = vpop.f32.mrf.mxu3 }
 0x495   : > { %v3071_v39 = vadd.f32 %v3070_v8, %v3041_v25  ;;  %v3123_v58 = vpop.f32.mrf.mxu2  ;;  %v3043_v2 = vpop.f32.mrf.mxu1 }
 0x496   : > { %v3124_v20 = vadd.f32 %v3123_v58, %v3094_v22  ;;  %v3096_v54 = vpop.f32.mrf.mxu0 }
 0x497   : > { %v10306_v24 = vadd.f32 %v3071_v39, %v9929_v36 }
 0x498   : > { %v10309_v60 = vadd.f32 %v3124_v20, %v9932_v38  ;;  %v7300_v20 = vld [vmem:[%s8778_s17 + $0x154] sm:$0xf] }
 0x49c   : > { %v3072_v49 = vpop.f32.mrf.mxu3 }
 0x49d   : > { %v3073_v43 = vadd.f32 %v3072_v49, %v3043_v2  ;;  %v3125_v33 = vpop.f32.mrf.mxu2  ;;  %v3046_v3 = vpop.f32.mrf.mxu1  ;;  %v6541_v2 = vld [vmem:[%s8778_s17 + $0x158] sm:$0xf0]  ;;  %v7301_v49 = vld [vmem:[%s8778_s17 + $0x154] sm:$0xf0] }
 0x49e   : > { %v3126_v16 = vadd.f32 %v3125_v33, %v3096_v54  ;;  %v3099_v51 = vpop.f32.mrf.mxu0  ;;  %v6539_v54 = vld [vmem:[%s8778_s17 + $0x150] sm:$0xf] }
 0x49f   : > { %v10312_v62 = vadd.f32 %v3073_v43, %v9935_v37 }
 0x4a0   : > { %v10315_v29 = vadd.f32 %v3126_v16, %v9938_v53  ;;  %v6540_v16 = vor.u32 %v7301_v49, %v6539_v54 }
 0x4a1   : > { %6514 = vmatmul.msk.bf16.gmra.mxu3 %vm1729_vm6, %v10216_v4  ;;  %3502 = vmatmul.bf16.gmra.mxu1 %v10224_v46 }
 0x4a2   : > { %6517 = vmatmul.msk.bf16.gmra.mxu2 %vm1729_vm6, %v10142_v56  ;;  %v6536_v56 = vor.u32 %v7298_v14, %v6533_v32 }
 0x4a3   : > { %3555 = vmatmul.bf16.gmra.mxu0 %v10144_v45 }
 0x4a4   : > { %v3075_v36 = vpop.f32.mrf.mxu3 }
 0x4a5   : > { %v3076_v38 = vadd.f32 %v3075_v36, %v3046_v3  ;;  %v3128_v37 = vpop.f32.mrf.mxu2  ;;  %v3048_v1 = vpop.f32.mrf.mxu1  ;;  %v11011_v36 = vld [vmem:[#allocation27_spill] sm:$0xff] }
 0x4a6   : > { %v3129_v35 = vadd.f32 %v3128_v37, %v3099_v51  ;;  %v3101_v53 = vpop.f32.mrf.mxu0  ;;  %v11012_v37 = vld [vmem:[#allocation22_spill] sm:$0xff] }
 0x4a7   : > { %v10324_v18 = vadd.f32 %v3076_v38, %v9950_v42 }
 0x4a8   : > { %v10327_v17 = vadd.f32 %v3129_v35, %v9959_v30 }
 0x4ac   : > { %v3077_v45 = vpop.f32.mrf.mxu3 }
 0x4ad   : > { %v3078_v0 = vadd.f32 %v3077_v45, %v3048_v1  ;;  %v3130_v48 = vpop.f32.mrf.mxu2  ;;  %v3223_v11 = vpop.f32.mrf.mxu1 }
 0x4ae   : > { %v3131_v61 = vadd.f32 %v3130_v48, %v3101_v53  ;;  %v3104_v42 = vpop.f32.mrf.mxu0 }
 0x4af   : > { %v10334_v28 = vadd.f32 %v3078_v0, %v9990_v57  ;;  %v11014_v0 = vld [vmem:[#allocation24_spill] sm:$0xff] }
 0x4b0   : > { %v10337_v30 = vadd.f32 %v3131_v61, %v9993_v27  ;;  %v7302_v61 = vld [vmem:[%s8778_s17 + $0x164] sm:$0xf] }
 0x4b1   : > { %6561 = vmatmul.msk.bf16.vlgmr.msrb.gmra.mxu3 %vm1729_vm6, %v6536_v56  ;;  %3679 = vmatmul.bf16.vlgmr.msrb.gmra.mxu1 %v6532_v63 }
 0x4b2   : > { %6518 = vmatmul.msk.bf16.gmra.mxu2 %vm1729_vm6, %v10216_v4  ;;  %v6544_v4 = vor.u32 %v7300_v20, %v6541_v2 }
 0x4b3   : > { %3560 = vmatmul.bf16.gmra.mxu0 %v10224_v46 }
 0x4b4   : > { %v3252_v31 = vpop.f32.mrf.mxu3 }
 0x4b5   : > { %v3253_v25 = vadd.f32 %v3252_v31, %v3223_v11  ;;  %v3133_v22 = vpop.f32.mrf.mxu2  ;;  %v3225_v8 = vpop.f32.mrf.mxu1  ;;  %v6549_v11 = vld [vmem:[%s8778_s17 + $0x168] sm:$0xf0]  ;;  %v7303_v31 = vld [vmem:[%s8778_s17 + $0x164] sm:$0xf0] }
 0x4b6   : > { %v3134_v57 = vadd.f32 %v3133_v22, %v3104_v42  ;;  %v3106_v58 = vpop.f32.mrf.mxu0  ;;  %v6547_v42 = vld [vmem:[%s8778_s17 + $0x160] sm:$0xf] }
 0x4b7   : > { %v10344_v39 = vadd.f32 %v3253_v25, %v10020_v52 }
 0x4b8   : > { %v10347_v27 = vadd.f32 %v3134_v57, %v10023_v21  ;;  %v6548_v57 = vor.u32 %v7303_v31, %v6547_v42 }
 0x4bc   : > { %v3254_v46 = vpop.f32.mrf.mxu3 }
 0x4bd   : > { %v3255_v43 = vadd.f32 %v3254_v46, %v3225_v8  ;;  %v3135_v33 = vpop.f32.mrf.mxu2  ;;  %v3228_v51 = vpop.f32.mrf.mxu1 }
 0x4be   : > { %v3136_v3 = vadd.f32 %v3135_v33, %v3106_v58  ;;  %v3281_v52 = vpop.f32.mrf.mxu0 }
 0x4bf   : > { %v10354_v38 = vadd.f32 %v3255_v43, %v11011_v36  ;;  %v11015_v36 = vld [vmem:[#allocation25_spill] sm:$0xff] }
 0x4c0   : > { %v10357_v21 = vadd.f32 %v3136_v3, %v11012_v37  ;;  %v6557_v37 = vld [vmem:[%s8778_s17 + $0x178] sm:$0xf0] }
 0x4c1   : > { %6562 = vmatmul.msk.bf16.gmra.mxu3 %vm1729_vm6, %v6544_v4  ;;  %3684 = vmatmul.bf16.gmra.mxu1 %v6540_v16 }
 0x4c2   : > { %6565 = vmatmul.msk.bf16.vlgmr.msrb.gmra.mxu2 %vm1729_vm6, %v6536_v56  ;;  %v6552_v56 = vor.u32 %v7302_v61, %v6549_v11 }
 0x4c3   : > { %3737 = vmatmul.bf16.vlgmr.msrb.gmra.mxu0 %v6532_v63 }
 0x4c4   : > { %v3257_v35 = vpop.f32.mrf.mxu3 }
 0x4c5   : > { %v3258_v1 = vadd.f32 %v3257_v35, %v3228_v51  ;;  %v3310_v53 = vpop.f32.mrf.mxu2  ;;  %v3230_v32 = vpop.f32.mrf.mxu1  ;;  %v6555_v35 = vld [vmem:[%s8778_s17 + $0x170] sm:$0xf] }
 0x4c6   : > { %v3311_v14 = vadd.f32 %v3310_v53, %v3281_v52  ;;  %v3283_v45 = vpop.f32.mrf.mxu0 }
 0x4c7   : > { %v10362_v9 = vadd.f32 %v3258_v1, %v11013_v13  ;;  %v7305_v1 = vld [vmem:[%s8778_s17 + $0x174] sm:$0xf0] }
 0x4c8   : > { %v10365_v48 = vadd.f32 %v3311_v14, %v11014_v0 }
 0x4cc   : > { %v3259_v25 = vpop.f32.mrf.mxu3 }
 0x4cd   : > { %v3260_v63 = vadd.f32 %v3259_v25, %v3230_v32  ;;  %v3312_v22 = vpop.f32.mrf.mxu2  ;;  %v3233_v58 = vpop.f32.mrf.mxu1  ;;  %v6556_v32 = vor.u32 %v7305_v1, %v6555_v35 }
 0x4ce   : > { %v3313_v8 = vadd.f32 %v3312_v22, %v3283_v45  ;;  %v3286_v2 = vpop.f32.mrf.mxu0 }
 0x4cf   : > { %v10372_v20 = vadd.f32 %v3260_v63, %v10155_v5 }
 0x4d0   : > { %v10375_v54 = vadd.f32 %v3313_v8, %v10159_v19  ;;  %v7304_v19 = vld [vmem:[%s8778_s17 + $0x174] sm:$0xf] }
 0x4d1   : > { %6563 = vmatmul.msk.bf16.gmra.mxu3 %vm1729_vm6, %v6552_v56  ;;  %3689 = vmatmul.bf16.gmra.mxu1 %v6548_v57 }
 0x4d2   : > { %6566 = vmatmul.msk.bf16.gmra.mxu2 %vm1729_vm6, %v6544_v4  ;;  %v6560_v4 = vor.u32 %v7304_v19, %v6557_v37 }
 0x4d3   : > { %3742 = vmatmul.bf16.gmra.mxu0 %v6540_v16 }
 0x4d4   : > { %v3262_v49 = vpop.f32.mrf.mxu3 }
 0x4d5   : > { %v3263_v46 = vadd.f32 %v3262_v49, %v3233_v58  ;;  %v3315_v43 = vpop.f32.mrf.mxu2  ;;  %v3235_v3 = vpop.f32.mrf.mxu1 }
 0x4d6   : > { %v3316_v33 = vadd.f32 %v3315_v43, %v3286_v2  ;;  %v3288_v51 = vpop.f32.mrf.mxu0 }
 0x4d7   : > { %v10380_v5 = vadd.f32 %v3263_v46, %v10196_v26 }
 0x4d8   : > { %v10383_v52 = vadd.f32 %v3316_v33, %v11015_v36 }
 0x4dc   : > { %v3264_v53 = vpop.f32.mrf.mxu3 }
 0x4dd   : > { %v3265_v16 = vadd.f32 %v3264_v53, %v3235_v3  ;;  %v3317_v14 = vpop.f32.mrf.mxu2 }
 0x4de   : > { %v3318_v13 = vadd.f32 %v3317_v14, %v3288_v51  ;;  %v3238_v45 = vpop.f32.mrf.mxu1 }
 0x4df   : > { %v10390_v0 = vadd.f32 %v3265_v16, %v10228_v6 }
 0x4e0   : > { %v3291_v26 = vpop.f32.mrf.mxu0  ;;  %v10393_v61 = vadd.f32 %v3318_v13, %v10231_v40 }
 0x4e1   : > { %6564 = vmatmul.msk.bf16.gmra.mxu3 %vm1729_vm6, %v6560_v4  ;;  %3694 = vmatmul.bf16.gmra.mxu1 %v6556_v32 }
 0x4e2   : > { %6567 = vmatmul.msk.bf16.gmra.mxu2 %vm1729_vm6, %v6552_v56 }
 0x4e3   : > { %3747 = vmatmul.bf16.gmra.mxu0 %v6548_v57 }
 0x4e4   : > { %v3267_v11 = vpop.f32.mrf.mxu3 }
 0x4e5   : > { %v3268_v42 = vadd.f32 %v3267_v11, %v3238_v45  ;;  %v3320_v31 = vpop.f32.mrf.mxu2 }
 0x4e6   : > { %v3321_v25 = vadd.f32 %v3320_v31, %v3291_v26  ;;  %v3240_v63 = vpop.f32.mrf.mxu1 }
 0x4e7   : > { %v10398_v22 = vadd.f32 %v3268_v42, %v10243_v23 }
 0x4e8   : > { %v3293_v6 = vpop.f32.mrf.mxu0  ;;  %v10401_v8 = vadd.f32 %v3321_v25, %v10247_v34 }
 0x4ec   : > { %v3269_v40 = vpop.f32.mrf.mxu3 }
 0x4ed   : > { %v3270_v58 = vadd.f32 %v3269_v40, %v3240_v63  ;;  %v3322_v2 = vpop.f32.mrf.mxu2 }
 0x4ee   : > { %v3323_v49 = vadd.f32 %v3322_v2, %v3293_v6  ;;  %v3488_v46 = vpop.f32.mrf.mxu1 }
 0x4ef   : > { %v10404_v57 = vadd.f32 %v3270_v58, %v10253_v50 }
 0x4f0   : > { %v3296_v56 = vpop.f32.mrf.mxu0  ;;  %v10407_v43 = vadd.f32 %v3323_v49, %v10257_v47 }
 0x4f2   : > { %6568 = vmatmul.msk.bf16.gmra.mxu2 %vm1729_vm6, %v6560_v4 }
 0x4f3   : > { %3752 = vmatmul.bf16.gmra.mxu0 %v6556_v32 }
 0x4f4   : > { %v3517_v23 = vpop.f32.mrf.mxu3 }
 0x4f5   : > { %v3518_v33 = vadd.f32 %v3517_v23, %v3488_v46  ;;  %v3325_v3 = vpop.f32.mrf.mxu2 }
 0x4f6   : > { %v3326_v34 = vadd.f32 %v3325_v3, %v3296_v56  ;;  %v3490_v51 = vpop.f32.mrf.mxu1 }
 0x4f7   : > { %v10411_v36 = vadd.f32 %v3518_v33, %v10269_v10 }
 0x4f8   : > { %v3298_v19 = vpop.f32.mrf.mxu0  ;;  %v10414_v37 = vadd.f32 %v3326_v34, %v10272_v12 }
 0x4fc   : > { %v3519_v50 = vpop.f32.mrf.mxu3 }
 0x4fd   : > { %v3520_v35 = vadd.f32 %v3519_v50, %v3490_v51  ;;  %v3327_v1 = vpop.f32.mrf.mxu2 }
 0x4fe   : > { %v3328_v47 = vadd.f32 %v3327_v1, %v3298_v19  ;;  %v3493_v53 = vpop.f32.mrf.mxu1 }
 0x4ff   : > { %v10417_v16 = vadd.f32 %v3520_v35, %v10276_v44 }
 0x500   : > { %v3546_v14 = vpop.f32.mrf.mxu0  ;;  %v10420_v4 = vadd.f32 %v3328_v47, %v10279_v7 }
 0x504   : > { %v3522_v32 = vpop.f32.mrf.mxu3 }
 0x505   : > { %v3523_v13 = vadd.f32 %v3522_v32, %v3493_v53  ;;  %v3575_v10 = vpop.f32.mrf.mxu2 }
 0x506   : > { %v3576_v45 = vadd.f32 %v3575_v10, %v3546_v14  ;;  %v3495_v26 = vpop.f32.mrf.mxu1 }
 0x507   : > { %v10423_v12 = vadd.f32 %v3523_v13, %v10288_v55 }
 0x508   : > { %v3548_v11 = vpop.f32.mrf.mxu0  ;;  %v10426_v42 = vadd.f32 %v3576_v45, %v10291_v59 }
 0x50c   : > { %v3524_v31 = vpop.f32.mrf.mxu3 }
 0x50d   : > { %v3525_v25 = vadd.f32 %v3524_v31, %v3495_v26  ;;  %v3577_v44 = vpop.f32.mrf.mxu2 }
 0x50e   : > { %v3578_v63 = vadd.f32 %v3577_v44, %v3548_v11  ;;  %v3498_v6 = vpop.f32.mrf.mxu1 }
 0x50f   : > { %v10429_v7 = vadd.f32 %v3525_v25, %v10294_v41 }
 0x510   : > { %v3551_v40 = vpop.f32.mrf.mxu0  ;;  %v10432_v58 = vadd.f32 %v3578_v63, %v10297_v15 }
 0x514   : > { %v3527_v2 = vpop.f32.mrf.mxu3 }
 0x515   : > { %v3528_v49 = vadd.f32 %v3527_v2, %v3498_v6  ;;  %v3580_v55 = vpop.f32.mrf.mxu2 }
 0x516   : > { %v3581_v46 = vadd.f32 %v3580_v55, %v3551_v40  ;;  %v3500_v56 = vpop.f32.mrf.mxu1 }
 0x517   : > { %v10435_v59 = vadd.f32 %v3528_v49, %v10306_v24 }
 0x518   : > { %v3553_v23 = vpop.f32.mrf.mxu0  ;;  %v10438_v33 = vadd.f32 %v3581_v46, %v10309_v60 }
 0x51c   : > { %v3529_v3 = vpop.f32.mrf.mxu3 }
 0x51d   : > { %v3530_v34 = vadd.f32 %v3529_v3, %v3500_v56  ;;  %v3582_v41 = vpop.f32.mrf.mxu2 }
 0x51e   : > { %v3583_v51 = vadd.f32 %v3582_v41, %v3553_v23  ;;  %v3503_v19 = vpop.f32.mrf.mxu1 }
 0x51f   : > { %v10441_v15 = vadd.f32 %v3530_v34, %v10312_v62 }
 0x520   : > { %v3556_v50 = vpop.f32.mrf.mxu0  ;;  %v10444_v35 = vadd.f32 %v3583_v51, %v10315_v29 }
 0x524   : > { %v3532_v1 = vpop.f32.mrf.mxu3 }
 0x525   : > { %v3533_v47 = vadd.f32 %v3532_v1, %v3503_v19  ;;  %v3585_v24 = vpop.f32.mrf.mxu2 }
 0x526   : > { %v3586_v53 = vadd.f32 %v3585_v24, %v3556_v50  ;;  %v3505_v14 = vpop.f32.mrf.mxu1 }
 0x527   : > { %v10447_v60 = vadd.f32 %v3533_v47, %v10324_v18 }
 0x528   : > { %v3558_v32 = vpop.f32.mrf.mxu0  ;;  %v10450_v13 = vadd.f32 %v3586_v53, %v10327_v17 }
 0x52c   : > { %v3534_v10 = vpop.f32.mrf.mxu3 }
 0x52d   : > { %v3535_v45 = vadd.f32 %v3534_v10, %v3505_v14  ;;  %v3587_v62 = vpop.f32.mrf.mxu2 }
 0x52e   : > { %v3588_v26 = vadd.f32 %v3587_v62, %v3558_v32  ;;  %v3680_v11 = vpop.f32.mrf.mxu1 }
 0x52f   : > { %v10453_v29 = vadd.f32 %v3535_v45, %v10334_v28 }
 0x530   : > { %v3561_v31 = vpop.f32.mrf.mxu0  ;;  %v10456_v25 = vadd.f32 %v3588_v26, %v10337_v30 }
 0x534   : > { %v3709_v44 = vpop.f32.mrf.mxu3 }
 0x535   : > { %v3710_v63 = vadd.f32 %v3709_v44, %v3680_v11  ;;  %v3590_v18 = vpop.f32.mrf.mxu2 }
 0x536   : > { %v3591_v6 = vadd.f32 %v3590_v18, %v3561_v31  ;;  %v3682_v40 = vpop.f32.mrf.mxu1 }
 0x537   : > { %v3787_v17 = vadd.f32 %v3710_v63, %v10344_v39  ;;  %v3819_v39 = vld [vmem:[%s10950_s4] sm:$0x3] }
 0x538   : > { %v3563_v2 = vpop.f32.mrf.mxu0  ;;  %v10460_v49 = vadd.f32 %v3591_v6, %v10347_v27  ;;  %v10471_v47 = vperm.slane %v3819_v39, 0 }
 0x539   : > { %v3803_v55 = vmax.f32 %v10411_v36, %v3787_v17 }
 0x53b   : > { %v10480_v32 = vadd.f32 %v10471_v47, %v3803_v55 }
 0x53c   : > { %v3711_v46 = vpop.f32.mrf.mxu3 }
 0x53d   : > { %v3712_v28 = vadd.f32 %v3711_v46, %v3682_v40  ;;  %v3592_v56 = vpop.f32.mrf.mxu2 }
 0x53e   : > { %v3593_v23 = vadd.f32 %v3592_v56, %v3563_v2  ;;  %v3685_v3 = vpop.f32.mrf.mxu1 }
 0x53f   : > { %v3789_v30 = vadd.f32 %v3712_v28, %v10354_v38 }
 0x540   : > { %v3738_v34 = vpop.f32.mrf.mxu0  ;;  %v10465_v41 = vadd.f32 %v3593_v23, %v10357_v21  ;;  %v10475_v21 = vperm.slane %v3819_v39, 1 }
 0x541   : > { %v3805_v51 = vmax.f32 %v10417_v16, %v3789_v30 }
 0x543   : > { %v10497_v40 = vadd.f32 %v10471_v47, %v3805_v51 }
 0x544   : > { %v3714_v27 = vpop.f32.mrf.mxu3 }
 0x545   : > { %v3715_v19 = vadd.f32 %v3714_v27, %v3685_v3  ;;  %v3767_v36 = vpop.f32.mrf.mxu2  ;;  %v3843_v46 = vmax.f32 %v10497_v40, 0.0 }
 0x546   : > { %v3768_v50 = vadd.f32 %v3767_v36, %v3738_v34  ;;  %v3687_v1 = vpop.f32.mrf.mxu1 }
 0x547   : > { %v3791_v24 = vadd.f32 %v3715_v19, %v10362_v9  ;;  %v3841_v9 = vmax.f32 %v10480_v32, 0.0 }
 0x548   : > { %v3740_v38 = vpop.f32.mrf.mxu0  ;;  %v3788_v53 = vadd.f32 %v3768_v50, %v10365_v48 }
 0x549   : > { %v3807_v16 = vmax.f32 %v10423_v12, %v3791_v24 }
 0x54a   : > { %v3804_v14 = vmax.f32 %v10426_v42, %v3788_v53 }
 0x54b   : > { %v10514_v51 = vadd.f32 %v10471_v47, %v3807_v16 }
 0x54c   : > { %v3716_v10 = vpop.f32.mrf.mxu3  ;;  %v10483_v45 = vadd.f32 %v10475_v21, %v3804_v14 }
 0x54d   : > { %v3717_v62 = vadd.f32 %v3716_v10, %v3687_v1  ;;  %v3769_v26 = vpop.f32.mrf.mxu2  ;;  %v3845_v36 = vmax.f32 %v10514_v51, 0.0 }
 0x54e   : > { %v3770_v11 = vadd.f32 %v3769_v26, %v3740_v38  ;;  %v3842_v48 = vmax.f32 %v10483_v45, 0.0  ;;  %v3690_v31 = vpop.f32.mrf.mxu1 }
 0x54f   : > { %v3793_v44 = vadd.f32 %v3717_v62, %v10372_v20 }
 0x550   : > { %v3743_v12 = vpop.f32.mrf.mxu0  ;;  %v3790_v42 = vadd.f32 %v3770_v11, %v10375_v54  ;;  %v7462_v63 = vpack.i.bf16 %v3842_v48, %v3841_v9 }
 0x551   : > { %v3809_v18 = vmax.f32 %v10429_v7, %v3793_v44 }
 0x552   : > { %v3806_v6 = vmax.f32 %v10432_v58, %v3790_v42  ;;  %7463 = vrot.lane.b32.xlu0 %v7462_v63, %s7522_s21 }
 0x553   : > { %v10531_v14 = vadd.f32 %v10471_v47, %v3809_v18 }
 0x554   : > { %v3719_v17 = vpop.f32.mrf.mxu3  ;;  %v10500_v20 = vadd.f32 %v10475_v21, %v3806_v6 }
 0x555   : > { %v3720_v54 = vadd.f32 %v3719_v17, %v3690_v31  ;;  %v3772_v2 = vpop.f32.mrf.mxu2  ;;  %v3847_v11 = vmax.f32 %v10531_v14, 0.0 }
 0x556   : > { %v3773_v55 = vadd.f32 %v3772_v2, %v3743_v12  ;;  %v3844_v28 = vmax.f32 %v10500_v20, 0.0  ;;  %v3692_v7 = vpop.f32.mrf.mxu1 }
 0x557   : > { %v3795_v58 = vadd.f32 %v3720_v54, %v10380_v5 }
 0x558   : > { %v3745_v56 = vpop.f32.mrf.mxu0  ;;  %v3792_v23 = vadd.f32 %v3773_v55, %v10383_v52  ;;  %v7467_v3 = vpack.i.bf16 %v3844_v28, %v3843_v46 }
 0x559   : > { %v3811_v30 = vmax.f32 %v10435_v59, %v3795_v58 }
 0x55a   : > { %v3808_v34 = vmax.f32 %v10438_v33, %v3792_v23  ;;  %7468 = vrot.lane.b32.xlu0 %v7467_v3, %s7522_s21 }
 0x55b   : > { %v10548_v6 = vadd.f32 %v10471_v47, %v3811_v30 }
 0x55c   : > { %v3721_v39 = vpop.f32.mrf.mxu3  ;;  %v10517_v5 = vadd.f32 %v10475_v21, %v3808_v34 }
 0x55d   : > { %v3722_v27 = vadd.f32 %v3721_v39, %v3692_v7  ;;  %v3774_v52 = vpop.f32.mrf.mxu2  ;;  %v3849_v55 = vmax.f32 %v10548_v6, 0.0 }
 0x55e   : > { %v3775_v19 = vadd.f32 %v3774_v52, %v3745_v56  ;;  %v3846_v50 = vmax.f32 %v10517_v5, 0.0  ;;  %v3695_v38 = vpop.f32.mrf.mxu1 }
 0x55f   : > { %v3797_v59 = vadd.f32 %v3722_v27, %v10390_v0 }
 0x560   : > { %v3748_v1 = vpop.f32.mrf.mxu0  ;;  %v3794_v33 = vadd.f32 %v3775_v19, %v10393_v61  ;;  %v7472_v24 = vpack.i.bf16 %v3846_v50, %v3845_v36 }
 0x561   : > { %v3813_v53 = vmax.f32 %v10441_v15, %v3797_v59 }
 0x562   : > { %v3810_v16 = vmax.f32 %v10444_v35, %v3794_v33  ;;  %7473 = vrot.lane.b32.xlu1 %v7472_v24, %s7522_s21 }
 0x563   : > { %v10558_v3 = vadd.f32 %v10471_v47, %v3813_v53 }
 0x564   : > { %v3724_v10 = vpop.f32.mrf.mxu3  ;;  %v10534_v0 = vadd.f32 %v10475_v21, %v3810_v16 }
 0x565   : > { %v3725_v61 = vadd.f32 %v3724_v10, %v3695_v38  ;;  %v3777_v62 = vpop.f32.mrf.mxu2  ;;  %v3851_v52 = vmax.f32 %v10558_v3, 0.0 }
 0x566   : > { %v3778_v26 = vadd.f32 %v3777_v62, %v3748_v1  ;;  %v3848_v31 = vmax.f32 %v10534_v0, 0.0  ;;  %v3697_v18 = vpop.f32.mrf.mxu1 }
 0x567   : > { %v3799_v15 = vadd.f32 %v3725_v61, %v10398_v22 }
 0x568   : > { %v3796_v35 = vadd.f32 %v3778_v26, %v10401_v8  ;;  %v7477_v44 = vpack.i.bf16 %v3848_v31, %v3847_v11  ;;  %v3750_v42 = vpop.f32.mrf.mxu0 }
 0x569   : > { %v3815_v12 = vmax.f32 %v10447_v60, %v3799_v15 }
 0x56a   : > { %v3812_v63 = vmax.f32 %v10450_v13, %v3796_v35  ;;  %7478 = vrot.lane.b32.xlu1 %v7477_v44, %s7522_s21 }
 0x56b   : > { %v10568_v19 = vadd.f32 %v10471_v47, %v3815_v12  ;;  %v7356_v12 = vld [vmem:[%s10951_s5 + $0xc8] sm:$0xff] (%p1517_p1) }
 0x56c   : > { %v3726_v17 = vpop.f32.mrf.mxu3  ;;  %v3834_v22 = vadd.f32 %v10475_v21, %v3812_v63 }
 0x56d   : > { %v3727_v8 = vadd.f32 %v3726_v17, %v3697_v18  ;;  %v3779_v54 = vpop.f32.mrf.mxu2  ;;  %v3853_v38 = vmax.f32 %v10568_v19, 0.0  ;;  %v7339_v19 = vld [vmem:[%s10951_s5 + $0x80] sm:$0xff] (%p1517_p1) }
 0x56e   : > { %v3780_v2 = vadd.f32 %v3779_v54, %v3750_v42  ;;  %v3850_v7 = vmax.f32 %v3834_v22, 0.0  ;;  %4125 = vmatpush.bf16.msra.mxu0 (%p1517_p1), %v7339_v19 }
 0x56f   : > { %v3801_v60 = vadd.f32 %v3727_v8, %v10404_v57 }
 0x570   : > { %v3798_v58 = vadd.f32 %v3780_v2, %v10407_v43  ;;  %v7482_v13 = vpack.i.bf16 %v3850_v7, %v3849_v55  ;;  %v3753_v30 = vpop.f32.mrf.mxu0 }
 0x571   : > { %v3817_v56 = vmax.f32 %v10453_v29, %v3801_v60 }
 0x572   : > { %v3814_v23 = vmax.f32 %v10456_v25, %v3798_v58  ;;  %7483 = vrot.lane.b32.xlu2 %v7482_v13, %s7522_s21 }
 0x573   : > { %v10583_v10 = vadd.f32 %v10471_v47, %v3817_v56 }
 0x574   : > { %v3836_v34 = vadd.f32 %v10475_v21, %v3814_v23 }
 0x575   : > { %v3782_v39 = vpop.f32.mrf.mxu2  ;;  %v3855_v62 = vmax.f32 %v10583_v10, 0.0  ;;  %v7322_v10 = vld [vmem:[%s10951_s5 + $0x38] sm:$0xff] (%p1517_p1) }
 0x576   : > { %v3783_v27 = vadd.f32 %v3782_v39, %v3753_v30  ;;  %v3852_v57 = vmax.f32 %v3836_v34, 0.0  ;;  %4285 = vmatpush.bf16.msra.mxu2 (%p1517_p1), %v7322_v10 }
 0x578   : > { %v3800_v43 = vadd.f32 %v3783_v27, %v10414_v37  ;;  %v7487_v29 = vpack.i.bf16 %v3852_v57, %v3851_v52  ;;  %v3755_v1 = vpop.f32.mrf.mxu0 }
 0x57a   : > { %v3816_v25 = vmax.f32 %v10460_v49, %v3800_v43  ;;  %7488 = vrot.lane.b32.xlu2 %v7487_v29, %s7522_s21 }
 0x57c   : > { %v10571_v59 = vadd.f32 %v10475_v21, %v3816_v25 }
 0x57d   : > { %v3784_v33 = vpop.f32.mrf.mxu2 }
 0x57e   : > { %v3785_v24 = vadd.f32 %v3784_v33, %v3755_v1  ;;  %v3854_v37 = vmax.f32 %v10571_v59, 0.0 }
 0x580   : > { %v3802_v53 = vadd.f32 %v3785_v24, %v10420_v4  ;;  %v7492_v49 = vpack.i.bf16 %v3854_v37, %v3853_v38 }
 0x582   : > { %v3818_v16 = vmax.f32 %v10465_v41, %v3802_v53  ;;  %7493 = vrot.lane.b32.xlu0 %v7492_v49, %s7522_s21 }
 0x584   : > { %v10586_v61 = vadd.f32 %v10475_v21, %v3818_v16 }
 0x586   : > { %v3856_v26 = vmax.f32 %v10586_v61, 0.0  ;;  %v7323_v61 = vld [vmem:[%s10951_s5 + $0x40] sm:$0xff] (%p1517_p1) }
 0x587   :  { %4321 = vmatpush.bf16.msra.mxu3 (%p1517_p1), %v7323_v61 }
 0x588   : > { %v7497_v4 = vpack.i.bf16 %v3856_v26, %v3855_v62 }
 0x58a   : > { %7498 = vrot.lane.b32.xlu1 %v7497_v4, %s7522_s21 }
 0x5c4   : > { %v7464_v41 = vpop.permute.xlu0 %7463 }
 0x5c5   : > { %v7466_v15 = vunpack.i.h.bf16 %v7464_v41  ;;  %v7465_v35 = vunpack.i.l.bf16 %v7464_v41 }
 0x5c7   : > { %v3931_v47 = vmax.f32 %v3842_v48, %v7466_v15  ;;  %v3906_v21 = vsel %vm3905_vm7, %v7465_v35, %v7466_v15  ;;  %v7357_v35 = vld [vmem:[%s10951_s5 + $0xd0] sm:$0xff] (%p1517_p1) }
 0x5c8   : > { %v3930_v44 = vmax.f32 %v3841_v9, %v3906_v21  ;;  %v7338_v21 = vld [vmem:[%s10951_s5 + $0x78] sm:$0xff] (%p1517_p1)  ;;  %4509 = vmatpush.bf16.msrb.mxu3 (%p1517_p1), %v7357_v35  ;;  %v7368_v35 = vld [vmem:[%s10951_s5 + $0xe8] sm:$0xff] (%p1517_p1) }
 0x5c9   :  { %4126 = vmatpush.bf16.msra.mxu0 (%p1517_p1), %v7338_v21 }
 0x5ca   : > { %v3946_v42 = vpack.c.bf16 %v3931_v47, %v3930_v44  ;;  %v7321_v44 = vld [vmem:[%s10951_s5 + $0x30] sm:$0xff] (%p1517_p1) }
 0x5cb   :  { %4286 = vmatpush.bf16.msra.mxu2 (%p1517_p1), %v7321_v44 }
 0x5cc   : > { %3960 = vst.msk [vmem:[%s10606_s23] sm:$0xff] %vm10602_vm9, %v3946_v42  ;;  %v7484_v45 = vpop.permute.xlu2 %7483  ;;  %v7469_v48 = vpop.permute.xlu0 %7468  ;;  %v7337_v42 = vld [vmem:[%s10951_s5 + $0x70] sm:$0xff] (%p1517_p1) }
 0x5cd   : > { %v7486_v63 = vunpack.i.h.bf16 %v7484_v45  ;;  %v7485_v18 = vunpack.i.l.bf16 %v7484_v45  ;;  %v7471_v32 = vunpack.i.h.bf16 %v7469_v48  ;;  %v7470_v9 = vunpack.i.l.bf16 %v7469_v48  ;;  %v7320_v45 = vld [vmem:[%s10951_s5 + $0x28] sm:$0xff] (%p1517_p1)  ;;  %v7355_v48 = vld [vmem:[%s10951_s5 + $0xc0] sm:$0xff] (%p1517_p1)  ;;  %4127 = vmatpush.bf16.msra.mxu0 (%p1517_p1), %v7337_v42 }
 0x5ce   :  { %v7367_v42 = vld [vmem:[%s10951_s5 + $0xe0] sm:$0xff] (%p1517_p1) }
 0x5cf   : > { %v3939_v6 = vmax.f32 %v3850_v7, %v7486_v63  ;;  %v3910_v17 = vsel %vm3905_vm7, %v7485_v18, %v7486_v63  ;;  %v3933_v22 = vmax.f32 %v3844_v28, %v7471_v32  ;;  %v3907_v8 = vsel %vm3905_vm7, %v7470_v9, %v7471_v32  ;;  %v7336_v63 = vld [vmem:[%s10951_s5 + $0x68] sm:$0xff] (%p1517_p1)  ;;  %4287 = vmatpush.bf16.msra.mxu2 (%p1517_p1), %v7320_v45  ;;  %v7319_v18 = vld [vmem:[%s10951_s5 + $0x20] sm:$0xff] (%p1517_p1)  ;;  %v7354_v32 = vld [vmem:[%s10951_s5 + $0xb8] sm:$0xff] (%p1517_p1) }
 0x5d0   : > { %v3938_v54 = vmax.f32 %v3849_v55, %v3910_v17  ;;  %v3932_v2 = vmax.f32 %v3843_v46, %v3907_v8  ;;  %v7335_v9 = vld [vmem:[%s10951_s5 + $0x60] sm:$0xff] (%p1517_p1) }
 0x5d1   :  { %4128 = vmatpush.bf16.msra.mxu0 (%p1517_p1), %v7336_v63 }
 0x5d2   : > { %v3950_v60 = vpack.c.bf16 %v3939_v6, %v3938_v54  ;;  %v3947_v58 = vpack.c.bf16 %v3933_v22, %v3932_v2  ;;  %v7318_v6 = vld [vmem:[%s10951_s5 + $0x18] sm:$0xff] (%p1517_p1)  ;;  %v7353_v2 = vld [vmem:[%s10951_s5 + $0xb0] sm:$0xff] (%p1517_p1) }
 0x5d3   :  { %4288 = vmatpush.bf16.msra.mxu2 (%p1517_p1), %v7319_v18 }
 0x5d4   : > { %3964 = vst.msk [vmem:[%s10606_s23 + $0x20] sm:$0xff] %vm10602_vm9, %v3950_v60  ;;  %v7489_v13 = vpop.permute.xlu2 %7488  ;;  %v7474_v56 = vpop.permute.xlu1 %7473 }
 0x5d5   : > { %3961 = vst.msk [vmem:[%s10606_s23 + $0x8] sm:$0xff] %vm10602_vm9, %v3947_v58  ;;  %v7491_v20 = vunpack.i.h.bf16 %v7489_v13  ;;  %v7490_v28 = vunpack.i.l.bf16 %v7489_v13  ;;  %v7476_v7 = vunpack.i.h.bf16 %v7474_v56  ;;  %v7475_v23 = vunpack.i.l.bf16 %v7474_v56  ;;  %4129 = vmatpush.bf16.msra.mxu0 (%p1517_p1), %v7335_v9  ;;  %v7334_v13 = vld [vmem:[%s10951_s5 + $0x58] sm:$0xff] (%p1517_p1)  ;;  %v7317_v56 = vld [vmem:[%s10951_s5 + $0x10] sm:$0xff] (%p1517_p1) }
 0x5d7   : > { %v3941_v55 = vmax.f32 %v3852_v57, %v7491_v20  ;;  %v3911_v40 = vsel %vm3905_vm7, %v7490_v28, %v7491_v20  ;;  %v3935_v46 = vmax.f32 %v3846_v50, %v7476_v7  ;;  %v3908_v30 = vsel %vm3905_vm7, %v7475_v23, %v7476_v7  ;;  %4289 = vmatpush.bf16.msra.mxu2 (%p1517_p1), %v7318_v6  ;;  %v7352_v20 = vld [vmem:[%s10951_s5 + $0xa8] sm:$0xff] (%p1517_p1)  ;;  %v7333_v28 = vld [vmem:[%s10951_s5 + $0x50] sm:$0xff] (%p1517_p1)  ;;  %v7351_v23 = vld [vmem:[%s10951_s5 + $0xa0] sm:$0xff] (%p1517_p1) }
 0x5d8   : > { %v3940_v34 = vmax.f32 %v3851_v52, %v3911_v40  ;;  %v3934_v39 = vmax.f32 %v3845_v36, %v3908_v30  ;;  %v7316_v7 = vld [vmem:[%s10951_s5 + $0x8] sm:$0xff] (%p1517_p1)  ;;  %v7315_v40 = vld [vmem:[%s10951_s5] sm:$0xff] (%p1517_p1) }
 0x5d9   :  { %4130 = vmatpush.bf16.msra.mxu0 (%p1517_p1), %v7334_v13 }
 0x5da   : > { %v3951_v27 = vpack.c.bf16 %v3941_v55, %v3940_v34  ;;  %v3948_v43 = vpack.c.bf16 %v3935_v46, %v3934_v39  ;;  %v7332_v55 = vld [vmem:[%s10951_s5 + $0x48] sm:$0xff] (%p1517_p1) }
 0x5db   :  { %4290 = vmatpush.bf16.msra.mxu2 (%p1517_p1), %v7317_v56 }
 0x5dc   : > { %3965 = vst.msk [vmem:[%s10606_s23 + $0x28] sm:$0xff] %vm10602_vm9, %v3951_v27  ;;  %v7479_v57 = vpop.permute.xlu1 %7478  ;;  %v7350_v27 = vld [vmem:[%s10951_s5 + $0x98] sm:$0xff] (%p1517_p1) }
 0x5dd   : > { %3962 = vst.msk [vmem:[%s10606_s23 + $0x10] sm:$0xff] %vm10602_vm9, %v3948_v43  ;;  %v7481_v5 = vunpack.i.h.bf16 %v7479_v57  ;;  %v7480_v50 = vunpack.i.l.bf16 %v7479_v57  ;;  %4131 = vmatpush.bf16.msra.mxu0 (%p1517_p1), %v7333_v28 }
 0x5df   : > { %v3937_v29 = vmax.f32 %v3848_v31, %v7481_v5  ;;  %v3909_v3 = vsel %vm3905_vm7, %v7480_v50, %v7481_v5  ;;  %4291 = vmatpush.bf16.msra.mxu2 (%p1517_p1), %v7316_v7 }
 0x5e0   : > { %v3936_v51 = vmax.f32 %v3847_v11, %v3909_v3 }
 0x5e1   :  { %4132 = vmatpush.bf16.msra.mxu0 (%p1517_p1), %v7332_v55 }
 0x5e2   : > { %v3949_v36 = vpack.c.bf16 %v3937_v29, %v3936_v51 }
 0x5e3   :  { %4292 = vmatpush.bf16.msra.mxu2 (%p1517_p1), %v7315_v40 }
 0x5e4   : > { %3963 = vst.msk [vmem:[%s10606_s23 + $0x18] sm:$0xff] %vm10602_vm9, %v3949_v36  ;;  %v7349_v36 = vld [vmem:[%s10951_s5 + $0x90] sm:$0xff] (%p1517_p1) }
 0x5f4   : > { %v7494_v52 = vpop.permute.xlu0 %7493 }
 0x5f5   : > { %v7496_v25 = vunpack.i.h.bf16 %v7494_v52  ;;  %v7495_v1 = vunpack.i.l.bf16 %v7494_v52 }
 0x5f7   : > { %v3943_v33 = vmax.f32 %v3854_v37, %v7496_v25  ;;  %v3912_v24 = vsel %vm3905_vm7, %v7495_v1, %v7496_v25  ;;  %v7374_v25 = vld [vmem:[%s10951_s5 + $0x118] sm:$0xff] (%p1517_p1)  ;;  %v7391_v1 = vld [vmem:[%s10951_s5 + $0x160] sm:$0xff] (%p1517_p1) }
 0x5f8   : > { %v3942_v0 = vmax.f32 %v3853_v38, %v3912_v24  ;;  %v7340_v38 = vld [vmem:[%s10951_s5 + $0x88] sm:$0xff] (%p1517_p1)  ;;  %4705 = vmatpush.bf16.msrb.mxu2 (%p1517_p1), %v7374_v25  ;;  %v7390_v24 = vld [vmem:[%s10951_s5 + $0x158] sm:$0xff] (%p1517_p1)  ;;  %v7383_v25 = vld [vmem:[%s10951_s5 + $0x120] sm:$0xff] (%p1517_p1) }
 0x5f9   :  { %4161 = vmatpush.bf16.msra.mxu1 (%p1517_p1), %v7340_v38 }
 0x5fa   : > { %v3952_v31 = vpack.c.bf16 %v3943_v33, %v3942_v0  ;;  %v7373_v33 = vld [vmem:[%s10951_s5 + $0x110] sm:$0xff] (%p1517_p1)  ;;  %v7372_v0 = vld [vmem:[%s10951_s5 + $0x108] sm:$0xff] (%p1517_p1) }
 0x5fb   :  { %4669 = vmatpush.bf16.msrb.mxu0 (%p1517_p1), %v7373_v33 }
 0x5fc   : > { %3966 = vst.msk [vmem:[%s10606_s23 + $0x30] sm:$0xff] %vm10602_vm9, %v3952_v31  ;;  %v7499_v14 = vpop.permute.xlu1 %7498 }
 0x5fd   : > { %v7501_v11 = vunpack.i.h.bf16 %v7499_v14  ;;  %v7500_v53 = vunpack.i.l.bf16 %v7499_v14  ;;  %4473 = vmatpush.bf16.msrb.mxu1 (%p1517_p1), %v7356_v12 }
 0x5ff   : > { %v3945_v49 = vmax.f32 %v3856_v26, %v7501_v11  ;;  %v3913_v16 = vsel %vm3905_vm7, %v7500_v53, %v7501_v11  ;;  %4670 = vmatpush.bf16.msrb.mxu0 (%p1517_p1), %v7372_v0 }
 0x600   : > { %v3944_v59 = vmax.f32 %v3855_v62, %v3913_v16  ;;  %1519 = sbr.rel (!%p1517_p1) target bundleno = 606 (0x25e), region = 119 }
 0x601   :  { %4474 = vmatpush.bf16.msrb.mxu1 (%p1517_p1), %v7355_v48 }
 0x602   : > { %v3953_v37 = vpack.c.bf16 %v3945_v49, %v3944_v59  ;;  %v7371_v49 = vld [vmem:[%s10951_s5 + $0x100] sm:$0xff] (%p1517_p1) }
 0x603   :  { %4671 = vmatpush.bf16.msrb.mxu0 (%p1517_p1), %v7371_v49 }
 0x604   : > { %3967 = vst.msk [vmem:[%s10606_s23 + $0x38] sm:$0xff] %vm10602_vm9, %v3953_v37 }
 0x605   :  { %4475 = vmatpush.bf16.msrb.mxu1 %v7354_v32 }
 0x609   :  { %4476 = vmatpush.bf16.msrb.mxu1 %v7353_v2 }
 0x60b   :  { %v7324_v62 = vld [vmem:[#allocation3 + $0x44] sm:$0xf]  ;;  %v6593_v26 = vld [vmem:[#allocation3 + $0x48] sm:$0xf0]  ;;  %v7326_v17 = vld [vmem:[#allocation3 + $0x54] sm:$0xf] }
 0x60c   :  { %v6596_v4 = vor.u32 %v7324_v62, %v6593_v26  ;;  %v7307_v41 = vld [vmem:[#allocation3 + $0x4] sm:$0xf]  ;;  %v6665_v15 = vld [vmem:[#allocation3 + $0x8] sm:$0xf0]  ;;  %v6601_v22 = vld [vmem:[#allocation3 + $0x58] sm:$0xf0] }
 0x60d   :  { %v6668_v47 = vor.u32 %v7307_v41, %v6665_v15  ;;  %v7309_v8 = vld [vmem:[#allocation3 + $0x14] sm:$0xf]  ;;  %v6673_v54 = vld [vmem:[#allocation3 + $0x18] sm:$0xf0]  ;;  %v6604_v60 = vor.u32 %v7326_v17, %v6601_v22  ;;  %4477 = vmatpush.bf16.msrb.mxu1 %v7352_v20  ;;  %v6591_v46 = vld [vmem:[#allocation3 + $0x40] sm:$0xf] }
 0x60e   :  { %6657 = vmatmul.msk.bf16.vlgmr.msra.gmra.mxu1 %vm4112_vm10, %v6596_v4  ;;  %v6676_v58 = vor.u32 %v7309_v8, %v6673_v54  ;;  %v7325_v30 = vld [vmem:[#allocation3 + $0x44] sm:$0xf0]  ;;  %v6663_v34 = vld [vmem:[#allocation3] sm:$0xf]  ;;  %v7328_v5 = vld [vmem:[#allocation3 + $0x64] sm:$0xf] }
 0x60f   :  { %6729 = vmatmul.msk.bf16.vlgmr.msra.gmra.mxu3 %vm4112_vm10, %v6668_v47  ;;  %v7308_v39 = vld [vmem:[#allocation3 + $0x4] sm:$0xf0]  ;;  %v6592_v43 = vor.u32 %v7325_v30, %v6591_v46  ;;  %v6609_v50 = vld [vmem:[#allocation3 + $0x68] sm:$0xf0]  ;;  %v7311_v29 = vld [vmem:[#allocation3 + $0x24] sm:$0xf] }
 0x610   :  { %v6664_v57 = vor.u32 %v7308_v39, %v6663_v34  ;;  %v6681_v3 = vld [vmem:[#allocation3 + $0x28] sm:$0xf0]  ;;  %v6612_v51 = vor.u32 %v7328_v5, %v6609_v50  ;;  %4901 = vmatpush.bf16.msra.mxu3 %v7391_v1  ;;  %v6599_v31 = vld [vmem:[#allocation3 + $0x50] sm:$0xf]  ;;  %v7327_v14 = vld [vmem:[#allocation3 + $0x54] sm:$0xf0] }
 0x611   :  { %4478 = vmatpush.bf16.msrb.mxu1 %v7351_v23  ;;  %4133 = vmatmul.bf16.vlgmr.msra.gmra.mxu0 %v6592_v43  ;;  %v6684_v52 = vor.u32 %v7311_v29, %v6681_v3  ;;  %v6671_v11 = vld [vmem:[#allocation3 + $0x10] sm:$0xf]  ;;  %v7310_v53 = vld [vmem:[#allocation3 + $0x14] sm:$0xf0]  ;;  %v6600_v16 = vor.u32 %v7327_v14, %v6599_v31  ;;  %v7330_v37 = vld [vmem:[#allocation3 + $0x74] sm:$0xf] }
 0x612   :  { %4293 = vmatmul.bf16.vlgmr.msra.gmra.mxu2 %v6664_v57  ;;  %v6672_v59 = vor.u32 %v7310_v53, %v6671_v11  ;;  %v6617_v19 = vld [vmem:[#allocation3 + $0x78] sm:$0xf0]  ;;  %v7313_v38 = vld [vmem:[#allocation3 + $0x34] sm:$0xf]  ;;  %v7388_v15 = vld [vmem:[%s10951_s5 + $0x148] sm:$0xff] }
 0x613   :  { %v6689_v10 = vld [vmem:[#allocation3 + $0x38] sm:$0xf0]  ;;  %v6620_v61 = vor.u32 %v7330_v37, %v6617_v19  ;;  %v7389_v26 = vld [vmem:[%s10951_s5 + $0x150] sm:$0xff]  ;;  %v6607_v47 = vld [vmem:[#allocation3 + $0x60] sm:$0xf] }
 0x614   :  { %v6692_v62 = vor.u32 %v7313_v38, %v6689_v10  ;;  %v7370_v4 = vld [vmem:[%s10951_s5 + $0xf8] sm:$0xff]  ;;  %v7369_v41 = vld [vmem:[%s10951_s5 + $0xf0] sm:$0xff]  ;;  %v7329_v21 = vld [vmem:[#allocation3 + $0x64] sm:$0xf0] }
 0x615   :  { %4479 = vmatpush.bf16.msrb.mxu1 %v7350_v27  ;;  %4672 = vmatpush.bf16.msrb.mxu0 %v7370_v4  ;;  %v6679_v44 = vld [vmem:[#allocation3 + $0x20] sm:$0xf]  ;;  %v7312_v12 = vld [vmem:[#allocation3 + $0x24] sm:$0xf0]  ;;  %v6608_v45 = vor.u32 %v7329_v21, %v6607_v47  ;;  %v7341_v32 = vld [vmem:[#allocation3 + $0x84] sm:$0xf] }
 0x616   :  { %v6680_v48 = vor.u32 %v7312_v12, %v6679_v44  ;;  %v6753_v63 = vld [vmem:[#allocation3 + $0x80] sm:$0xf]  ;;  %v7342_v18 = vld [vmem:[#allocation3 + $0x84] sm:$0xf0]  ;;  %v6755_v9 = vld [vmem:[#allocation3 + $0x88] sm:$0xf0] }
 0x617   :  { %v6754_v6 = vor.u32 %v7342_v18, %v6753_v63  ;;  %v6758_v17 = vor.u32 %v7341_v32, %v6755_v9  ;;  %v7387_v22 = vld [vmem:[%s10951_s5 + $0x140] sm:$0xff]  ;;  %v7366_v8 = vld [vmem:[%s10951_s5 + $0xd8] sm:$0xff]  ;;  %v6615_v2 = vld [vmem:[#allocation3 + $0x70] sm:$0xf] }
 0x618   :  { %v7386_v54 = vld [vmem:[%s10951_s5 + $0x138] sm:$0xff]  ;;  %v6761_v28 = vld [vmem:[#allocation3 + $0x90] sm:$0xf]  ;;  %v7343_v23 = vld [vmem:[#allocation3 + $0x94] sm:$0xf] }
 0x619   :  { %4480 = vmatpush.bf16.msrb.mxu1 %v7349_v36  ;;  %4673 = vmatpush.bf16.msrb.mxu0 %v7369_v41  ;;  %v7314_v13 = vld [vmem:[#allocation3 + $0x34] sm:$0xf0]  ;;  %v6763_v55 = vld [vmem:[#allocation3 + $0x98] sm:$0xf0]  ;;  %v7385_v30 = vld [vmem:[%s10951_s5 + $0x130] sm:$0xff] }
 0x61a   :  { %v7344_v7 = vld [vmem:[#allocation3 + $0x94] sm:$0xf0]  ;;  %v6766_v46 = vor.u32 %v7343_v23, %v6763_v55  ;;  %v7384_v34 = vld [vmem:[%s10951_s5 + $0x128] sm:$0xff]  ;;  %v6843_v39 = vld [vmem:[#allocation3 + $0xc0] sm:$0xf] }
 0x61b   :  { %v6762_v40 = vor.u32 %v7344_v7, %v6761_v28  ;;  %v7359_v27 = vld [vmem:[#allocation3 + $0xc4] sm:$0xf0]  ;;  %v7358_v43 = vld [vmem:[#allocation3 + $0xc4] sm:$0xf]  ;;  %v6845_v57 = vld [vmem:[#allocation3 + $0xc8] sm:$0xf0] }
 0x61c   :  { %v6844_v5 = vor.u32 %v7359_v27, %v6843_v39  ;;  %v6848_v50 = vor.u32 %v7358_v43, %v6845_v57  ;;  %v6769_v29 = vld [vmem:[#allocation3 + $0xa0] sm:$0xf]  ;;  %v7346_v3 = vld [vmem:[#allocation3 + $0xa4] sm:$0xf0]  ;;  %v6771_v36 = vld [vmem:[#allocation3 + $0xa8] sm:$0xf0] }
 0x61d   :  { %4865 = vmatpush.bf16.msra.mxu1 %v7390_v24  ;;  %4674 = vmatpush.bf16.msrb.mxu0 %v7368_v35  ;;  %v6851_v33 = vld [vmem:[#allocation3 + $0xd0] sm:$0xf]  ;;  %v7361_v24 = vld [vmem:[#allocation3 + $0xd4] sm:$0xf0]  ;;  %v7360_v0 = vld [vmem:[#allocation3 + $0xd4] sm:$0xf] }
 0x61e   :  { %6658 = vmatmul.msk.bf16.gmra.mxu1 %vm4112_vm10, %v6604_v60  ;;  %v7331_v60 = vld [vmem:[#allocation3 + $0x74] sm:$0xf0]  ;;  %v6853_v31 = vld [vmem:[#allocation3 + $0xd8] sm:$0xf0]  ;;  %v6852_v14 = vor.u32 %v7361_v24, %v6851_v33  ;;  %v6777_v53 = vld [vmem:[#allocation3 + $0xb0] sm:$0xf] }
 0x61f   :  { %6730 = vmatmul.msk.bf16.gmra.mxu3 %vm4112_vm10, %v6676_v58  ;;  %v6687_v58 = vld [vmem:[#allocation3 + $0x30] sm:$0xf]  ;;  %v6616_v56 = vor.u32 %v7331_v60, %v6615_v2  ;;  %v6856_v11 = vor.u32 %v7360_v0, %v6853_v31  ;;  %v7348_v49 = vld [vmem:[#allocation3 + $0xb4] sm:$0xf0]  ;;  %v6859_v38 = vld [vmem:[#allocation3 + $0xe0] sm:$0xf] }
 0x620   :  { %v6688_v20 = vor.u32 %v7314_v13, %v6687_v58  ;;  %v6778_v37 = vor.u32 %v7348_v49, %v6777_v53  ;;  %v7363_v10 = vld [vmem:[#allocation3 + $0xe4] sm:$0xf0]  ;;  %v6933_v41 = vld [vmem:[#allocation3 + $0x100] sm:$0xf]  ;;  %v7375_v35 = vld [vmem:[#allocation3 + $0x104] sm:$0xf] }
 0x621   :  { %4138 = vmatmul.bf16.gmra.mxu0 %v6600_v16  ;;  %4866 = vmatpush.bf16.msra.mxu1 %v7389_v26  ;;  %v7347_v16 = vld [vmem:[#allocation3 + $0xb4] sm:$0xf]  ;;  %v6860_v26 = vor.u32 %v7363_v10, %v6859_v38  ;;  %v6935_v47 = vld [vmem:[#allocation3 + $0x108] sm:$0xf0]  ;;  %v7365_v63 = vld [vmem:[#allocation3 + $0xf4] sm:$0xf0] }
 0x622   :  { %4298 = vmatmul.bf16.gmra.mxu2 %v6672_v59  ;;  %4675 = vmatpush.bf16.msrb.mxu0 %v7367_v42  ;;  %v6779_v59 = vld [vmem:[#allocation3 + $0xb8] sm:$0xf0]  ;;  %v6938_v12 = vor.u32 %v7375_v35, %v6935_v47  ;;  %v7364_v18 = vld [vmem:[#allocation3 + $0xf4] sm:$0xf]  ;;  %v6949_v7 = vld [vmem:[#allocation3 + $0x120] sm:$0xf] }
 0x623   :  { %v6782_v19 = vor.u32 %v7347_v16, %v6779_v59  ;;  %v6869_v32 = vld [vmem:[#allocation3 + $0xf8] sm:$0xf0]  ;;  %v7380_v23 = vld [vmem:[#allocation3 + $0x124] sm:$0xf0]  ;;  %v7382_v33 = vld [vmem:[#allocation3 + $0x134] sm:$0xf0] }
 0x624   :  { %v7381_v0 = vld [vmem:[#allocation3 + $0x134] sm:$0xf]  ;;  %v6959_v31 = vld [vmem:[#allocation3 + $0x138] sm:$0xf0] }
 0x625   :  { %4867 = vmatpush.bf16.msra.mxu1 %v7388_v15  ;;  %v7376_v15 = vld [vmem:[#allocation3 + $0x104] sm:$0xf0]  ;;  %v6962_v16 = vor.u32 %v7381_v0, %v6959_v31 }
 0x626   :  { %4676 = vmatpush.bf16.msrb.mxu0 %v7366_v8  ;;  %v6934_v21 = vor.u32 %v7376_v15, %v6933_v41  ;;  %v7377_v8 = vld [vmem:[#allocation3 + $0x114] sm:$0xf]  ;;  %v7393_v0 = vld [vmem:[%s10953_s7 + $0x8] sm:$0xff] }
 0x629   :  { %4868 = vmatpush.bf16.msra.mxu1 %v7387_v22  ;;  %v7378_v22 = vld [vmem:[#allocation3 + $0x114] sm:$0xf0] }
 0x62d   :  { %4869 = vmatpush.bf16.msra.mxu1 %v7386_v54  ;;  %v6943_v54 = vld [vmem:[#allocation3 + $0x118] sm:$0xf0] }
 0x62e   :  { %6659 = vmatmul.msk.bf16.gmra.mxu1 %vm4112_vm10, %v6612_v51  ;;  %v7345_v51 = vld [vmem:[#allocation3 + $0xa4] sm:$0xf]  ;;  %v6946_v13 = vor.u32 %v7377_v8, %v6943_v54 }
 0x62f   :  { %6731 = vmatmul.msk.bf16.gmra.mxu3 %vm4112_vm10, %v6684_v52  ;;  %v6770_v52 = vor.u32 %v7346_v3, %v6769_v29  ;;  %v6774_v1 = vor.u32 %v7345_v51, %v6771_v36 }
 0x631   :  { %4143 = vmatmul.bf16.gmra.mxu0 %v6608_v45  ;;  %4870 = vmatpush.bf16.msra.mxu1 %v7385_v30 }
 0x632   :  { %4303 = vmatmul.bf16.gmra.mxu2 %v6680_v48  ;;  %v6867_v48 = vld [vmem:[#allocation3 + $0xf0] sm:$0xf] }
 0x633   :  { %v6868_v9 = vor.u32 %v7365_v63, %v6867_v48  ;;  %v7398_v48 = vld [vmem:[%s10953_s7 + $0x30] sm:$0xff] }
 0x635   :  { %4871 = vmatpush.bf16.msra.mxu1 %v7384_v34  ;;  %v6950_v34 = vor.u32 %v7380_v23, %v6949_v7  ;;  %v7396_v23 = vld [vmem:[%s10953_s7 + $0x20] sm:$0xff] }
 0x639   :  { %4872 = vmatpush.bf16.msra.mxu1 %v7383_v25 }
 0x63e   :  { %6660 = vmatmul.msk.bf16.gmra.mxu1 %vm4112_vm10, %v6620_v61  ;;  %v7362_v61 = vld [vmem:[#allocation3 + $0xe4] sm:$0xf] }
 0x63f   :  { %6732 = vmatmul.msk.bf16.gmra.mxu3 %vm4112_vm10, %v6692_v62  ;;  %v6861_v62 = vld [vmem:[#allocation3 + $0xe8] sm:$0xf0] }
 0x640   :  { %v6864_v4 = vor.u32 %v7362_v61, %v6861_v62 }
 0x641   :  { %4148 = vmatmul.bf16.gmra.mxu0 %v6616_v56 }
 0x642   :  { %4308 = vmatmul.bf16.gmra.mxu2 %v6688_v20 }
 0x64e   :  { %4481 = vmatmul.bf16.vlgmr.msrb.gmra.mxu1 %v6754_v6  ;;  %v6872_v6 = vor.u32 %v7364_v18, %v6869_v32 }
 0x64f   :  { %6819 = vmatmul.msk.bf16.vlgmr.msrb.gmra.mxu3 %vm4112_vm10, %v6758_v17  ;;  %v6941_v17 = vld [vmem:[#allocation3 + $0x110] sm:$0xf] }
 0x650   :  { %v6942_v60 = vor.u32 %v7378_v22, %v6941_v17 }
 0x651   :  { %4677 = vmatmul.bf16.vlgmr.msrb.gmra.mxu0 %v6844_v5 }
 0x652   :  { %6909 = vmatmul.msk.bf16.vlgmr.msrb.gmra.mxu2 %vm4112_vm10, %v6848_v50 }
 0x65e   :  { %4486 = vmatmul.bf16.gmra.mxu1 %v6762_v40  ;;  %v7379_v40 = vld [vmem:[#allocation3 + $0x124] sm:$0xf] }
 0x65f   :  { %6820 = vmatmul.msk.bf16.gmra.mxu3 %vm4112_vm10, %v6766_v46  ;;  %v6951_v46 = vld [vmem:[#allocation3 + $0x128] sm:$0xf0] }
 0x660   :  { %v6954_v27 = vor.u32 %v7379_v40, %v6951_v46 }
 0x661   :  { %4682 = vmatmul.bf16.gmra.mxu0 %v6852_v14 }
 0x662   :  { %6910 = vmatmul.msk.bf16.gmra.mxu2 %vm4112_vm10, %v6856_v11 }
 0x66e   :  { %4491 = vmatmul.bf16.gmra.mxu1 %v6770_v52 }
 0x66f   :  { %6821 = vmatmul.msk.bf16.gmra.mxu3 %vm4112_vm10, %v6774_v1  ;;  %v6957_v1 = vld [vmem:[#allocation3 + $0x130] sm:$0xf] }
 0x670   :  { %v6958_v53 = vor.u32 %v7382_v33, %v6957_v1 }
 0x671   :  { %4687 = vmatmul.bf16.gmra.mxu0 %v6860_v26  ;;  %v4969_v26 = vld [vmem:[%s10953_s7 + $0x38] sm:$0xf] }
 0x672   :  { %6911 = vmatmul.msk.bf16.gmra.mxu2 %vm4112_vm10, %v6864_v4  ;;  %v5003_v41 = vunpack.c.l.b16 %v4969_v26 }
 0x67e   :  { %4496 = vmatmul.bf16.gmra.mxu1 %v6778_v37 }
 0x67f   :  { %6822 = vmatmul.msk.bf16.gmra.mxu3 %vm4112_vm10, %v6782_v19 }
 0x681   :  { %4692 = vmatmul.bf16.gmra.mxu0 %v6868_v9 }
 0x682   :  { %6912 = vmatmul.msk.bf16.gmra.mxu2 %vm4112_vm10, %v6872_v6 }
 0x68b   :  { %v4163_v44 = vpop.f32.mrf.mxu1 }
 0x68e   :  { %4873 = vmatmul.bf16.vlgmr.msra.gmra.mxu1 %v6934_v21  ;;  %v4134_v28 = vpop.f32.mrf.mxu0  ;;  %v5011_v21 = vpack.c.b16 %v5003_v41, %v5003_v41 }
 0x68f   :  { %6999 = vmatmul.msk.bf16.vlgmr.msra.gmra.mxu3 %vm4112_vm10, %v6938_v12  ;;  %v4164_v55 = vadd.f32 %v4163_v44, %v4134_v28 }
 0x692   :  { %v4323_v42 = vpop.f32.mrf.mxu3 }
 0x693   :  { %v4165_v45 = vpop.f32.mrf.mxu1 }
 0x695   :  { %v4294_v43 = vpop.f32.mrf.mxu2 }
 0x696   :  { %v4295_v57 = vadd.f32 %v4294_v43, %v4164_v55  ;;  %v4136_v5 = vpop.f32.mrf.mxu0 }
 0x697   :  { %v4166_v51 = vadd.f32 %v4165_v45, %v4136_v5  ;;  %v7395_v5 = vld [vmem:[%s10953_s7 + $0x18] sm:$0xff] }
 0x698   :  { %v4324_v50 = vadd.f32 %v4323_v42, %v4295_v57  ;;  %v5034_v42 = vsel %vm1504_vm2, %v5011_v21, 0 }
 0x699   :  { %5036 = vmatpush.bf16.msra.mxu0 %v5034_v42 }
 0x69a   :  { %v4325_v2 = vpop.f32.mrf.mxu3 }
 0x69b   :  { %v4168_v58 = vpop.f32.mrf.mxu1 }
 0x69d   :  { %v4296_v36 = vpop.f32.mrf.mxu2  ;;  %5037 = vmatpush.bf16.msra.mxu0 %v7398_v48 }
 0x69e   :  { %4878 = vmatmul.bf16.gmra.mxu1 %v6942_v60  ;;  %v4297_v52 = vadd.f32 %v4296_v36, %v4166_v51  ;;  %v4139_v25 = vpop.f32.mrf.mxu0 }
 0x69f   :  { %7000 = vmatmul.msk.bf16.gmra.mxu3 %vm4112_vm10, %v6946_v13  ;;  %v4169_v24 = vadd.f32 %v4168_v58, %v4139_v25 }
 0x6a0   :  { %v10818_v14 = vadd.f32 %v4325_v2, %v4297_v52  ;;  %v7397_v2 = vld [vmem:[%s10953_s7 + $0x28] sm:$0xff]  ;;  %v7394_v52 = vld [vmem:[%s10953_s7 + $0x10] sm:$0xff] }
 0x6a1   :  { %5038 = vmatpush.bf16.msra.mxu0 %v7397_v2 }
 0x6a2   :  { %v4328_v56 = vpop.f32.mrf.mxu3 }
 0x6a3   :  { %v4170_v20 = vpop.f32.mrf.mxu1 }
 0x6a5   :  { %v4299_v59 = vpop.f32.mrf.mxu2  ;;  %5039 = vmatpush.bf16.msra.mxu0 %v7396_v23 }
 0x6a6   :  { %v4300_v37 = vadd.f32 %v4299_v59, %v4169_v24  ;;  %v4141_v19 = vpop.f32.mrf.mxu0 }
 0x6a7   :  { %v4171_v62 = vadd.f32 %v4170_v20, %v4141_v19 }
 0x6a8   :  { %v4329_v38 = vadd.f32 %v4328_v56, %v4300_v37 }
 0x6a9   :  { %5040 = vmatpush.bf16.msra.mxu0 %v7395_v5 }
 0x6aa   :  { %v4330_v30 = vpop.f32.mrf.mxu3 }
 0x6ab   :  { %v4173_v39 = vpop.f32.mrf.mxu1 }
 0x6ad   :  { %v4301_v4 = vpop.f32.mrf.mxu2  ;;  %5041 = vmatpush.bf16.msra.mxu0 %v7394_v52 }
 0x6ae   :  { %4883 = vmatmul.bf16.gmra.mxu1 %v6950_v34  ;;  %v4302_v15 = vadd.f32 %v4301_v4, %v4171_v62  ;;  %v4144_v35 = vpop.f32.mrf.mxu0 }
 0x6af   :  { %7001 = vmatmul.msk.bf16.gmra.mxu3 %vm4112_vm10, %v6954_v27  ;;  %v4174_v47 = vadd.f32 %v4173_v39, %v4144_v35 }
 0x6b0   :  { %v10824_v44 = vadd.f32 %v4330_v30, %v4302_v15 }
 0x6b1   :  { %5042 = vmatpush.bf16.msra.mxu0 %v7393_v0 }
 0x6b2   :  { %v4333_v29 = vpop.f32.mrf.mxu3 }
 0x6b3   :  { %v4175_v3 = vpop.f32.mrf.mxu1 }
 0x6b5   :  { %v4304_v63 = vpop.f32.mrf.mxu2 }
 0x6b6   :  { %v4305_v18 = vadd.f32 %v4304_v63, %v4174_v47  ;;  %v4146_v32 = vpop.f32.mrf.mxu0 }
 0x6b7   :  { %v4176_v8 = vadd.f32 %v4175_v3, %v4146_v32 }
 0x6b8   :  { %v4334_v9 = vadd.f32 %v4333_v29, %v4305_v18  ;;  %v10870_v18 = vld [vmem:[%s10952_s6] ss:$0 sm:$0xff] }
 0x6ba   :  { %v4335_v11 = vpop.f32.mrf.mxu3 }
 0x6bb   :  { %v4178_v49 = vpop.f32.mrf.mxu1 }
 0x6bd   :  { %v4306_v60 = vpop.f32.mrf.mxu2 }
 0x6be   :  { %4888 = vmatmul.bf16.gmra.mxu1 %v6958_v53  ;;  %v4307_v58 = vadd.f32 %v4306_v60, %v4176_v8  ;;  %v4149_v13 = vpop.f32.mrf.mxu0 }
 0x6bf   :  { %7002 = vmatmul.msk.bf16.gmra.mxu3 %vm4112_vm10, %v6962_v16  ;;  %v4179_v56 = vadd.f32 %v4178_v49, %v4149_v13  ;;  %v7392_v16 = vld [vmem:[%s10953_s7] sm:$0xff] }
 0x6c0   :  { %v10833_v20 = vadd.f32 %v4335_v11, %v4307_v58  ;;  %5043 = vmatpush.bf16.msra.mxu0 %v7392_v16 }
 0x6c2   :  { %v4338_v10 = vpop.f32.mrf.mxu3 }
 0x6c3   :  { %v4180_v61 = vpop.f32.mrf.mxu1 }
 0x6c5   :  { %v4309_v55 = vpop.f32.mrf.mxu2 }
 0x6c6   :  { %v4310_v40 = vadd.f32 %v4309_v55, %v4179_v56  ;;  %v4151_v30 = vpop.f32.mrf.mxu0 }
 0x6c7   :  { %v4181_v43 = vadd.f32 %v4180_v61, %v4151_v30 }
 0x6c8   :  { %v4339_v46 = vadd.f32 %v4338_v10, %v4310_v40 }
 0x6ca   :  { %v4340_v12 = vpop.f32.mrf.mxu3 }
 0x6cb   :  { %v4482_v45 = vpop.f32.mrf.mxu1 }
 0x6ce   :  { %v4678_v53 = vpop.f32.mrf.mxu0 }
 0x6d2   :  { %v4511_v6 = vpop.f32.mrf.mxu3 }
 0x6d3   :  { %v4512_v17 = vadd.f32 %v4511_v6, %v4482_v45  ;;  %v4484_v22 = vpop.f32.mrf.mxu1 }
 0x6d5   :  { %v4531_v54 = vadd.f32 %v4512_v17, %v4324_v50  ;;  %v4311_v50 = vpop.f32.mrf.mxu2 }
 0x6d6   :  { %v4312_v29 = vadd.f32 %v4311_v50, %v4181_v43  ;;  %v4680_v10 = vpop.f32.mrf.mxu0 }
 0x6d8   :  { %v10843_v3 = vadd.f32 %v4340_v12, %v4312_v29 }
 0x6da   :  { %v4513_v28 = vpop.f32.mrf.mxu3 }
 0x6db   :  { %v4487_v7 = vpop.f32.mrf.mxu1  ;;  %v4514_v21 = vadd.f32 %v4513_v28, %v4484_v22 }
 0x6dd   :  { %v4707_v49 = vpop.f32.mrf.mxu2  ;;  %v4532_v48 = vadd.f32 %v4514_v21, %v10818_v14 }
 0x6de   :  { %v4683_v4 = vpop.f32.mrf.mxu0  ;;  %v4708_v35 = vadd.f32 %v4707_v49, %v4678_v53 }
 0x6e0   :  { %v4727_v42 = vadd.f32 %v4708_v35, %v4531_v54 }
 0x6e2   :  { %v4516_v34 = vpop.f32.mrf.mxu3 }
 0x6e3   :  { %v4517_v39 = vadd.f32 %v4516_v34, %v4487_v7  ;;  %v4489_v27 = vpop.f32.mrf.mxu1 }
 0x6e5   :  { %v10838_v57 = vadd.f32 %v4517_v39, %v4329_v38  ;;  %v4709_v61 = vpop.f32.mrf.mxu2 }
 0x6e6   :  { %v4710_v45 = vadd.f32 %v4709_v61, %v4680_v10  ;;  %v4685_v6 = vpop.f32.mrf.mxu0 }
 0x6ea   :  { %v4518_v51 = vpop.f32.mrf.mxu3 }
 0x6eb   :  { %v4492_v36 = vpop.f32.mrf.mxu1  ;;  %v4519_v23 = vadd.f32 %v4518_v51, %v4489_v27 }
 0x6ed   :  { %v4712_v41 = vpop.f32.mrf.mxu2  ;;  %v4534_v39 = vadd.f32 %v4519_v23, %v10824_v44 }
 0x6ee   :  { %v4713_v56 = vadd.f32 %v4712_v41, %v4683_v4  ;;  %v4688_v55 = vpop.f32.mrf.mxu0 }
 0x6f0   :  { %v4729_v30 = vadd.f32 %v4713_v56, %v10838_v57  ;;  %v7400_v56 = vld [vmem:[%s10955_s9 + $0x8] sm:$0xff] }
 0x6f2   :  { %v4521_v25 = vpop.f32.mrf.mxu3 }
 0x6f3   :  { %v4522_v1 = vadd.f32 %v4521_v25, %v4492_v36  ;;  %v10848_v33 = vpop.f32.mrf.mxu1 }
 0x6f5   :  { %v10850_v24 = vadd.f32 %v4522_v1, %v4334_v9  ;;  %v4728_v9 = vadd.f32 %v4710_v45, %v4532_v48  ;;  %v4714_v2 = vpop.f32.mrf.mxu2 }
 0x6f6   :  { %v4715_v34 = vadd.f32 %v4714_v2, %v4685_v6  ;;  %v4690_v1 = vpop.f32.mrf.mxu0  ;;  %v7401_v2 = vld [vmem:[%s10955_s9 + $0x10] sm:$0xff] }
 0x6f8   :  { %v4730_v50 = vadd.f32 %v4715_v34, %v4534_v39 }
 0x6fa   :  { %v10855_v31 = vpop.f32.mrf.mxu3 }
 0x6fb   :  { %v4497_v11 = vpop.f32.mrf.mxu1  ;;  %v4524_v44 = vadd.f32 %v10855_v31, %v10848_v33 }
 0x6fd   :  { %v4536_v41 = vadd.f32 %v4524_v44, %v10833_v20  ;;  %v7402_v20 = vld [vmem:[%s10955_s9 + $0x18] sm:$0xff] }
 0x702   :  { %v4526_v59 = vpop.f32.mrf.mxu3 }
 0x703   :  { %v4527_v37 = vadd.f32 %v4526_v59, %v4497_v11  ;;  %v10860_v19 = vpop.f32.mrf.mxu1  ;;  %v5087_v59 = vld [vmem:[%s10955_s9 + $0x28] sm:$0x3] }
 0x704   :  { %v5113_v10 = vunpack.c.l.b16 %v5087_v59 }
 0x705   :  { %v10862_v38 = vadd.f32 %v4527_v37, %v4339_v46  ;;  %v4717_v46 = vpop.f32.mrf.mxu2 }
 0x706   :  { %v4718_v49 = vadd.f32 %v4717_v46, %v4688_v55  ;;  %v5119_v4 = vpack.c.b16 %v5113_v10, %v5113_v10 }
 0x708   :  { %v4731_v61 = vadd.f32 %v4718_v49, %v10850_v24  ;;  %v5140_v31 = vsel %vm5138_vm12, %v5119_v4, 0 }
 0x709   :  { %5144 = vmatpush.bf16.msra.mxu2 %v5140_v31  ;;  %v7504_v31 = vld [vmem:[%s10956_s10] ss:$0 sm:$0xff] }
 0x70a   :  { %v10864_v62 = vpop.f32.mrf.mxu3 }
 0x70b   :  { %v4874_v26 = vpop.f32.mrf.mxu1 }
 0x70d   :  { %v4719_v51 = vpop.f32.mrf.mxu2 }
 0x712   :  { %v4903_v15 = vpop.f32.mrf.mxu3 }
 0x713   :  { %v4876_v47 = vpop.f32.mrf.mxu1  ;;  %v4904_v12 = vadd.f32 %v4903_v15, %v4874_v26  ;;  %v4720_v26 = vadd.f32 %v4719_v51, %v4690_v1  ;;  %v4693_v15 = vpop.f32.mrf.mxu0 }
 0x715   :  { %v4923_v63 = vadd.f32 %v4904_v12, %v4727_v42  ;;  %v4732_v21 = vadd.f32 %v4720_v26, %v4536_v41  ;;  %v7403_v42 = vld [vmem:[%s10955_s9 + $0x20] sm:$0xff] }
 0x716   :  { %5145 = vmatpush.bf16.msra.mxu2 %v7403_v42 }
 0x717   :  { %v4935_v60 = vadd.f32 %v10870_v18, %v4923_v63 }
 0x719   :  { %v4943_v58 = vmax.f32 %v4935_v60, 0.0 }
 0x71a   :  { %v4905_v32 = vpop.f32.mrf.mxu3  ;;  %5146 = vmatpush.bf16.msra.mxu2 %v7402_v20 }
 0x71b   :  { %v4906_v17 = vadd.f32 %v4905_v32, %v4876_v47  ;;  %v4879_v8 = vpop.f32.mrf.mxu1  ;;  %v4722_v47 = vpop.f32.mrf.mxu2 }
 0x71c   :  { %v4695_v60 = vpop.f32.mrf.mxu0 }
 0x71d   :  { %v4924_v22 = vadd.f32 %v4906_v17, %v4728_v9  ;;  %v4723_v17 = vadd.f32 %v4722_v47, %v4693_v15 }
 0x71e   :  { %5147 = vmatpush.bf16.msra.mxu2 %v7401_v2 }
 0x71f   :  { %v4936_v54 = vadd.f32 %v10870_v18, %v4924_v22 }
 0x721   :  { %v4944_v13 = vmax.f32 %v4936_v54, 0.0  ;;  %v4529_v54 = vadd.f32 %v10864_v62, %v10860_v19 }
 0x722   :  { %v4908_v14 = vpop.f32.mrf.mxu3  ;;  %5148 = vmatpush.bf16.msra.mxu2 %v7400_v56 }
 0x723   :  { %v4951_v28 = vpack.c.bf16 %v4944_v13, %v4943_v58  ;;  %v4881_v7 = vpop.f32.mrf.mxu1  ;;  %v4909_v40 = vadd.f32 %v4908_v14, %v4879_v8  ;;  %v4724_v22 = vpop.f32.mrf.mxu2  ;;  %v4733_v13 = vadd.f32 %v4723_v17, %v10862_v38 }
 0x724   :  { %v4725_v14 = vadd.f32 %v4724_v22, %v4695_v60 }
 0x725   :  { %7031 = vmatmul.msk.bf16.vlgmr.msra.gmra.mxu0 %vm5019_vm11, %v4951_v28  ;;  %v4925_v43 = vadd.f32 %v4909_v40, %v4729_v30  ;;  %v4538_v28 = vadd.f32 %v4529_v54, %v10843_v3  ;;  %v7399_v3 = vld [vmem:[%s10955_s9] sm:$0xff] }
 0x726   :  { %5149 = vmatpush.bf16.msra.mxu2 %v7399_v3 }
 0x727   :  { %v4937_v52 = vadd.f32 %v10870_v18, %v4925_v43  ;;  %v4734_v40 = vadd.f32 %v4725_v14, %v4538_v28 }
 0x729   :  { %v4945_v0 = vmax.f32 %v4937_v52, 0.0 }
 0x72a   :  { %v4910_v5 = vpop.f32.mrf.mxu3 }
 0x72b   :  { %v4911_v29 = vadd.f32 %v4910_v5, %v4881_v7  ;;  %v4884_v36 = vpop.f32.mrf.mxu1  ;;  %v7503_v5 = vld [vmem:[%s10954_s8] ss:$0 sm:$0xff] }
 0x72d   :  { %v4926_v25 = vadd.f32 %v4911_v29, %v4730_v50 }
 0x72f   :  { %v4938_v27 = vadd.f32 %v10870_v18, %v4926_v25 }
 0x731   :  { %v4946_v11 = vmax.f32 %v4938_v27, 0.0 }
 0x732   :  { %v4913_v53 = vpop.f32.mrf.mxu3 }
 0x733   :  { %v4952_v57 = vpack.c.bf16 %v4946_v11, %v4945_v0  ;;  %v4914_v16 = vadd.f32 %v4913_v53, %v4884_v36  ;;  %v4886_v37 = vpop.f32.mrf.mxu1 }
 0x735   :  { %7032 = vmatmul.msk.bf16.gmra.mxu0 %vm5019_vm11, %v4952_v57  ;;  %v4927_v35 = vadd.f32 %v4914_v16, %v4731_v61 }
 0x737   :  { %v4939_v45 = vadd.f32 %v10870_v18, %v4927_v35 }
 0x739   :  { %v4947_v32 = vmax.f32 %v4939_v45, 0.0 }
 0x73a   :  { %v4915_v33 = vpop.f32.mrf.mxu3 }
 0x73b   :  { %v4916_v12 = vadd.f32 %v4915_v33, %v4886_v37  ;;  %v4889_v63 = vpop.f32.mrf.mxu1 }
 0x73d   :  { %v4928_v24 = vadd.f32 %v4916_v12, %v4732_v21 }
 0x73f   :  { %v4940_v48 = vadd.f32 %v10870_v18, %v4928_v24 }
 0x741   :  { %v4948_v9 = vmax.f32 %v4940_v48, 0.0 }
 0x742   :  { %v4918_v6 = vpop.f32.mrf.mxu3 }
 0x743   :  { %v4953_v8 = vpack.c.bf16 %v4948_v9, %v4947_v32  ;;  %v4919_v58 = vadd.f32 %v4918_v6, %v4889_v63  ;;  %v4891_v23 = vpop.f32.mrf.mxu1 }
 0x745   :  { %7033 = vmatmul.msk.bf16.gmra.mxu0 %vm5019_vm11, %v4953_v8  ;;  %v4929_v7 = vadd.f32 %v4919_v58, %v4733_v13 }
 0x747   :  { %v4941_v19 = vadd.f32 %v10870_v18, %v4929_v7 }
 0x749   :  { %v4949_v38 = vmax.f32 %v4941_v19, 0.0 }
 0x74a   :  { %v4920_v55 = vpop.f32.mrf.mxu3 }
 0x74b   :  { %v4921_v46 = vadd.f32 %v4920_v55, %v4891_v23 }
 0x74d   :  { %v4930_v62 = vadd.f32 %v4921_v46, %v4734_v40 }
 0x74f   :  { %v4942_v30 = vadd.f32 %v10870_v18, %v4930_v62 }
 0x751   :  { %v4950_v34 = vmax.f32 %v4942_v30, 0.0 }
 0x753   :  { %v4954_v39 = vpack.c.bf16 %v4950_v34, %v4949_v38 }
 0x755   :  { %7034 = vmatmul.msk.bf16.gmra.mxu0 %vm5019_vm11, %v4954_v39 }
 0x7a2   :  { %v5045_v43 = vpop.f32.mrf.mxu0 }
 0x7a3   :  { %v5046_v50 = vadd.f32 %v7503_v5, %v5045_v43 }
 0x7a5   :  { %v5065_v52 = vmax.f32 %v5046_v50, 0.0 }
 0x7aa   :  { %v5047_v29 = vpop.f32.mrf.mxu0 }
 0x7ab   :  { %v5048_v36 = vadd.f32 %v7503_v5, %v5047_v29 }
 0x7ad   :  { %v5066_v18 = vmax.f32 %v5048_v36, 0.0 }
 0x7af   :  { %v5073_v25 = vpack.c.bf16 %v5066_v18, %v5065_v52 }
 0x7b1   :  { %7055 = vmatmul.msk.bf16.vlgmr.msra.gmra.mxu2 %vm5125_vm13, %v5073_v25 }
 0x7b2   :  { %v5050_v1 = vpop.f32.mrf.mxu0 }
 0x7b3   :  { %v5051_v27 = vadd.f32 %v7503_v5, %v5050_v1 }
 0x7b5   :  { %v5067_v11 = vmax.f32 %v5051_v27, 0.0 }
 0x7ba   :  { %v5052_v51 = vpop.f32.mrf.mxu0 }
 0x7bb   :  { %v5053_v0 = vadd.f32 %v7503_v5, %v5052_v51 }
 0x7bd   :  { %v5068_v53 = vmax.f32 %v5053_v0, 0.0 }
 0x7bf   :  { %v5074_v49 = vpack.c.bf16 %v5068_v53, %v5067_v11 }
 0x7c1   :  { %7056 = vmatmul.msk.bf16.gmra.mxu2 %vm5125_vm13, %v5074_v49 }
 0x7c2   :  { %v5055_v57 = vpop.f32.mrf.mxu0 }
 0x7c3   :  { %v5056_v44 = vadd.f32 %v7503_v5, %v5055_v57 }
 0x7c5   :  { %v5069_v37 = vmax.f32 %v5056_v44, 0.0 }
 0x7ca   :  { %v5057_v16 = vpop.f32.mrf.mxu0 }
 0x7cb   :  { %v5058_v59 = vadd.f32 %v7503_v5, %v5057_v16 }
 0x7cd   :  { %v5070_v10 = vmax.f32 %v5058_v59, 0.0 }
 0x7cf   :  { %v5075_v61 = vpack.c.bf16 %v5070_v10, %v5069_v37 }
 0x7d1   :  { %7057 = vmatmul.msk.bf16.gmra.mxu2 %vm5125_vm13, %v5075_v61 }
 0x7d2   :  { %v5060_v26 = vpop.f32.mrf.mxu0 }
 0x7d3   :  { %v5061_v4 = vadd.f32 %v7503_v5, %v5060_v26 }
 0x7d5   :  { %v5071_v35 = vmax.f32 %v5061_v4, 0.0 }
 0x7da   :  { %v5062_v41 = vpop.f32.mrf.mxu0 }
 0x7db   :  { %v5063_v15 = vadd.f32 %v7503_v5, %v5062_v41 }
 0x7dd   :  { %v5072_v47 = vmax.f32 %v5063_v15, 0.0 }
 0x7df   :  { %v5076_v33 = vpack.c.bf16 %v5072_v47, %v5071_v35 }
 0x7e1   :  { %7058 = vmatmul.msk.bf16.gmra.mxu2 %vm5125_vm13, %v5076_v33 }
 0x834   :  { %v5151_v21 = vpop.f32.mrf.mxu2 }
 0x835   :  { %v5152_v12 = vadd.f32 %v7504_v31, %v5151_v21 }
 0x837   :  { %5171 = vst [vmem:[%s10957_s11] sm:$0xff] %v5152_v12 }
 0x83c   :  { %v5153_v42 = vpop.f32.mrf.mxu2 }
 0x83d   :  { %v5154_v45 = vadd.f32 %v7504_v31, %v5153_v42 }
 0x83f   :  { %5172 = vst [vmem:[%s10957_s11 + $0x8] sm:$0xff] %v5154_v45 }
 0x844   :  { %v5156_v24 = vpop.f32.mrf.mxu2 }
 0x845   :  { %v5157_v48 = vadd.f32 %v7504_v31, %v5156_v24 }
 0x847   :  { %5173 = vst [vmem:[%s10957_s11 + $0x10] sm:$0xff] %v5157_v48 }
 0x84c   :  { %v5158_v20 = vpop.f32.mrf.mxu2 }
 0x84d   :  { %v5159_v63 = vadd.f32 %v7504_v31, %v5158_v20 }
 0x84f   :  { %5174 = vst [vmem:[%s10957_s11 + $0x18] sm:$0xff] %v5159_v63 }
 0x854   :  { %v5161_v32 = vpop.f32.mrf.mxu2 }
 0x855   :  { %v5162_v9 = vadd.f32 %v7504_v31, %v5161_v32 }
 0x857   :  { %5175 = vst [vmem:[%s10957_s11 + $0x20] sm:$0xff] %v5162_v9 }
 0x85c   :  { %v5163_v6 = vpop.f32.mrf.mxu2 }
 0x85d   :  { %v5164_v17 = vadd.f32 %v7504_v31, %v5163_v6 }
 0x85f   :  { %5176 = vst [vmem:[%s10957_s11 + $0x28] sm:$0xff] %v5164_v17 }
 0x864   :  { %v5166_v8 = vpop.f32.mrf.mxu2 }
 0x865   :  { %v5167_v2 = vadd.f32 %v7504_v31, %v5166_v8 }
 0x867   :  { %5177 = vst [vmem:[%s10957_s11 + $0x30] sm:$0xff] %v5167_v2 }
 0x86c   :  { %v5168_v60 = vpop.f32.mrf.mxu2 }
 0x86d   :  { %v5169_v22 = vadd.f32 %v7504_v31, %v5168_v60 }
 0x86f   :  { %5178 = vst [vmem:[%s10957_s11 + $0x38] sm:$0xff] %v5169_v22 }

</bundles_post_ra>
